<compile_context>
chip_gen: v6e
topology: v6e:2x2x1
jax: 0.10.0
libtpu: 0.0.40
codegen_flags: <defaults>
</compile_context>

<pallas_src>
import jax
import jax.numpy as jnp
from jax.experimental import pallas as pl
from jax.experimental.pallas import tpu as pltpu

N_ACTIONS = 20
LEN_SEQUENCE = 237
LEN_ONEHOT = N_ACTIONS * LEN_SEQUENCE  # 4740 -- fixed by the module's forward


def _round_up(n, m):
    return -(-n // m) * m


def _mlp_kernel(x_ref,
                w1_ref, b1_ref,
                w2_ref, b2_ref,
                w3_ref, b3_ref,
                w4_ref, b4_ref,
                o_ref):
    """Fused MLP: relu(relu(relu(x@W1+b1)@W2+b2)@W3+b3) . w4 + b4."""
    # x already arrives in the weights' dtype (bf16); accumulate in f32.
    h = jnp.dot(x_ref[...], w1_ref[...],
                preferred_element_type=jnp.float32) + b1_ref[...]
    h = jnp.maximum(h, 0.0).astype(w2_ref.dtype)

    h = jnp.dot(h, w2_ref[...], preferred_element_type=jnp.float32) + b2_ref[...]
    h = jnp.maximum(h, 0.0).astype(w3_ref.dtype)

    h = jnp.dot(h, w3_ref[...], preferred_element_type=jnp.float32) + b3_ref[...]
    h = jnp.maximum(h, 0.0)                        # keep f32 for the reduction

    # Final layer has out-dim 1: a (block_b, n_hid) @ (n_hid, 1) matmul would
    # use 1/256 of the MXU columns, so run it on the otherwise-idle VPU/XLU.
    w4 = w4_ref[...].astype(jnp.float32)           # (1, n_hid) row
    o_ref[...] = (jnp.sum(h * w4, axis=-1, keepdims=True)
                  + b4_ref[...]).astype(o_ref.dtype)


def _physical_vmem_bytes(default_bytes=64 << 20):
    """Per-core physical VMEM (v5e/v6e: 128 MiB, v7x: 64 MiB)."""
    try:
        cap = int(getattr(pltpu.get_tpu_info(), "vmem_capacity_bytes", 0))
        if cap > 0:
            return cap
    except Exception:
        # Narrow purpose: hardware-query fallback only (not a compile retry).
        pass
    return default_bytes  # most conservative generation (v7x)


def _vmem_estimate(w_bytes, block_b, d_in, n_hid, x_itemsize):
    """Working-set estimate: resident weights + double-buffered x/out tiles +
    ~3 live f32 activation buffers, plus Mosaic scratch/alignment headroom."""
    x_tile = block_b * d_in * x_itemsize
    out_tile = block_b * 4
    act = 3 * block_b * n_hid * 4
    est = w_bytes + 2 * x_tile + 2 * out_tile + act
    return int(est * 1.15) + (2 << 20)


def _choose_block_b(batch, requested):
    """Batch tile: multiple of 8 (sublanes), preferably 128 (MXU rows), sized
    to keep >= ~4 grid steps (2 per v7x TensorCore x 2-deep pipeline)."""
    if batch <= 128:
        return _round_up(max(batch, 8), 8)
    cap = max(128, _round_up(batch // 4, 128))
    return int(min(_round_up(requested, 128), cap))


def gfp_reward_forward(x, params, *, block_b=256):
    """x: (B, LEN_ONEHOT) float -> (B, 1) float32."""
    # TODO(synk): if callers can guarantee x is a true one-hot over (20 actions
    # x 237 positions), layer 1 should become a scalar-prefetched gather-sum of
    # 237 rows of W1, cutting ~90% of the FLOPs and most of the input DMA;
    # kept as a dense GEMM here to preserve the module's dense-input semantics.
    assert len(params) == 4, "fused kernel expects exactly 4 linear layers"
    (w1, _), _, _, (w4, b4) = params
    B, d_in = x.shape
    assert d_in == w1.shape[0] == LEN_ONEHOT
    n_hid = w1.shape[1]
    assert w4.shape == (1, n_hid) and b4.shape == (1, 1)

    # The x tile is the only per-grid-step HBM stream: send it in the MXU dtype.
    x = x.astype(w1.dtype)

    block_b = _choose_block_b(B, block_b)

    vmem_cap = _physical_vmem_bytes()
    w_bytes = sum(int(w.size) * w.dtype.itemsize + int(b.size) * b.dtype.itemsize
                  for (w, b) in params)

    # Shrink the batch tile (never the resident weights) until the working set
    # fits the physical per-core VMEM -- no silent clamping.
    while (block_b > 8 and
           _vmem_estimate(w_bytes, block_b, d_in, n_hid,
                          x.dtype.itemsize) > vmem_cap):
        block_b = max(8, _round_up(block_b // 2, 8))
    vmem_need = _vmem_estimate(w_bytes, block_b, d_in, n_hid, x.dtype.itemsize)
    if vmem_need > vmem_cap:
        # TODO(synk): stream W1 over a K-tiled inner ("arbitrary") grid axis
        # with an f32 accumulator + pl.when init when the resident weights
        # alone exceed physical VMEM (only needed for n_hid far above 2048).
        raise ValueError(
            f"resident weights ({w_bytes / 2**20:.1f} MiB) do not fit the "
            f"{vmem_cap / 2**20:.0f} MiB per-core VMEM budget")
    vmem_limit = int(min(max(vmem_need, 32 << 20), vmem_cap))

    # Ragged batch: cdiv grid + rounded-up out_shape; tail rows are garbage
    # (OOB input reads) and are sliced off below -- no jnp.pad copy of x.
    num_blocks = int(pl.cdiv(B, block_b))
    b_padded = num_blocks * block_b

    flat = []
    for (w, b) in params:
        flat += [w, b]

    # Weights/biases: whole-array VMEM residents (exactly one copy, loaded
    # once in the prologue, no per-step pipelining / double buffering).
    in_specs = [pl.BlockSpec((block_b, d_in), lambda i: (i, 0))]
    in_specs += [pl.BlockSpec(memory_space=pltpu.MemorySpace.VMEM)
                 for _ in range(2 * len(params))]

    out = pl.pallas_call(
        _mlp_kernel,
        out_shape=jax.ShapeDtypeStruct((b_padded, 1), jnp.float32),
        grid_spec=pltpu.PrefetchScalarGridSpec(
            num_scalar_prefetch=0,
            grid=(num_blocks,),
            in_specs=in_specs,
            out_specs=pl.BlockSpec((block_b, 1), lambda i: (i, 0)),
        ),
        compiler_params=pltpu.CompilerParams(
            dimension_semantics=("parallel",),   # batch axis shards across TCs
            vmem_limit_bytes=vmem_limit,
        ),
    )(x, *flat)
    return out[:B]


def init_gfp_reward_params(key, n_hid=256, n_hidden_layers=2,
                           weight_dtype=jnp.bfloat16):
    """nn.Linear-style U(-1/sqrt(fan_in), +1/sqrt(fan_in)) init.

    Weights are cast to `weight_dtype` (bf16 halves VMEM/HBM traffic and
    doubles the MXU rate); biases stay f32. The output-layer weight is stored
    as a (1, n_hid) row for the in-kernel VPU reduction.
    """
    assert n_hidden_layers == 2, (
        "fused kernel is specialised to the module default of 2 hidden layers")
    dims = [LEN_ONEHOT] + [n_hid] * (1 + n_hidden_layers) + [1]
    params = []
    for fan_in, fan_out in zip(dims[:-1], dims[1:]):
        key, kw, kb = jax.random.split(key, 3)
        bound = 1.0 / jnp.sqrt(float(fan_in))
        w = jax.random.uniform(kw, (fan_in, fan_out), jnp.float32, -bound, bound)
        b = jax.random.uniform(kb, (1, fan_out), jnp.float32, -bound, bound)
        if fan_out == 1:
            w = w.T                      # store final-layer weight as (1, n_hid)
        params.append((w.astype(weight_dtype), b))
    return params


def _reference_forward(x, params):
    """Pure-JAX reference with the same bf16-weight / f32-accumulate math."""
    (w1, b1), (w2, b2), (w3, b3), (w4, b4) = params
    h = jnp.maximum(jnp.dot(x.astype(w1.dtype), w1,
                            preferred_element_type=jnp.float32) + b1, 0.0)
    h = jnp.maximum(jnp.dot(h.astype(w2.dtype), w2,
                            preferred_element_type=jnp.float32) + b2, 0.0)
    h = jnp.maximum(jnp.dot(h.astype(w3.dtype), w3,
                            preferred_element_type=jnp.float32) + b3, 0.0)
    return jnp.sum(h * w4.astype(jnp.float32), axis=-1, keepdims=True) + b4


if __name__ == "__main__":
    key = jax.random.PRNGKey(0)
    k_param, k_x = jax.random.split(key)

    # Small-but-faithful shapes: the input feature dim is fixed at 20*237=4740
    # by the module's forward; n_hid shrunk from 2048 -> 256 for a quick run.
    # batch=512 -> block_b=128 -> 4 grid steps (>= 2 per v7x TensorCore).
    n_hid = 256
    batch = 512

    params = init_gfp_reward_params(k_param, n_hid=n_hid, n_hidden_layers=2)
    x = jax.random.uniform(k_x, (batch, LEN_ONEHOT), jnp.float32)

    out = jax.block_until_ready(gfp_reward_forward(x, params))
    ref = _reference_forward(x, params)
    assert out.shape == (batch, 1)
    max_err = float(jnp.max(jnp.abs(out - ref)))
    assert jnp.allclose(out, ref, atol=1e-2, rtol=1e-2), max_err

    # Ragged batch path: cdiv grid, no jnp.pad copy, tail rows discarded.
    xr = x[:300]
    out_r = jax.block_until_ready(gfp_reward_forward(xr, params))
    ref_r = _reference_forward(xr, params)
    assert out_r.shape == (300, 1)
    max_err_r = float(jnp.max(jnp.abs(out_r - ref_r)))
    assert jnp.allclose(out_r, ref_r, atol=1e-2, rtol=1e-2), max_err_r

    print("KERNEL_OK")
</pallas_src>

<mosaic_0001>
module attributes {stable_mosaic.version = 11 : i64} {
  func.func @_mlp_kernel(%arg0: i32, %arg1: memref<128x4740xbf16, #tpu.memory_space<vmem>>, %arg2: memref<4740x256xbf16, #tpu.memory_space<vmem>>, %arg3: memref<1x256xf32, #tpu.memory_space<vmem>>, %arg4: memref<256x256xbf16, #tpu.memory_space<vmem>>, %arg5: memref<1x256xf32, #tpu.memory_space<vmem>>, %arg6: memref<256x256xbf16, #tpu.memory_space<vmem>>, %arg7: memref<1x256xf32, #tpu.memory_space<vmem>>, %arg8: memref<1x256xbf16, #tpu.memory_space<vmem>>, %arg9: memref<1x1xf32, #tpu.memory_space<vmem>>, %arg10: memref<128x1xf32, #tpu.memory_space<vmem>>) attributes {dimension_semantics = [#tpu.dimension_semantics<parallel>], iteration_bounds = array<i64: 4>, scalar_prefetch = 0 : i64, scratch_operands = 0 : i64, tpu.core_type = #tpu.core_type<tc>, window_params = [{transform_indices = @transform_0, window_bounds = array<i64: 128, 4740>}, {pipeline_mode = #tpu.pipeline_mode<synchronous>, transform_indices = @transform_1, window_bounds = array<i64: 4740, 256>}, {pipeline_mode = #tpu.pipeline_mode<synchronous>, transform_indices = @transform_2, window_bounds = array<i64: 1, 256>}, {pipeline_mode = #tpu.pipeline_mode<synchronous>, transform_indices = @transform_3, window_bounds = array<i64: 256, 256>}, {pipeline_mode = #tpu.pipeline_mode<synchronous>, transform_indices = @transform_4, window_bounds = array<i64: 1, 256>}, {pipeline_mode = #tpu.pipeline_mode<synchronous>, transform_indices = @transform_5, window_bounds = array<i64: 256, 256>}, {pipeline_mode = #tpu.pipeline_mode<synchronous>, transform_indices = @transform_6, window_bounds = array<i64: 1, 256>}, {pipeline_mode = #tpu.pipeline_mode<synchronous>, transform_indices = @transform_7, window_bounds = array<i64: 1, 256>}, {pipeline_mode = #tpu.pipeline_mode<synchronous>, transform_indices = @transform_8, window_bounds = array<i64: 1, 1>}, {transform_indices = @transform_9, window_bounds = array<i64: 128, 1>}]} {
    %c0 = arith.constant 0 : index
    %c0_0 = arith.constant 0 : index
    %0 = vector.load %arg1[%c0, %c0_0] : memref<128x4740xbf16, #tpu.memory_space<vmem>>, vector<128x4740xbf16>
    %c0_1 = arith.constant 0 : index
    %c0_2 = arith.constant 0 : index
    %1 = vector.load %arg2[%c0_1, %c0_2] : memref<4740x256xbf16, #tpu.memory_space<vmem>>, vector<4740x256xbf16>
    %cst = arith.constant dense<0.000000e+00> : vector<128x256xf32>
    %2 = tpu.matmul %0, %1, %cst {dimension_numbers = #tpu.dot_dimension_numbers<[1], [0], [0], [1], [0, 0, 1, 1], [], []>} : vector<128x4740xbf16>, vector<4740x256xbf16>, vector<128x256xf32> -> vector<128x256xf32>
    %c0_3 = arith.constant 0 : index
    %c0_4 = arith.constant 0 : index
    %3 = vector.load %arg3[%c0_3, %c0_4] : memref<1x256xf32, #tpu.memory_space<vmem>>, vector<1x256xf32>
    %4 = vector.broadcast %3 : vector<1x256xf32> to vector<128x256xf32>
    %5 = arith.addf %2, %4 : vector<128x256xf32>
    %cst_5 = arith.constant 0.000000e+00 : f32
    %6 = vector.broadcast %cst_5 : f32 to vector<128x256xf32>
    %7 = arith.maximumf %5, %6 : vector<128x256xf32>
    %8 = arith.truncf %7 : vector<128x256xf32> to vector<128x256xbf16>
    %c0_6 = arith.constant 0 : index
    %c0_7 = arith.constant 0 : index
    %9 = vector.load %arg4[%c0_6, %c0_7] : memref<256x256xbf16, #tpu.memory_space<vmem>>, vector<256x256xbf16>
    %cst_8 = arith.constant dense<0.000000e+00> : vector<128x256xf32>
    %10 = tpu.matmul %8, %9, %cst_8 {dimension_numbers = #tpu.dot_dimension_numbers<[1], [0], [0], [1], [0, 0, 1, 1], [], []>} : vector<128x256xbf16>, vector<256x256xbf16>, vector<128x256xf32> -> vector<128x256xf32>
    %c0_9 = arith.constant 0 : index
    %c0_10 = arith.constant 0 : index
    %11 = vector.load %arg5[%c0_9, %c0_10] : memref<1x256xf32, #tpu.memory_space<vmem>>, vector<1x256xf32>
    %12 = vector.broadcast %11 : vector<1x256xf32> to vector<128x256xf32>
    %13 = arith.addf %10, %12 : vector<128x256xf32>
    %cst_11 = arith.constant 0.000000e+00 : f32
    %14 = vector.broadcast %cst_11 : f32 to vector<128x256xf32>
    %15 = arith.maximumf %13, %14 : vector<128x256xf32>
    %16 = arith.truncf %15 : vector<128x256xf32> to vector<128x256xbf16>
    %c0_12 = arith.constant 0 : index
    %c0_13 = arith.constant 0 : index
    %17 = vector.load %arg6[%c0_12, %c0_13] : memref<256x256xbf16, #tpu.memory_space<vmem>>, vector<256x256xbf16>
    %cst_14 = arith.constant dense<0.000000e+00> : vector<128x256xf32>
    %18 = tpu.matmul %16, %17, %cst_14 {dimension_numbers = #tpu.dot_dimension_numbers<[1], [0], [0], [1], [0, 0, 1, 1], [], []>} : vector<128x256xbf16>, vector<256x256xbf16>, vector<128x256xf32> -> vector<128x256xf32>
    %c0_15 = arith.constant 0 : index
    %c0_16 = arith.constant 0 : index
    %19 = vector.load %arg7[%c0_15, %c0_16] : memref<1x256xf32, #tpu.memory_space<vmem>>, vector<1x256xf32>
    %20 = vector.broadcast %19 : vector<1x256xf32> to vector<128x256xf32>
    %21 = arith.addf %18, %20 : vector<128x256xf32>
    %cst_17 = arith.constant 0.000000e+00 : f32
    %22 = vector.broadcast %cst_17 : f32 to vector<128x256xf32>
    %23 = arith.maximumf %21, %22 : vector<128x256xf32>
    %c0_18 = arith.constant 0 : index
    %c0_19 = arith.constant 0 : index
    %24 = vector.load %arg8[%c0_18, %c0_19] : memref<1x256xbf16, #tpu.memory_space<vmem>>, vector<1x256xbf16>
    %25 = arith.extf %24 : vector<1x256xbf16> to vector<1x256xf32>
    %26 = vector.broadcast %25 : vector<1x256xf32> to vector<128x256xf32>
    %27 = arith.mulf %23, %26 : vector<128x256xf32>
    %cst_20 = arith.constant dense<0.000000e+00> : vector<128xf32>
    %28 = vector.multi_reduction <add>, %27, %cst_20 [1] : vector<128x256xf32> to vector<128xf32>
    %29 = vector.shape_cast %28 : vector<128xf32> to vector<128x1xf32>
    %c0_21 = arith.constant 0 : index
    %c0_22 = arith.constant 0 : index
    %30 = vector.load %arg9[%c0_21, %c0_22] : memref<1x1xf32, #tpu.memory_space<vmem>>, vector<1x1xf32>
    %31 = vector.broadcast %30 : vector<1x1xf32> to vector<128x1xf32>
    %32 = arith.addf %29, %31 : vector<128x1xf32>
    %c0_23 = arith.constant 0 : index
    %c0_24 = arith.constant 0 : index
    %33 = vector.load %arg10[%c0_23, %c0_24] : memref<128x1xf32, #tpu.memory_space<vmem>>, vector<128x1xf32>
    tpu.vector_store %arg10[%c0_23, %c0_24], %32 {strides = array<i32>} : memref<128x1xf32, #tpu.memory_space<vmem>>, vector<128x1xf32>,
    return
  }
  func.func @transform_0(%arg0: i32) -> (i32, i32) {
    %c0_i32 = arith.constant 0 : i32
    %c0_i32_0 = arith.constant 0 : i32
    return %arg0, %c0_i32 : i32, i32
  }
  func.func @transform_1(%arg0: i32) -> (i32, i32) {
    %c0_i32 = arith.constant 0 : i32
    %c0_i32_0 = arith.constant 0 : i32
    %c0_i32_1 = arith.constant 0 : i32
    return %c0_i32, %c0_i32_0 : i32, i32
  }
  func.func @transform_2(%arg0: i32) -> (i32, i32) {
    %c0_i32 = arith.constant 0 : i32
    %c0_i32_0 = arith.constant 0 : i32
    %c0_i32_1 = arith.constant 0 : i32
    return %c0_i32, %c0_i32_0 : i32, i32
  }
  func.func @transform_3(%arg0: i32) -> (i32, i32) {
    %c0_i32 = arith.constant 0 : i32
    %c0_i32_0 = arith.constant 0 : i32
    %c0_i32_1 = arith.constant 0 : i32
    return %c0_i32, %c0_i32_0 : i32, i32
  }
  func.func @transform_4(%arg0: i32) -> (i32, i32) {
    %c0_i32 = arith.constant 0 : i32
    %c0_i32_0 = arith.constant 0 : i32
    %c0_i32_1 = arith.constant 0 : i32
    return %c0_i32, %c0_i32_0 : i32, i32
  }
  func.func @transform_5(%arg0: i32) -> (i32, i32) {
    %c0_i32 = arith.constant 0 : i32
    %c0_i32_0 = arith.constant 0 : i32
    %c0_i32_1 = arith.constant 0 : i32
    return %c0_i32, %c0_i32_0 : i32, i32
  }
  func.func @transform_6(%arg0: i32) -> (i32, i32) {
    %c0_i32 = arith.constant 0 : i32
    %c0_i32_0 = arith.constant 0 : i32
    %c0_i32_1 = arith.constant 0 : i32
    return %c0_i32, %c0_i32_0 : i32, i32
  }
  func.func @transform_7(%arg0: i32) -> (i32, i32) {
    %c0_i32 = arith.constant 0 : i32
    %c0_i32_0 = arith.constant 0 : i32
    %c0_i32_1 = arith.constant 0 : i32
    return %c0_i32, %c0_i32_0 : i32, i32
  }
  func.func @transform_8(%arg0: i32) -> (i32, i32) {
    %c0_i32 = arith.constant 0 : i32
    %c0_i32_0 = arith.constant 0 : i32
    %c0_i32_1 = arith.constant 0 : i32
    return %c0_i32, %c0_i32_0 : i32, i32
  }
  func.func @transform_9(%arg0: i32) -> (i32, i32) {
    %c0_i32 = arith.constant 0 : i32
    %c0_i32_0 = arith.constant 0 : i32
    return %arg0, %c0_i32 : i32, i32
  }
}

</mosaic_0001>

<bundles_post_ra>
// kernel: tpu_custom_call.1
= control target key start
LH: loop header
LB: loop body
LE: loop exit
PB: predicated region body
PF: predicated region fallthrough
CT: control target
= control target key end

     0   :  { %s11393_s11 = smov 0   ;;  %s15032_s0 = inlined_call_operand.vmem [shape: bf16[512,4740], index: 0, kind: input, shape index: {}]   ;;  %s15033_s1 = inlined_call_operand.vmem [shape: bf16[4740,256], index: 1, kind: input, shape index: {}]   ;;  %s15034_s2 = inlined_call_operand.vmem [shape: f32[1,256], index: 2, kind: input, shape index: {}]   ;;  %s15035_s3 = inlined_call_operand.vmem [shape: bf16[256,256], index: 3, kind: input, shape index: {}]   ;;  %s15036_s4 = inlined_call_operand.vmem [shape: f32[1,256], index: 4, kind: input, shape index: {}]   ;;  %s15037_s5 = inlined_call_operand.vmem [shape: bf16[256,256], index: 5, kind: input, shape index: {}]   ;;  %s15038_s6 = inlined_call_operand.vmem [shape: f32[1,256], index: 6, kind: input, shape index: {}]   ;;  %s15039_s7 = inlined_call_operand.vmem [shape: bf16[1,256], index: 7, kind: input, shape index: {}]   ;;  %s15040_s8 = inlined_call_operand.<no memory space> [shape: f32[1,1], index: 8, kind: input, shape index: {}]   ;;  %s15041_s9 = inlined_call_operand.vmem [shape: f32[512,1], index: 9, kind: output, shape index: {}]  }
   0x1   :  { %v14_v0 = vstv %s15040_s8 }
   0x2   :  { %15 = vst [vmem:[#allocation2] sm:$0x1] %v14_v0 }
   0x3 LB: > { %s8866_s12 = sadd.s32 4294967295, %s11338_s11   ;;  %p8870_p0 = scmp.ge.s32.totalorder %s11338_s11, 1  ;;  %s11338_s11 = sphi %s11393_s11, %s21_s11  }
   0x4   : > { %p291_p1 = scmp.lt.s32.totalorder %s11338_s11, 5 }
   0x6   : > { %p292_p2 = pnand %p8870_p0, %p291_p1 }
   0x8   : > { %295 = sbr.rel (%p292_p2) target bundleno = 1470 (0x5be), region = 56 }
   0xd   : > { %v9890_v1 = vld [vmem:[%s15033_s1 + $0x74] ss:$8 sps:$4 sm:$0xff]   ;;  %v9892_v2 = vld [vmem:[%s15033_s1 + $0x70] ss:$8 sps:$4 sm:$0xff]   ;;  %v9896_v5 = vld [vmem:[%s15033_s1 + $0x64] ss:$8 sps:$4 sm:$0xff]  }
   0xe   : > { %5760 = vmatprep.subr.bf16.mxu0 %v9890_v1  ;;  %v9893_v3 = vld [vmem:[%s15033_s1 + $0x174] ss:$8 sps:$4 sm:$0xff]   ;;  %v9895_v4 = vld [vmem:[%s15033_s1 + $0x170] ss:$8 sps:$4 sm:$0xff]   ;;  %v9898_v6 = vld [vmem:[%s15033_s1 + $0x60] ss:$8 sps:$4 sm:$0xff]  }
   0xf   : > { %5761 = vmatpush1.bf16.msra.mxu0 %v9892_v2  ;;  %5873 = vmatprep.subr.bf16.mxu1 %v9893_v3  ;;  %v9899_v7 = vld [vmem:[%s15033_s1 + $0x164] ss:$8 sps:$4 sm:$0xff]   ;;  %v9901_v8 = vld [vmem:[%s15033_s1 + $0x160] ss:$8 sps:$4 sm:$0xff]   ;;  %v9902_v9 = vld [vmem:[%s15033_s1 + $0x54] ss:$8 sps:$4 sm:$0xff]  }
  0x10   : > { %5874 = vmatpush1.bf16.msra.mxu1 %v9895_v4  ;;  %5762 = vmatprep.subr.bf16.mxu0 %v9896_v5  ;;  %v9904_v10 = vld [vmem:[%s15033_s1 + $0x50] ss:$8 sps:$4 sm:$0xff]   ;;  %v9905_v11 = vld [vmem:[%s15033_s1 + $0x154] ss:$8 sps:$4 sm:$0xff]   ;;  %v9908_v12 = vld [vmem:[%s15033_s1 + $0x44] ss:$8 sps:$4 sm:$0xff]  }
  0x11   : > { %5875 = vmatprep.subr.bf16.mxu1 %v9899_v7  ;;  %v9907_v13 = vld [vmem:[%s15033_s1 + $0x150] ss:$8 sps:$4 sm:$0xff]   ;;  %v9911_v14 = vld [vmem:[%s15033_s1 + $0x144] ss:$8 sps:$4 sm:$0xff]   ;;  %v9910_v15 = vld [vmem:[%s15033_s1 + $0x40] ss:$8 sps:$4 sm:$0xff]  }
  0x12   : > { %v9914_v16 = vld [vmem:[%s15033_s1 + $0x34] ss:$8 sps:$4 sm:$0xff]   ;;  %v9913_v17 = vld [vmem:[%s15033_s1 + $0x140] ss:$8 sps:$4 sm:$0xff]   ;;  %v9916_v19 = vld [vmem:[%s15033_s1 + $0x30] ss:$8 sps:$4 sm:$0xff]  }
  0x13   : > { %5763 = vmatpush1.bf16.msra.mxu0 %v9898_v6  ;;  %v9917_v18 = vld [vmem:[%s15033_s1 + $0x134] ss:$8 sps:$4 sm:$0xff]   ;;  %v9920_v20 = vld [vmem:[%s15033_s1 + $0x24] ss:$8 sps:$4 sm:$0xff]   ;;  %v9919_v21 = vld [vmem:[%s15033_s1 + $0x130] ss:$8 sps:$4 sm:$0xff]  }
  0x14   : > { %5764 = vmatprep.subr.bf16.mxu0 %v9902_v9  ;;  %5876 = vmatpush1.bf16.msra.mxu1 %v9901_v8  ;;  %v9923_v22 = vld [vmem:[%s15033_s1 + $0x124] ss:$8 sps:$4 sm:$0xff]   ;;  %v9922_v23 = vld [vmem:[%s15033_s1 + $0x20] ss:$8 sps:$4 sm:$0xff]   ;;  %v9926_v24 = vld [vmem:[%s15033_s1 + $0x14] ss:$8 sps:$4 sm:$0xff]  }
  0x15   : > { %5877 = vmatprep.subr.bf16.mxu1 %v9905_v11  ;;  %v9925_v25 = vld [vmem:[%s15033_s1 + $0x120] ss:$8 sps:$4 sm:$0xff]   ;;  %v9929_v26 = vld [vmem:[%s15033_s1 + $0x114] ss:$8 sps:$4 sm:$0xff]   ;;  %v9928_v27 = vld [vmem:[%s15033_s1 + $0x10] ss:$8 sps:$4 sm:$0xff]  }
  0x16   : > { %v9932_v28 = vld [vmem:[%s15033_s1 + $0x4] ss:$8 sps:$4 sm:$0xff]   ;;  %v9931_v29 = vld [vmem:[%s15033_s1 + $0x110] ss:$8 sps:$4 sm:$0xff]   ;;  %s8871_s30 = sshll.u32 %s8866_s12, 4  ;;  %vm5753_vm0 = vcmask 1041408  }
  0x17   : > { %5765 = vmatpush1.bf16.msra.mxu0 %v9904_v10  ;;  %v9935_v30 = vld [vmem:[%s15033_s1 + $0x104] ss:$8 sps:$4 sm:$0xff]   ;;  %v9934_v31 = vld [vmem:[%s15033_s1] ss:$8 sps:$4 sm:$0xff]   ;;  %v9938_v32 = vld [vmem:[%s15033_s1 + $0xf4] ss:$8 sps:$4 sm:$0xff]  }
  0x18   : > { %5766 = vmatprep.subr.bf16.mxu0 %v9908_v12  ;;  %5878 = vmatpush1.bf16.msra.mxu1 %v9907_v13  ;;  %p329_p3 = scmp.lt.s32.totalorder %s8871_s30, 63  ;;  %v9937_v33 = vld [vmem:[%s15033_s1 + $0x100] ss:$8 sps:$4 sm:$0xff]   ;;  %v9941_v34 = vld [vmem:[%s15033_s1 + $0x1f4] ss:$8 sps:$4 sm:$0xff]   ;;  %vm5728_vm1 = vcmask 31744  }
  0x19   : > { %5879 = vmatprep.subr.bf16.mxu1 %v9911_v14  ;;  %v9940_v35 = vld [vmem:[%s15033_s1 + $0xf0] ss:$8 sps:$4 sm:$0xff]   ;;  %v9944_v36 = vld [vmem:[%s15033_s1 + $0xe4] ss:$8 sps:$4 sm:$0xff]   ;;  %v9946_v39 = vld [vmem:[%s15033_s1 + $0xe0] ss:$8 sps:$4 sm:$0xff]  }
  0x1a   : > { %s15177_s30 = smov (!%p329_p3, %s8871_s30), 63  ;;  %v9943_v37 = vld [vmem:[%s15033_s1 + $0x1f0] ss:$8 sps:$4 sm:$0xff]   ;;  %v9947_v38 = vld [vmem:[%s15033_s1 + $0x1e4] ss:$8 sps:$4 sm:$0xff]   ;;  %vm8793_vm2 = vcmask 7168  }
  0x1b   : > { %5767 = vmatpush1.bf16.msra.mxu0 %v9910_v15  ;;  %v9950_v40 = vld [vmem:[%s15033_s1 + $0xd4] ss:$8 sps:$4 sm:$0xff]   ;;  %s9881_s14 = smul.u32 152, %s15177_s30  ;;  %v9949_v41 = vld [vmem:[%s15033_s1 + $0x1e0] ss:$8 sps:$4 sm:$0xff]   ;;  %s8874_s18 = sshll.u32 %s15177_s30, 3 }
  0x1c   : > { %5768 = vmatprep.subr.bf16.mxu0 %v9914_v16  ;;  %5880 = vmatpush1.bf16.msra.mxu1 %v9913_v17  ;;  %v9953_v42 = vld [vmem:[%s15033_s1 + $0x1d4] ss:$8 sps:$4 sm:$0xff]   ;;  %v9952_v43 = vld [vmem:[%s15033_s1 + $0xd0] ss:$8 sps:$4 sm:$0xff]   ;;  %v9956_v44 = vld [vmem:[%s15033_s1 + $0xc4] ss:$8 sps:$4 sm:$0xff]   ;;  %s14995_s20 = scalar_lea.vmem %s15041_s9, %s8874_s18 }
  0x1d   : > { %5881 = vmatprep.subr.bf16.mxu1 %v9917_v18  ;;  %s11541_s23 = scalar_lea.vmem %s15032_s0, %s9881_s14  ;;  %v9955_v45 = vld [vmem:[%s15033_s1 + $0x1d0] ss:$8 sps:$4 sm:$0xff]   ;;  %v9959_v46 = vld [vmem:[%s15033_s1 + $0x1c4] ss:$8 sps:$4 sm:$0xff]   ;;  %v9958_v47 = vld [vmem:[%s15033_s1 + $0xc0] ss:$8 sps:$4 sm:$0xff]  }
  0x1e   : > { %v9987_v48 = vld [vmem:[%s11541_s23 + $0x4] ss:$152 sps:$4 sm:$0xff]   ;;  %v9961_v50 = vld [vmem:[%s15033_s1 + $0x1c0] ss:$8 sps:$4 sm:$0xff]   ;;  %v9964_v53 = vld [vmem:[%s15033_s1 + $0xb0] ss:$8 sps:$4 sm:$0xff]  }
  0x1f   : > { %5769 = vmatpush1.bf16.msra.mxu0 %v9916_v19  ;;  %v9962_v49 = vld [vmem:[%s15033_s1 + $0xb4] ss:$8 sps:$4 sm:$0xff]   ;;  %5792 = vmatprep.mubr.bf16.mxu0 %v9987_v48  ;;  %v9994_v52 = vld [vmem:[%s11541_s23 + $0xc] ss:$152 sps:$4 sm:$0xff]   ;;  %v9967_v55 = vld [vmem:[%s15033_s1 + $0x1b0] ss:$8 sps:$4 sm:$0xff]  }
  0x20   : > { %5770 = vmatprep.subr.bf16.mxu0 %v9920_v20  ;;  %5882 = vmatpush1.bf16.msra.mxu1 %v9919_v21  ;;  %v9965_v51 = vld [vmem:[%s15033_s1 + $0x1b4] ss:$8 sps:$4 sm:$0xff]   ;;  %v9968_v54 = vld [vmem:[%s15033_s1 + $0xa4] ss:$8 sps:$4 sm:$0xff]   ;;  %v9970_v57 = vld [vmem:[%s15033_s1 + $0xa0] ss:$8 sps:$4 sm:$0xff]  }
  0x21   : > { %5883 = vmatprep.subr.bf16.mxu1 %v9923_v22  ;;  %5905 = vmatprep.mubr.bf16.mxu1 %v9994_v52  ;;  %v9971_v56 = vld [vmem:[%s15033_s1 + $0x1a4] ss:$8 sps:$4 sm:$0xff]   ;;  %v9974_v58 = vld [vmem:[%s15033_s1 + $0x94] ss:$8 sps:$4 sm:$0xff]   ;;  %v9973_v59 = vld [vmem:[%s15033_s1 + $0x1a0] ss:$8 sps:$4 sm:$0xff]  }
  0x22   : > { %v9977_v60 = vld [vmem:[%s15033_s1 + $0x194] ss:$8 sps:$4 sm:$0xff]   ;;  %v9976_v61 = vld [vmem:[%s15033_s1 + $0x90] ss:$8 sps:$4 sm:$0xff]   ;;  %v9980_v62 = vld [vmem:[%s15033_s1 + $0x84] ss:$8 sps:$4 sm:$0xff]  }
  0x23   : > { %5771 = vmatpush1.bf16.msra.mxu0 %v9922_v23  ;;  %v9979_v63 = vld [vmem:[%s15033_s1 + $0x190] ss:$8 sps:$4 sm:$0xff]   ;;  %v9983_v0 = vld [vmem:[%s15033_s1 + $0x184] ss:$8 sps:$4 sm:$0xff]   ;;  %v9982_v1 = vld [vmem:[%s15033_s1 + $0x80] ss:$8 sps:$4 sm:$0xff]  }
  0x24   : > { %5772 = vmatprep.subr.bf16.mxu0 %v9926_v24  ;;  %5884 = vmatpush1.bf16.msra.mxu1 %v9925_v25  ;;  %v9988_v2 = vld [vmem:[%s15033_s1 + $0x180] ss:$8 sps:$4 sm:$0xff]   ;;  %v9991_v4 = vld [vmem:[%s15033_s1 + $0x274] ss:$8 sps:$4 sm:$0xff]   ;;  %v9989_v5 = vld [vmem:[%s15033_s1 + $0x270] ss:$8 sps:$4 sm:$0xff]  }
  0x25   : > { %5885 = vmatprep.subr.bf16.mxu1 %v9929_v26  ;;  %v9985_v3 = vld [vmem:[%s11541_s23] ss:$152 sps:$4 sm:$0xff]   ;;  %v9997_v7 = vld [vmem:[%s15033_s1 + $0x374] ss:$8 sps:$4 sm:$0xff]   ;;  %v10000_v10 = vld [vmem:[%s15033_s1 + $0x264] ss:$8 sps:$4 sm:$0xff]  }
  0x26   : > { %v9992_v6 = vld [vmem:[%s11541_s23 + $0x8] ss:$152 sps:$4 sm:$0xff]   ;;  %v9995_v8 = vld [vmem:[%s15033_s1 + $0x370] ss:$8 sps:$4 sm:$0xff]   ;;  %v10004_v9 = vld [vmem:[%s11541_s23 + $0x134] ss:$152 sps:$4 sm:$0xff]  }
  0x27   : > { %5773 = vmatpush1.bf16.msra.mxu0 %v9928_v27  ;;  %v10010_v11 = vld [vmem:[%s11541_s23 + $0x13c] ss:$152 sps:$4 sm:$0xff]   ;;  %v10003_v12 = vld [vmem:[%s15033_s1 + $0x364] ss:$8 sps:$4 sm:$0xff]   ;;  %v9998_v13 = vld [vmem:[%s15033_s1 + $0x260] ss:$8 sps:$4 sm:$0xff]  }
  0x28   : > { %5774 = vmatprep.subr.bf16.mxu0 %v9932_v28  ;;  %5886 = vmatpush1.bf16.msra.mxu1 %v9931_v29  ;;  %v10001_v14 = vld [vmem:[%s15033_s1 + $0x360] ss:$8 sps:$4 sm:$0xff]   ;;  %v10009_v16 = vld [vmem:[%s15033_s1 + $0x254] ss:$8 sps:$4 sm:$0xff]   ;;  %v10007_v17 = vld [vmem:[%s15033_s1 + $0x250] ss:$8 sps:$4 sm:$0xff]  }
  0x29   : > { %5887 = vmatprep.subr.bf16.mxu1 %v9935_v30  ;;  %v10006_v15 = vld [vmem:[%s11541_s23 + $0x130] ss:$152 sps:$4 sm:$0xff]   ;;  %v10015_v19 = vld [vmem:[%s15033_s1 + $0x354] ss:$8 sps:$4 sm:$0xff]   ;;  %v10018_v22 = vld [vmem:[%s15033_s1 + $0x244] ss:$8 sps:$4 sm:$0xff]  }
  0x2a   : > { %v10012_v18 = vld [vmem:[%s11541_s23 + $0x138] ss:$152 sps:$4 sm:$0xff]   ;;  %v10022_v21 = vld [vmem:[%s11541_s23 + $0x264] ss:$152 sps:$4 sm:$0xff]   ;;  %v10016_v25 = vld [vmem:[%s15033_s1 + $0x240] ss:$8 sps:$4 sm:$0xff]  }
  0x2b   : > { %5775 = vmatpush1.bf16.msra.mxu0 %v9934_v31  ;;  %v10013_v20 = vld [vmem:[%s15033_s1 + $0x350] ss:$8 sps:$4 sm:$0xff]   ;;  %v10028_v23 = vld [vmem:[%s11541_s23 + $0x26c] ss:$152 sps:$4 sm:$0xff]   ;;  %v10019_v26 = vld [vmem:[%s15033_s1 + $0x340] ss:$8 sps:$4 sm:$0xff]  }
  0x2c   : > { %5776 = vmatprep.subr.bf16.mxu0 %v9938_v32  ;;  %5888 = vmatpush1.bf16.msra.mxu1 %v9937_v33  ;;  %v10021_v24 = vld [vmem:[%s15033_s1 + $0x344] ss:$8 sps:$4 sm:$0xff]   ;;  %v10024_v27 = vld [vmem:[%s11541_s23 + $0x260] ss:$152 sps:$4 sm:$0xff]   ;;  %v10027_v28 = vld [vmem:[%s15033_s1 + $0x234] ss:$8 sps:$4 sm:$0xff]  }
  0x2d   : > { %5889 = vmatprep.subr.bf16.mxu1 %v9941_v34  ;;  %v10025_v29 = vld [vmem:[%s15033_s1 + $0x230] ss:$8 sps:$4 sm:$0xff]   ;;  %v10030_v30 = vld [vmem:[%s11541_s23 + $0x268] ss:$152 sps:$4 sm:$0xff]   ;;  %v10033_v31 = vld [vmem:[%s15033_s1 + $0x334] ss:$8 sps:$4 sm:$0xff]  }
  0x2e   : > { %v10031_v32 = vld [vmem:[%s15033_s1 + $0x330] ss:$8 sps:$4 sm:$0xff]   ;;  %v10040_v33 = vld [vmem:[%s11541_s23 + $0x394] ss:$152 sps:$4 sm:$0xff]  }
  0x2f   : > { %5777 = vmatpush2.bf16.msra.mxu0 %v9940_v35  ;;  %v10036_v34 = vld [vmem:[%s15033_s1 + $0x224] ss:$8 sps:$4 sm:$0xff]   ;;  %v10046_v35 = vld [vmem:[%s11541_s23 + $0x39c] ss:$152 sps:$4 sm:$0xff]  }
  0x30   : > { %5778 = vmatprep.subr.bf16.mxu0 %v9944_v36  ;;  %5890 = vmatpush2.bf16.msra.mxu1 %v9943_v37  ;;  %v10039_v36 = vld [vmem:[%s15033_s1 + $0x324] ss:$8 sps:$4 sm:$0xff]   ;;  %v10034_v37 = vld [vmem:[%s15033_s1 + $0x220] ss:$8 sps:$4 sm:$0xff]   ;;  %v10063_v52 = vld [vmem:[%s15033_s1 + $0x2f4] ss:$8 sps:$4 sm:$0xff]  }
  0x31   : > { %5891 = vmatprep.subr.bf16.mxu1 %v9947_v38  ;;  %v10037_v38 = vld [vmem:[%s15033_s1 + $0x320] ss:$8 sps:$4 sm:$0xff]   ;;  %v10057_v48 = vld [vmem:[%s15033_s1 + $0x304] ss:$8 sps:$4 sm:$0xff]  }
  0x33   : > { %5779 = vmatpush2.bf16.msra.mxu0 %v9946_v39  ;;  %v10042_v39 = vld [vmem:[%s11541_s23 + $0x390] ss:$152 sps:$4 sm:$0xff]  }
  0x34   : > { %5780 = vmatprep.subr.bf16.mxu0 %v9950_v40  ;;  %5892 = vmatpush2.bf16.msra.mxu1 %v9949_v41  ;;  %v10045_v40 = vld [vmem:[%s15033_s1 + $0x214] ss:$8 sps:$4 sm:$0xff]   ;;  %v10043_v41 = vld [vmem:[%s15033_s1 + $0x210] ss:$8 sps:$4 sm:$0xff]  }
  0x35   : > { %5893 = vmatprep.subr.bf16.mxu1 %v9953_v42  ;;  %v10048_v42 = vld [vmem:[%s11541_s23 + $0x398] ss:$152 sps:$4 sm:$0xff]  }
  0x37   : > { %5781 = vmatpush2.bf16.msra.mxu0 %v9952_v43  ;;  %v10051_v43 = vld [vmem:[%s15033_s1 + $0x314] ss:$8 sps:$4 sm:$0xff]  }
  0x38   : > { %5782 = vmatprep.subr.bf16.mxu0 %v9956_v44  ;;  %5894 = vmatpush2.bf16.msra.mxu1 %v9955_v45  ;;  %v10049_v44 = vld [vmem:[%s15033_s1 + $0x310] ss:$8 sps:$4 sm:$0xff]   ;;  %v10058_v45 = vld [vmem:[%s11541_s23 + $0x4c4] ss:$152 sps:$4 sm:$0xff]  }
  0x39   : > { %5895 = vmatprep.subr.bf16.mxu1 %v9959_v46  ;;  %v10054_v46 = vld [vmem:[%s15033_s1 + $0x204] ss:$8 sps:$4 sm:$0xff]  }
  0x3b   : > { %5783 = vmatpush2.bf16.msra.mxu0 %v9958_v47  ;;  %v10064_v47 = vld [vmem:[%s11541_s23 + $0x4cc] ss:$152 sps:$4 sm:$0xff]  }
  0x3c   : > { %5784 = vmatprep.subr.bf16.mxu0 %v9962_v49  ;;  %5896 = vmatpush2.bf16.msra.mxu1 %v9961_v50  ;;  %v10052_v49 = vld [vmem:[%s15033_s1 + $0x200] ss:$8 sps:$4 sm:$0xff]  }
  0x3d   : > { %5897 = vmatprep.subr.bf16.mxu1 %v9965_v51  ;;  %v10055_v50 = vld [vmem:[%s15033_s1 + $0x300] ss:$8 sps:$4 sm:$0xff]  }
  0x3e   : > { %v10060_v51 = vld [vmem:[%s11541_s23 + $0x4c0] ss:$152 sps:$4 sm:$0xff]  }
  0x3f   : > { %5785 = vmatpush2.bf16.msra.mxu0 %v9964_v53  ;;  %v10061_v53 = vld [vmem:[%s15033_s1 + $0x2f0] ss:$8 sps:$4 sm:$0xff]  }
  0x40   : > { %5786 = vmatprep.subr.bf16.mxu0 %v9968_v54  ;;  %5898 = vmatpush2.bf16.msra.mxu1 %v9967_v55  ;;  %v10066_v54 = vld [vmem:[%s11541_s23 + $0x4c8] ss:$152 sps:$4 sm:$0xff]   ;;  %v10069_v55 = vld [vmem:[%s15033_s1 + $0x3f4] ss:$8 sps:$4 sm:$0xff]  }
  0x41   : > { %5899 = vmatprep.subr.bf16.mxu1 %v9971_v56  ;;  %v10067_v56 = vld [vmem:[%s15033_s1 + $0x3f0] ss:$8 sps:$4 sm:$0xff]  }
  0x43   : > { %5787 = vmatpush2.bf16.msra.mxu0 %v9970_v57  ;;  %v10076_v57 = vld [vmem:[%s11541_s23 + $0x5f4] ss:$152 sps:$4 sm:$0xff]  }
  0x44   : > { %5788 = vmatprep.subr.bf16.mxu0 %v9974_v58  ;;  %5900 = vmatpush2.bf16.msra.mxu1 %v9973_v59  ;;  %v10072_v58 = vld [vmem:[%s15033_s1 + $0x2e4] ss:$8 sps:$4 sm:$0xff]   ;;  %v10082_v59 = vld [vmem:[%s11541_s23 + $0x5fc] ss:$152 sps:$4 sm:$0xff]  }
  0x45   : > { %5901 = vmatprep.subr.bf16.mxu1 %v9977_v60  ;;  %v10075_v60 = vld [vmem:[%s15033_s1 + $0x3e4] ss:$8 sps:$4 sm:$0xff]  }
  0x47   : > { %5789 = vmatpush2.bf16.msra.mxu0 %v9976_v61  ;;  %v10070_v61 = vld [vmem:[%s15033_s1 + $0x2e0] ss:$8 sps:$4 sm:$0xff]  }
  0x48   : > { %5790 = vmatprep.subr.bf16.mxu0 %v9980_v62  ;;  %5902 = vmatpush2.bf16.msra.mxu1 %v9979_v63  ;;  %v10073_v62 = vld [vmem:[%s15033_s1 + $0x3e0] ss:$8 sps:$4 sm:$0xff]  }
  0x49   : > { %5903 = vmatprep.subr.bf16.mxu1 %v9983_v0  ;;  %v10078_v63 = vld [vmem:[%s11541_s23 + $0x5f0] ss:$152 sps:$4 sm:$0xff]   ;;  %v10081_v0 = vld [vmem:[%s15033_s1 + $0x2d4] ss:$8 sps:$4 sm:$0xff]  }
  0x4b   : > { %5791 = vmatpush2.bf16.msra.mxu0 %v9982_v1  ;;  %v10079_v1 = vld [vmem:[%s15033_s1 + $0x2d0] ss:$8 sps:$4 sm:$0xff]  }
  0x4c   : > { %5986 = vmatprep.subr.bf16.mxu0 %v9991_v4  ;;  %5904 = vmatpush2.bf16.msra.mxu1 %v9988_v2  ;;  %v10084_v2 = vld [vmem:[%s11541_s23 + $0x5f8] ss:$152 sps:$4 sm:$0xff]  }
  0x4d   : > { %6099 = vmatprep.subr.bf16.mxu1 %v9997_v7  ;;  %v10085_v4 = vld [vmem:[%s15033_s1 + $0x3d0] ss:$8 sps:$4 sm:$0xff]   ;;  %v10100_v7 = vld [vmem:[%s11541_s23 + $0x72c] ss:$152 sps:$4 sm:$0xff]  }
  0x4e   : > { %5793 = vmatmul.mubr.bf16.vlgmr.msra.gmra.mxu0 %v9985_v3  ;;  %v10087_v3 = vld [vmem:[%s15033_s1 + $0x3d4] ss:$8 sps:$4 sm:$0xff]  }
  0x4f   : > { %5987 = vmatpush1.bf16.msra.mxu0 %v9989_v5  ;;  %5802 = vmatprep.mubr.bf16.mxu0 %v10004_v9  ;;  %v10094_v5 = vld [vmem:[%s11541_s23 + $0x724] ss:$152 sps:$4 sm:$0xff]   ;;  %v10088_v9 = vld [vmem:[%s15033_s1 + $0x2c0] ss:$8 sps:$4 sm:$0xff]  }
  0x50   : > { %5906 = vmatmul.mubr.bf16.vlgmr.msra.gmra.mxu1 %v9992_v6  ;;  %5988 = vmatprep.subr.bf16.mxu0 %v10000_v10  ;;  %v10090_v6 = vld [vmem:[%s15033_s1 + $0x2c4] ss:$8 sps:$4 sm:$0xff]   ;;  %v10091_v10 = vld [vmem:[%s15033_s1 + $0x3c0] ss:$8 sps:$4 sm:$0xff]  }
  0x51   : > { %6100 = vmatpush1.bf16.msra.mxu1 %v9995_v8  ;;  %5915 = vmatprep.mubr.bf16.mxu1 %v10010_v11  ;;  %v10093_v8 = vld [vmem:[%s15033_s1 + $0x3c4] ss:$8 sps:$4 sm:$0xff]   ;;  %v10096_v11 = vld [vmem:[%s11541_s23 + $0x720] ss:$152 sps:$4 sm:$0xff]  }
  0x52   : > { %6101 = vmatprep.subr.bf16.mxu1 %v10003_v12  ;;  %v10099_v12 = vld [vmem:[%s15033_s1 + $0x2b4] ss:$8 sps:$4 sm:$0xff]  }
  0x53   : > { %5989 = vmatpush1.bf16.msra.mxu0 %v9998_v13  ;;  %v10097_v13 = vld [vmem:[%s15033_s1 + $0x2b0] ss:$8 sps:$4 sm:$0xff]  }
  0x54   : > { %5990 = vmatprep.subr.bf16.mxu0 %v10009_v16  ;;  %v10103_v16 = vld [vmem:[%s15033_s1 + $0x3b0] ss:$8 sps:$4 sm:$0xff]  }
  0x55   : > { %6102 = vmatpush1.bf16.msra.mxu1 %v10001_v14  ;;  %v10102_v14 = vld [vmem:[%s11541_s23 + $0x728] ss:$152 sps:$4 sm:$0xff]  }
  0x56   : > { %5803 = vmatmul.mubr.bf16.gmra.mxu0 %v10006_v15  ;;  %6103 = vmatprep.subr.bf16.mxu1 %v10015_v19  ;;  %v10105_v15 = vld [vmem:[%s15033_s1 + $0x3b4] ss:$8 sps:$4 sm:$0xff]  }
  0x57   : > { %5991 = vmatpush1.bf16.msra.mxu0 %v10007_v17  ;;  %5812 = vmatprep.mubr.bf16.mxu0 %v10022_v21  ;;  %v10112_v17 = vld [vmem:[%s11541_s23 + $0x854] ss:$152 sps:$4 sm:$0xff]   ;;  %v10106_v21 = vld [vmem:[%s15033_s1 + $0x2a0] ss:$8 sps:$4 sm:$0xff]  }
  0x58   : > { %5916 = vmatmul.mubr.bf16.gmra.mxu1 %v10012_v18  ;;  %5992 = vmatprep.subr.bf16.mxu0 %v10018_v22  ;;  %v10108_v18 = vld [vmem:[%s15033_s1 + $0x2a4] ss:$8 sps:$4 sm:$0xff]   ;;  %v10118_v19 = vld [vmem:[%s11541_s23 + $0x85c] ss:$152 sps:$4 sm:$0xff]   ;;  %v10109_v22 = vld [vmem:[%s15033_s1 + $0x3a0] ss:$8 sps:$4 sm:$0xff]  }
  0x59   : > { %6104 = vmatpush1.bf16.msra.mxu1 %v10013_v20  ;;  %5925 = vmatprep.mubr.bf16.mxu1 %v10028_v23  ;;  %v10111_v20 = vld [vmem:[%s15033_s1 + $0x3a4] ss:$8 sps:$4 sm:$0xff]   ;;  %v10114_v23 = vld [vmem:[%s11541_s23 + $0x850] ss:$152 sps:$4 sm:$0xff]  }
  0x5a   : > { %6105 = vmatprep.subr.bf16.mxu1 %v10021_v24  ;;  %v10117_v24 = vld [vmem:[%s15033_s1 + $0x294] ss:$8 sps:$4 sm:$0xff]  }
  0x5b   : > { %5993 = vmatpush1.bf16.msra.mxu0 %v10016_v25  ;;  %v10115_v25 = vld [vmem:[%s15033_s1 + $0x290] ss:$8 sps:$4 sm:$0xff]  }
  0x5c   : > { %5994 = vmatprep.subr.bf16.mxu0 %v10027_v28  ;;  %v10121_v28 = vld [vmem:[%s15033_s1 + $0x390] ss:$8 sps:$4 sm:$0xff]  }
  0x5d   : > { %6106 = vmatpush1.bf16.msra.mxu1 %v10019_v26  ;;  %v10120_v26 = vld [vmem:[%s11541_s23 + $0x858] ss:$152 sps:$4 sm:$0xff]  }
  0x5e   : > { %5813 = vmatmul.mubr.bf16.gmra.mxu0 %v10024_v27  ;;  %6107 = vmatprep.subr.bf16.mxu1 %v10033_v31  ;;  %v10123_v27 = vld [vmem:[%s15033_s1 + $0x394] ss:$8 sps:$4 sm:$0xff]  }
  0x5f   : > { %5995 = vmatpush1.bf16.msra.mxu0 %v10025_v29  ;;  %5822 = vmatprep.mubr.bf16.mxu0 %v10040_v33  ;;  %v10132_v29 = vld [vmem:[%s11541_s23 + $0x14] ss:$152 sps:$4 sm:$0xff]   ;;  %v10124_v33 = vld [vmem:[%s15033_s1 + $0x280] ss:$8 sps:$4 sm:$0xff]  }
  0x60   : > { %5926 = vmatmul.mubr.bf16.gmra.mxu1 %v10030_v30  ;;  %5996 = vmatprep.subr.bf16.mxu0 %v10036_v34  ;;  %v10126_v30 = vld [vmem:[%s15033_s1 + $0x284] ss:$8 sps:$4 sm:$0xff]   ;;  %v10138_v31 = vld [vmem:[%s11541_s23 + $0x1c] ss:$152 sps:$4 sm:$0xff]   ;;  %v10127_v34 = vld [vmem:[%s15033_s1 + $0x380] ss:$8 sps:$4 sm:$0xff]  }
  0x61   : > { %6108 = vmatpush1.bf16.msra.mxu1 %v10031_v32  ;;  %5935 = vmatprep.mubr.bf16.mxu1 %v10046_v35  ;;  %v10129_v32 = vld [vmem:[%s15033_s1 + $0x384] ss:$8 sps:$4 sm:$0xff]   ;;  %v10130_v35 = vld [vmem:[%s11541_s23 + $0x10] ss:$152 sps:$4 sm:$0xff]  }
  0x62   : > { %6109 = vmatprep.subr.bf16.mxu1 %v10039_v36  ;;  %v10135_v36 = vld [vmem:[%s15033_s1 + $0x474] ss:$8 sps:$4 sm:$0xff]  }
  0x63   : > { %5997 = vmatpush1.bf16.msra.mxu0 %v10034_v37  ;;  %v10133_v37 = vld [vmem:[%s15033_s1 + $0x470] ss:$8 sps:$4 sm:$0xff]  }
  0x64   : > { %5998 = vmatprep.subr.bf16.mxu0 %v10045_v40  ;;  %v10139_v40 = vld [vmem:[%s15033_s1 + $0x570] ss:$8 sps:$4 sm:$0xff]  }
  0x65   : > { %6110 = vmatpush1.bf16.msra.mxu1 %v10037_v38  ;;  %v10136_v38 = vld [vmem:[%s11541_s23 + $0x18] ss:$152 sps:$4 sm:$0xff]  }
  0x66   : > { %5823 = vmatmul.mubr.bf16.gmra.mxu0 %v10042_v39  ;;  %6111 = vmatprep.subr.bf16.mxu1 %v10051_v43  ;;  %v10141_v39 = vld [vmem:[%s15033_s1 + $0x574] ss:$8 sps:$4 sm:$0xff]   ;;  %v10154_v43 = vld [vmem:[%s11541_s23 + $0x14c] ss:$152 sps:$4 sm:$0xff]  }
  0x67   : > { %5999 = vmatpush1.bf16.msra.mxu0 %v10043_v41  ;;  %5832 = vmatprep.mubr.bf16.mxu0 %v10058_v45  ;;  %v10148_v41 = vld [vmem:[%s11541_s23 + $0x144] ss:$152 sps:$4 sm:$0xff]   ;;  %v10142_v45 = vld [vmem:[%s15033_s1 + $0x460] ss:$8 sps:$4 sm:$0xff]  }
  0x68   : > { %5936 = vmatmul.mubr.bf16.gmra.mxu1 %v10048_v42  ;;  %6000 = vmatprep.subr.bf16.mxu0 %v10054_v46  ;;  %v10144_v42 = vld [vmem:[%s15033_s1 + $0x464] ss:$8 sps:$4 sm:$0xff]   ;;  %v10145_v46 = vld [vmem:[%s15033_s1 + $0x560] ss:$8 sps:$4 sm:$0xff]  }
  0x69   : > { %6112 = vmatpush1.bf16.msra.mxu1 %v10049_v44  ;;  %5945 = vmatprep.mubr.bf16.mxu1 %v10064_v47  ;;  %v10147_v44 = vld [vmem:[%s15033_s1 + $0x564] ss:$8 sps:$4 sm:$0xff]   ;;  %v10150_v47 = vld [vmem:[%s11541_s23 + $0x140] ss:$152 sps:$4 sm:$0xff]  }
  0x6a   : > { %6113 = vmatprep.subr.bf16.mxu1 %v10057_v48  ;;  %v10153_v48 = vld [vmem:[%s15033_s1 + $0x454] ss:$8 sps:$4 sm:$0xff]  }
  0x6b   : > { %6001 = vmatpush1.bf16.msra.mxu0 %v10052_v49  ;;  %v10151_v49 = vld [vmem:[%s15033_s1 + $0x450] ss:$8 sps:$4 sm:$0xff]  }
  0x6c   : > { %6002 = vmatprep.subr.bf16.mxu0 %v10063_v52  ;;  %v10157_v52 = vld [vmem:[%s15033_s1 + $0x550] ss:$8 sps:$4 sm:$0xff]  }
  0x6d   : > { %6114 = vmatpush1.bf16.msra.mxu1 %v10055_v50  ;;  %v10156_v50 = vld [vmem:[%s11541_s23 + $0x148] ss:$152 sps:$4 sm:$0xff]  }
  0x6e   : > { %5833 = vmatmul.mubr.bf16.gmra.mxu0 %v10060_v51  ;;  %6115 = vmatprep.subr.bf16.mxu1 %v10069_v55  ;;  %v10159_v51 = vld [vmem:[%s15033_s1 + $0x554] ss:$8 sps:$4 sm:$0xff]  }
  0x6f   : > { %6003 = vmatpush2.bf16.msra.mxu0 %v10061_v53  ;;  %5842 = vmatprep.mubr.bf16.mxu0 %v10076_v57  ;;  %v10166_v53 = vld [vmem:[%s11541_s23 + $0x274] ss:$152 sps:$4 sm:$0xff]   ;;  %v10160_v57 = vld [vmem:[%s15033_s1 + $0x440] ss:$8 sps:$4 sm:$0xff]  }
  0x70   : > { %5946 = vmatmul.mubr.bf16.gmra.mxu1 %v10066_v54  ;;  %6004 = vmatprep.subr.bf16.mxu0 %v10072_v58  ;;  %v10162_v54 = vld [vmem:[%s15033_s1 + $0x444] ss:$8 sps:$4 sm:$0xff]   ;;  %v10172_v55 = vld [vmem:[%s11541_s23 + $0x27c] ss:$152 sps:$4 sm:$0xff]   ;;  %v10163_v58 = vld [vmem:[%s15033_s1 + $0x540] ss:$8 sps:$4 sm:$0xff]  }
  0x71   : > { %6116 = vmatpush2.bf16.msra.mxu1 %v10067_v56  ;;  %5955 = vmatprep.mubr.bf16.mxu1 %v10082_v59  ;;  %v10165_v56 = vld [vmem:[%s15033_s1 + $0x544] ss:$8 sps:$4 sm:$0xff]   ;;  %v10168_v59 = vld [vmem:[%s11541_s23 + $0x270] ss:$152 sps:$4 sm:$0xff]  }
  0x72   : > { %6117 = vmatprep.subr.bf16.mxu1 %v10075_v60  ;;  %v10171_v60 = vld [vmem:[%s15033_s1 + $0x434] ss:$8 sps:$4 sm:$0xff]  }
  0x73   : > { %6005 = vmatpush2.bf16.msra.mxu0 %v10070_v61  ;;  %v10169_v61 = vld [vmem:[%s15033_s1 + $0x430] ss:$8 sps:$4 sm:$0xff]  }
  0x74   : > { %6006 = vmatprep.subr.bf16.mxu0 %v10081_v0  ;;  %v10175_v0 = vld [vmem:[%s15033_s1 + $0x530] ss:$8 sps:$4 sm:$0xff]  }
  0x75   : > { %6118 = vmatpush2.bf16.msra.mxu1 %v10073_v62  ;;  %v10174_v62 = vld [vmem:[%s11541_s23 + $0x278] ss:$152 sps:$4 sm:$0xff]  }
  0x76   : > { %5843 = vmatmul.mubr.bf16.gmra.mxu0 %v10078_v63  ;;  %6119 = vmatprep.subr.bf16.mxu1 %v10087_v3  ;;  %v10177_v63 = vld [vmem:[%s15033_s1 + $0x534] ss:$8 sps:$4 sm:$0xff]   ;;  %v10190_v3 = vld [vmem:[%s11541_s23 + $0x3ac] ss:$152 sps:$4 sm:$0xff]  }
  0x77   : > { %6007 = vmatpush2.bf16.msra.mxu0 %v10079_v1  ;;  %5852 = vmatprep.mubr.bf16.mxu0 %v10094_v5  ;;  %v10184_v1 = vld [vmem:[%s11541_s23 + $0x3a4] ss:$152 sps:$4 sm:$0xff]   ;;  %v10178_v5 = vld [vmem:[%s15033_s1 + $0x420] ss:$8 sps:$4 sm:$0xff]  }
  0x78   : > { %5956 = vmatmul.mubr.bf16.gmra.mxu1 %v10084_v2  ;;  %6008 = vmatprep.subr.bf16.mxu0 %v10090_v6  ;;  %v10180_v2 = vld [vmem:[%s15033_s1 + $0x424] ss:$8 sps:$4 sm:$0xff]   ;;  %v10181_v6 = vld [vmem:[%s15033_s1 + $0x520] ss:$8 sps:$4 sm:$0xff]  }
  0x79   : > { %6120 = vmatpush2.bf16.msra.mxu1 %v10085_v4  ;;  %5965 = vmatprep.mubr.bf16.mxu1 %v10100_v7  ;;  %v10183_v4 = vld [vmem:[%s15033_s1 + $0x524] ss:$8 sps:$4 sm:$0xff]   ;;  %v10186_v7 = vld [vmem:[%s11541_s23 + $0x3a0] ss:$152 sps:$4 sm:$0xff]  }
  0x7a   : > { %6121 = vmatprep.subr.bf16.mxu1 %v10093_v8  ;;  %v10189_v8 = vld [vmem:[%s15033_s1 + $0x414] ss:$8 sps:$4 sm:$0xff]  }
  0x7b   : > { %6009 = vmatpush2.bf16.msra.mxu0 %v10088_v9  ;;  %v10187_v9 = vld [vmem:[%s15033_s1 + $0x410] ss:$8 sps:$4 sm:$0xff]  }
  0x7c   : > { %6010 = vmatprep.subr.bf16.mxu0 %v10099_v12  ;;  %v10193_v12 = vld [vmem:[%s15033_s1 + $0x510] ss:$8 sps:$4 sm:$0xff]  }
  0x7d   : > { %6122 = vmatpush2.bf16.msra.mxu1 %v10091_v10  ;;  %v10192_v10 = vld [vmem:[%s11541_s23 + $0x3a8] ss:$152 sps:$4 sm:$0xff]  }
  0x7e   : > { %5853 = vmatmul.mubr.bf16.gmra.mxu0 %v10096_v11  ;;  %6123 = vmatprep.subr.bf16.mxu1 %v10105_v15  ;;  %v10195_v11 = vld [vmem:[%s15033_s1 + $0x514] ss:$8 sps:$4 sm:$0xff]  }
  0x7f   : > { %6011 = vmatpush2.bf16.msra.mxu0 %v10097_v13  ;;  %5862 = vmatprep.mubr.bf16.mxu0 %v10112_v17  ;;  %v10202_v13 = vld [vmem:[%s11541_s23 + $0x4d4] ss:$152 sps:$4 sm:$0xff]   ;;  %v10196_v17 = vld [vmem:[%s15033_s1 + $0x400] ss:$8 sps:$4 sm:$0xff]  }
  0x80   : > { %5966 = vmatmul.mubr.bf16.gmra.mxu1 %v10102_v14  ;;  %6012 = vmatprep.subr.bf16.mxu0 %v10108_v18  ;;  %v10198_v14 = vld [vmem:[%s15033_s1 + $0x404] ss:$8 sps:$4 sm:$0xff]   ;;  %v10208_v15 = vld [vmem:[%s11541_s23 + $0x4dc] ss:$152 sps:$4 sm:$0xff]   ;;  %v10199_v18 = vld [vmem:[%s15033_s1 + $0x500] ss:$8 sps:$4 sm:$0xff]  }
  0x81   : > { %6124 = vmatpush2.bf16.msra.mxu1 %v10103_v16  ;;  %5975 = vmatprep.mubr.bf16.mxu1 %v10118_v19  ;;  %v10201_v16 = vld [vmem:[%s15033_s1 + $0x504] ss:$8 sps:$4 sm:$0xff]   ;;  %v10204_v19 = vld [vmem:[%s11541_s23 + $0x4d0] ss:$152 sps:$4 sm:$0xff]  }
  0x82   : > { %6125 = vmatprep.subr.bf16.mxu1 %v10111_v20  ;;  %v10207_v20 = vld [vmem:[%s15033_s1 + $0x4f4] ss:$8 sps:$4 sm:$0xff]  }
  0x83   : > { %6013 = vmatpush2.bf16.msra.mxu0 %v10106_v21  ;;  %v10205_v21 = vld [vmem:[%s15033_s1 + $0x4f0] ss:$8 sps:$4 sm:$0xff]  }
  0x84   : > { %6014 = vmatprep.subr.bf16.mxu0 %v10117_v24  ;;  %v10211_v24 = vld [vmem:[%s15033_s1 + $0x5f0] ss:$8 sps:$4 sm:$0xff]  }
  0x85   : > { %6126 = vmatpush2.bf16.msra.mxu1 %v10109_v22  ;;  %v10210_v22 = vld [vmem:[%s11541_s23 + $0x4d8] ss:$152 sps:$4 sm:$0xff]  }
  0x86   : > { %5863 = vmatmul.mubr.bf16.gmra.mxu0 %v10114_v23  ;;  %6127 = vmatprep.subr.bf16.mxu1 %v10123_v27  ;;  %v10213_v23 = vld [vmem:[%s15033_s1 + $0x5f4] ss:$8 sps:$4 sm:$0xff]   ;;  %v10226_v27 = vld [vmem:[%s11541_s23 + $0x60c] ss:$152 sps:$4 sm:$0xff]  }
  0x87   : > { %6015 = vmatpush2.bf16.msra.mxu0 %v10115_v25  ;;  %6018 = vmatprep.mubr.bf16.mxu0 %v10132_v29  ;;  %v10220_v25 = vld [vmem:[%s11541_s23 + $0x604] ss:$152 sps:$4 sm:$0xff]   ;;  %v10214_v29 = vld [vmem:[%s15033_s1 + $0x4e0] ss:$8 sps:$4 sm:$0xff]  }
  0x88   : > { %5976 = vmatmul.mubr.bf16.gmra.mxu1 %v10120_v26  ;;  %6016 = vmatprep.subr.bf16.mxu0 %v10126_v30  ;;  %v10216_v26 = vld [vmem:[%s15033_s1 + $0x4e4] ss:$8 sps:$4 sm:$0xff]   ;;  %v10217_v30 = vld [vmem:[%s15033_s1 + $0x5e0] ss:$8 sps:$4 sm:$0xff]  }
  0x89   : > { %6128 = vmatpush2.bf16.msra.mxu1 %v10121_v28  ;;  %6131 = vmatprep.mubr.bf16.mxu1 %v10138_v31  ;;  %v10219_v28 = vld [vmem:[%s15033_s1 + $0x5e4] ss:$8 sps:$4 sm:$0xff]   ;;  %v10222_v31 = vld [vmem:[%s11541_s23 + $0x600] ss:$152 sps:$4 sm:$0xff]  }
  0x8a   : > { %6129 = vmatprep.subr.bf16.mxu1 %v10129_v32  ;;  %v10225_v32 = vld [vmem:[%s15033_s1 + $0x4d4] ss:$8 sps:$4 sm:$0xff]  }
  0x8b   : > { %6017 = vmatpush2.bf16.msra.mxu0 %v10124_v33  ;;  %v10223_v33 = vld [vmem:[%s15033_s1 + $0x4d0] ss:$8 sps:$4 sm:$0xff]  }
  0x8c   : > { %6212 = vmatprep.subr.bf16.mxu0 %v10135_v36  ;;  %v10229_v36 = vld [vmem:[%s15033_s1 + $0x5d0] ss:$8 sps:$4 sm:$0xff]  }
  0x8d   : > { %6130 = vmatpush2.bf16.msra.mxu1 %v10127_v34  ;;  %v10228_v34 = vld [vmem:[%s11541_s23 + $0x608] ss:$152 sps:$4 sm:$0xff]  }
  0x8e   : > { %6019 = vmatmul.mubr.bf16.vlgmr.msra.gmra.mxu0 %v10130_v35  ;;  %6325 = vmatprep.subr.bf16.mxu1 %v10141_v39  ;;  %v10231_v35 = vld [vmem:[%s15033_s1 + $0x5d4] ss:$8 sps:$4 sm:$0xff]  }
  0x8f   : > { %6213 = vmatpush1.bf16.msra.mxu0 %v10133_v37  ;;  %6028 = vmatprep.mubr.bf16.mxu0 %v10148_v41  ;;  %v10238_v37 = vld [vmem:[%s11541_s23 + $0x734] ss:$152 sps:$4 sm:$0xff]   ;;  %v10232_v41 = vld [vmem:[%s15033_s1 + $0x4c0] ss:$8 sps:$4 sm:$0xff]  }
  0x90   : > { %6132 = vmatmul.mubr.bf16.vlgmr.msra.gmra.mxu1 %v10136_v38  ;;  %6214 = vmatprep.subr.bf16.mxu0 %v10144_v42  ;;  %v10234_v38 = vld [vmem:[%s15033_s1 + $0x4c4] ss:$8 sps:$4 sm:$0xff]   ;;  %v10244_v39 = vld [vmem:[%s11541_s23 + $0x73c] ss:$152 sps:$4 sm:$0xff]   ;;  %v10235_v42 = vld [vmem:[%s15033_s1 + $0x5c0] ss:$8 sps:$4 sm:$0xff]  }
  0x91   : > { %6326 = vmatpush1.bf16.msra.mxu1 %v10139_v40  ;;  %6141 = vmatprep.mubr.bf16.mxu1 %v10154_v43  ;;  %v10237_v40 = vld [vmem:[%s15033_s1 + $0x5c4] ss:$8 sps:$4 sm:$0xff]   ;;  %v10240_v43 = vld [vmem:[%s11541_s23 + $0x730] ss:$152 sps:$4 sm:$0xff]  }
  0x92   : > { %6327 = vmatprep.subr.bf16.mxu1 %v10147_v44  ;;  %v10243_v44 = vld [vmem:[%s15033_s1 + $0x4b4] ss:$8 sps:$4 sm:$0xff]  }
  0x93   : > { %6215 = vmatpush1.bf16.msra.mxu0 %v10142_v45  ;;  %v10241_v45 = vld [vmem:[%s15033_s1 + $0x4b0] ss:$8 sps:$4 sm:$0xff]  }
  0x94   : > { %6216 = vmatprep.subr.bf16.mxu0 %v10153_v48  ;;  %v10247_v48 = vld [vmem:[%s15033_s1 + $0x5b0] ss:$8 sps:$4 sm:$0xff]  }
  0x95   : > { %6328 = vmatpush1.bf16.msra.mxu1 %v10145_v46  ;;  %v10246_v46 = vld [vmem:[%s11541_s23 + $0x738] ss:$152 sps:$4 sm:$0xff]  }
  0x96   : > { %6029 = vmatmul.mubr.bf16.gmra.mxu0 %v10150_v47  ;;  %6329 = vmatprep.subr.bf16.mxu1 %v10159_v51  ;;  %v10249_v47 = vld [vmem:[%s15033_s1 + $0x5b4] ss:$8 sps:$4 sm:$0xff]   ;;  %v10262_v51 = vld [vmem:[%s11541_s23 + $0x86c] ss:$152 sps:$4 sm:$0xff]  }
  0x97   : > { %6217 = vmatpush1.bf16.msra.mxu0 %v10151_v49  ;;  %6038 = vmatprep.mubr.bf16.mxu0 %v10166_v53  ;;  %v10256_v49 = vld [vmem:[%s11541_s23 + $0x864] ss:$152 sps:$4 sm:$0xff]   ;;  %v10250_v53 = vld [vmem:[%s15033_s1 + $0x4a0] ss:$8 sps:$4 sm:$0xff]  }
  0x98   : > { %6142 = vmatmul.mubr.bf16.gmra.mxu1 %v10156_v50  ;;  %6218 = vmatprep.subr.bf16.mxu0 %v10162_v54  ;;  %v10252_v50 = vld [vmem:[%s15033_s1 + $0x4a4] ss:$8 sps:$4 sm:$0xff]   ;;  %v10253_v54 = vld [vmem:[%s15033_s1 + $0x5a0] ss:$8 sps:$4 sm:$0xff]  }
  0x99   : > { %6330 = vmatpush1.bf16.msra.mxu1 %v10157_v52  ;;  %6151 = vmatprep.mubr.bf16.mxu1 %v10172_v55  ;;  %v10255_v52 = vld [vmem:[%s15033_s1 + $0x5a4] ss:$8 sps:$4 sm:$0xff]   ;;  %v10258_v55 = vld [vmem:[%s11541_s23 + $0x860] ss:$152 sps:$4 sm:$0xff]  }
  0x9a   : > { %6331 = vmatprep.subr.bf16.mxu1 %v10165_v56  ;;  %v10261_v56 = vld [vmem:[%s15033_s1 + $0x494] ss:$8 sps:$4 sm:$0xff]  }
  0x9b   : > { %6219 = vmatpush1.bf16.msra.mxu0 %v10160_v57  ;;  %v10259_v57 = vld [vmem:[%s15033_s1 + $0x490] ss:$8 sps:$4 sm:$0xff]  }
  0x9c   : > { %6220 = vmatprep.subr.bf16.mxu0 %v10171_v60  ;;  %v10265_v60 = vld [vmem:[%s15033_s1 + $0x590] ss:$8 sps:$4 sm:$0xff]  }
  0x9d   : > { %6332 = vmatpush1.bf16.msra.mxu1 %v10163_v58  ;;  %v10264_v58 = vld [vmem:[%s11541_s23 + $0x868] ss:$152 sps:$4 sm:$0xff]  }
  0x9e   : > { %6039 = vmatmul.mubr.bf16.gmra.mxu0 %v10168_v59  ;;  %6333 = vmatprep.subr.bf16.mxu1 %v10177_v63  ;;  %v10267_v59 = vld [vmem:[%s15033_s1 + $0x594] ss:$8 sps:$4 sm:$0xff]   ;;  %v10282_v63 = vld [vmem:[%s11541_s23 + $0x2c] ss:$152 sps:$4 sm:$0xff]  }
  0x9f   : > { %6221 = vmatpush1.bf16.msra.mxu0 %v10169_v61  ;;  %6048 = vmatprep.mubr.bf16.mxu0 %v10184_v1  ;;  %v10276_v61 = vld [vmem:[%s11541_s23 + $0x24] ss:$152 sps:$4 sm:$0xff]   ;;  %v10268_v1 = vld [vmem:[%s15033_s1 + $0x480] ss:$8 sps:$4 sm:$0xff]  }
  0xa0   : > { %6152 = vmatmul.mubr.bf16.gmra.mxu1 %v10174_v62  ;;  %6222 = vmatprep.subr.bf16.mxu0 %v10180_v2  ;;  %v10270_v62 = vld [vmem:[%s15033_s1 + $0x484] ss:$8 sps:$4 sm:$0xff]   ;;  %v10271_v2 = vld [vmem:[%s15033_s1 + $0x580] ss:$8 sps:$4 sm:$0xff]  }
  0xa1   : > { %6334 = vmatpush1.bf16.msra.mxu1 %v10175_v0  ;;  %6161 = vmatprep.mubr.bf16.mxu1 %v10190_v3  ;;  %v10273_v0 = vld [vmem:[%s15033_s1 + $0x584] ss:$8 sps:$4 sm:$0xff]   ;;  %v10274_v3 = vld [vmem:[%s11541_s23 + $0x20] ss:$152 sps:$4 sm:$0xff]  }
  0xa2   : > { %6335 = vmatprep.subr.bf16.mxu1 %v10183_v4  ;;  %v10279_v4 = vld [vmem:[%s15033_s1 + $0x674] ss:$8 sps:$4 sm:$0xff]  }
  0xa3   : > { %6223 = vmatpush1.bf16.msra.mxu0 %v10178_v5  ;;  %v10277_v5 = vld [vmem:[%s15033_s1 + $0x670] ss:$8 sps:$4 sm:$0xff]  }
  0xa4   : > { %6224 = vmatprep.subr.bf16.mxu0 %v10189_v8  ;;  %v10283_v8 = vld [vmem:[%s15033_s1 + $0x770] ss:$8 sps:$4 sm:$0xff]  }
  0xa5   : > { %6336 = vmatpush1.bf16.msra.mxu1 %v10181_v6  ;;  %v10280_v6 = vld [vmem:[%s11541_s23 + $0x28] ss:$152 sps:$4 sm:$0xff]  }
  0xa6   : > { %6049 = vmatmul.mubr.bf16.gmra.mxu0 %v10186_v7  ;;  %6337 = vmatprep.subr.bf16.mxu1 %v10195_v11  ;;  %v10285_v7 = vld [vmem:[%s15033_s1 + $0x774] ss:$8 sps:$4 sm:$0xff]  }
  0xa7   : > { %6225 = vmatpush1.bf16.msra.mxu0 %v10187_v9  ;;  %6058 = vmatprep.mubr.bf16.mxu0 %v10202_v13  ;;  %v10292_v9 = vld [vmem:[%s11541_s23 + $0x154] ss:$152 sps:$4 sm:$0xff]   ;;  %v10286_v13 = vld [vmem:[%s15033_s1 + $0x660] ss:$8 sps:$4 sm:$0xff]  }
  0xa8   : > { %6162 = vmatmul.mubr.bf16.gmra.mxu1 %v10192_v10  ;;  %6226 = vmatprep.subr.bf16.mxu0 %v10198_v14  ;;  %v10288_v10 = vld [vmem:[%s15033_s1 + $0x664] ss:$8 sps:$4 sm:$0xff]   ;;  %v10298_v11 = vld [vmem:[%s11541_s23 + $0x15c] ss:$152 sps:$4 sm:$0xff]   ;;  %v10289_v14 = vld [vmem:[%s15033_s1 + $0x760] ss:$8 sps:$4 sm:$0xff]  }
  0xa9   : > { %6338 = vmatpush1.bf16.msra.mxu1 %v10193_v12  ;;  %6171 = vmatprep.mubr.bf16.mxu1 %v10208_v15  ;;  %v10291_v12 = vld [vmem:[%s15033_s1 + $0x764] ss:$8 sps:$4 sm:$0xff]   ;;  %v10294_v15 = vld [vmem:[%s11541_s23 + $0x150] ss:$152 sps:$4 sm:$0xff]  }
  0xaa   : > { %6339 = vmatprep.subr.bf16.mxu1 %v10201_v16  ;;  %v10297_v16 = vld [vmem:[%s15033_s1 + $0x654] ss:$8 sps:$4 sm:$0xff]  }
  0xab   : > { %6227 = vmatpush1.bf16.msra.mxu0 %v10196_v17  ;;  %v10295_v17 = vld [vmem:[%s15033_s1 + $0x650] ss:$8 sps:$4 sm:$0xff]  }
  0xac   : > { %6228 = vmatprep.subr.bf16.mxu0 %v10207_v20  ;;  %v10301_v20 = vld [vmem:[%s15033_s1 + $0x750] ss:$8 sps:$4 sm:$0xff]  }
  0xad   : > { %6340 = vmatpush1.bf16.msra.mxu1 %v10199_v18  ;;  %v10300_v18 = vld [vmem:[%s11541_s23 + $0x158] ss:$152 sps:$4 sm:$0xff]  }
  0xae   : > { %6059 = vmatmul.mubr.bf16.gmra.mxu0 %v10204_v19  ;;  %6341 = vmatprep.subr.bf16.mxu1 %v10213_v23  ;;  %v10303_v19 = vld [vmem:[%s15033_s1 + $0x754] ss:$8 sps:$4 sm:$0xff]   ;;  %v10316_v23 = vld [vmem:[%s11541_s23 + $0x28c] ss:$152 sps:$4 sm:$0xff]  }
  0xaf   : > { %6229 = vmatpush2.bf16.msra.mxu0 %v10205_v21  ;;  %6068 = vmatprep.mubr.bf16.mxu0 %v10220_v25  ;;  %v10310_v21 = vld [vmem:[%s11541_s23 + $0x284] ss:$152 sps:$4 sm:$0xff]   ;;  %v10304_v25 = vld [vmem:[%s15033_s1 + $0x640] ss:$8 sps:$4 sm:$0xff]  }
  0xb0   : > { %6172 = vmatmul.mubr.bf16.gmra.mxu1 %v10210_v22  ;;  %6230 = vmatprep.subr.bf16.mxu0 %v10216_v26  ;;  %v10306_v22 = vld [vmem:[%s15033_s1 + $0x644] ss:$8 sps:$4 sm:$0xff]   ;;  %v10307_v26 = vld [vmem:[%s15033_s1 + $0x740] ss:$8 sps:$4 sm:$0xff]  }
  0xb1   : > { %6342 = vmatpush2.bf16.msra.mxu1 %v10211_v24  ;;  %6181 = vmatprep.mubr.bf16.mxu1 %v10226_v27  ;;  %v10309_v24 = vld [vmem:[%s15033_s1 + $0x744] ss:$8 sps:$4 sm:$0xff]   ;;  %v10312_v27 = vld [vmem:[%s11541_s23 + $0x280] ss:$152 sps:$4 sm:$0xff]  }
  0xb2   : > { %6343 = vmatprep.subr.bf16.mxu1 %v10219_v28  ;;  %v10315_v28 = vld [vmem:[%s15033_s1 + $0x634] ss:$8 sps:$4 sm:$0xff]  }
  0xb3   : > { %6231 = vmatpush2.bf16.msra.mxu0 %v10214_v29  ;;  %v10313_v29 = vld [vmem:[%s15033_s1 + $0x630] ss:$8 sps:$4 sm:$0xff]  }
  0xb4   : > { %6232 = vmatprep.subr.bf16.mxu0 %v10225_v32  ;;  %v10319_v32 = vld [vmem:[%s15033_s1 + $0x730] ss:$8 sps:$4 sm:$0xff]  }
  0xb5   : > { %6344 = vmatpush2.bf16.msra.mxu1 %v10217_v30  ;;  %v10318_v30 = vld [vmem:[%s11541_s23 + $0x288] ss:$152 sps:$4 sm:$0xff]  }
  0xb6   : > { %6069 = vmatmul.mubr.bf16.gmra.mxu0 %v10222_v31  ;;  %6345 = vmatprep.subr.bf16.mxu1 %v10231_v35  ;;  %v10321_v31 = vld [vmem:[%s15033_s1 + $0x734] ss:$8 sps:$4 sm:$0xff]  }
  0xb7   : > { %6233 = vmatpush2.bf16.msra.mxu0 %v10223_v33  ;;  %6078 = vmatprep.mubr.bf16.mxu0 %v10238_v37  ;;  %v10328_v33 = vld [vmem:[%s11541_s23 + $0x3b4] ss:$152 sps:$4 sm:$0xff]   ;;  %v10322_v37 = vld [vmem:[%s15033_s1 + $0x620] ss:$8 sps:$4 sm:$0xff]  }
  0xb8   : > { %6182 = vmatmul.mubr.bf16.gmra.mxu1 %v10228_v34  ;;  %6234 = vmatprep.subr.bf16.mxu0 %v10234_v38  ;;  %v10324_v34 = vld [vmem:[%s15033_s1 + $0x624] ss:$8 sps:$4 sm:$0xff]   ;;  %v10334_v35 = vld [vmem:[%s11541_s23 + $0x3bc] ss:$152 sps:$4 sm:$0xff]   ;;  %v10325_v38 = vld [vmem:[%s15033_s1 + $0x720] ss:$8 sps:$4 sm:$0xff]  }
  0xb9   : > { %6346 = vmatpush2.bf16.msra.mxu1 %v10229_v36  ;;  %6191 = vmatprep.mubr.bf16.mxu1 %v10244_v39  ;;  %v10327_v36 = vld [vmem:[%s15033_s1 + $0x724] ss:$8 sps:$4 sm:$0xff]   ;;  %v10330_v39 = vld [vmem:[%s11541_s23 + $0x3b0] ss:$152 sps:$4 sm:$0xff]  }
  0xba   : > { %6347 = vmatprep.subr.bf16.mxu1 %v10237_v40  ;;  %v10333_v40 = vld [vmem:[%s15033_s1 + $0x614] ss:$8 sps:$4 sm:$0xff]  }
  0xbb   : > { %6235 = vmatpush2.bf16.msra.mxu0 %v10232_v41  ;;  %v10331_v41 = vld [vmem:[%s15033_s1 + $0x610] ss:$8 sps:$4 sm:$0xff]  }
  0xbc   : > { %6236 = vmatprep.subr.bf16.mxu0 %v10243_v44  ;;  %v10337_v44 = vld [vmem:[%s15033_s1 + $0x710] ss:$8 sps:$4 sm:$0xff]  }
  0xbd   : > { %6348 = vmatpush2.bf16.msra.mxu1 %v10235_v42  ;;  %v10336_v42 = vld [vmem:[%s11541_s23 + $0x3b8] ss:$152 sps:$4 sm:$0xff]  }
  0xbe   : > { %6079 = vmatmul.mubr.bf16.gmra.mxu0 %v10240_v43  ;;  %6349 = vmatprep.subr.bf16.mxu1 %v10249_v47  ;;  %v10339_v43 = vld [vmem:[%s15033_s1 + $0x714] ss:$8 sps:$4 sm:$0xff]   ;;  %v10352_v47 = vld [vmem:[%s11541_s23 + $0x4ec] ss:$152 sps:$4 sm:$0xff]  }
  0xbf   : > { %6237 = vmatpush2.bf16.msra.mxu0 %v10241_v45  ;;  %6088 = vmatprep.mubr.bf16.mxu0 %v10256_v49  ;;  %v10346_v45 = vld [vmem:[%s11541_s23 + $0x4e4] ss:$152 sps:$4 sm:$0xff]   ;;  %v10340_v49 = vld [vmem:[%s15033_s1 + $0x600] ss:$8 sps:$4 sm:$0xff]  }
  0xc0   : > { %6192 = vmatmul.mubr.bf16.gmra.mxu1 %v10246_v46  ;;  %6238 = vmatprep.subr.bf16.mxu0 %v10252_v50  ;;  %v10342_v46 = vld [vmem:[%s15033_s1 + $0x604] ss:$8 sps:$4 sm:$0xff]   ;;  %v10343_v50 = vld [vmem:[%s15033_s1 + $0x700] ss:$8 sps:$4 sm:$0xff]  }
  0xc1   : > { %6350 = vmatpush2.bf16.msra.mxu1 %v10247_v48  ;;  %6201 = vmatprep.mubr.bf16.mxu1 %v10262_v51  ;;  %v10345_v48 = vld [vmem:[%s15033_s1 + $0x704] ss:$8 sps:$4 sm:$0xff]   ;;  %v10348_v51 = vld [vmem:[%s11541_s23 + $0x4e0] ss:$152 sps:$4 sm:$0xff]  }
  0xc2   : > { %6351 = vmatprep.subr.bf16.mxu1 %v10255_v52  ;;  %v10351_v52 = vld [vmem:[%s15033_s1 + $0x6f4] ss:$8 sps:$4 sm:$0xff]  }
  0xc3   : > { %6239 = vmatpush2.bf16.msra.mxu0 %v10250_v53  ;;  %v10349_v53 = vld [vmem:[%s15033_s1 + $0x6f0] ss:$8 sps:$4 sm:$0xff]  }
  0xc4   : > { %6240 = vmatprep.subr.bf16.mxu0 %v10261_v56  ;;  %v10355_v56 = vld [vmem:[%s15033_s1 + $0x7f0] ss:$8 sps:$4 sm:$0xff]  }
  0xc5   : > { %6352 = vmatpush2.bf16.msra.mxu1 %v10253_v54  ;;  %v10354_v54 = vld [vmem:[%s11541_s23 + $0x4e8] ss:$152 sps:$4 sm:$0xff]  }
  0xc6   : > { %6089 = vmatmul.mubr.bf16.gmra.mxu0 %v10258_v55  ;;  %6353 = vmatprep.subr.bf16.mxu1 %v10267_v59  ;;  %v10357_v55 = vld [vmem:[%s15033_s1 + $0x7f4] ss:$8 sps:$4 sm:$0xff]  }
  0xc7   : > { %6241 = vmatpush2.bf16.msra.mxu0 %v10259_v57  ;;  %6244 = vmatprep.mubr.bf16.mxu0 %v10276_v61  ;;  %v10364_v57 = vld [vmem:[%s11541_s23 + $0x614] ss:$152 sps:$4 sm:$0xff]   ;;  %v10358_v61 = vld [vmem:[%s15033_s1 + $0x6e0] ss:$8 sps:$4 sm:$0xff]  }
  0xc8   : > { %6202 = vmatmul.mubr.bf16.gmra.mxu1 %v10264_v58  ;;  %6242 = vmatprep.subr.bf16.mxu0 %v10270_v62  ;;  %v10360_v58 = vld [vmem:[%s15033_s1 + $0x6e4] ss:$8 sps:$4 sm:$0xff]   ;;  %v10370_v59 = vld [vmem:[%s11541_s23 + $0x61c] ss:$152 sps:$4 sm:$0xff]   ;;  %v10361_v62 = vld [vmem:[%s15033_s1 + $0x7e0] ss:$8 sps:$4 sm:$0xff]  }
  0xc9   : > { %6354 = vmatpush2.bf16.msra.mxu1 %v10265_v60  ;;  %6357 = vmatprep.mubr.bf16.mxu1 %v10282_v63  ;;  %v10363_v60 = vld [vmem:[%s15033_s1 + $0x7e4] ss:$8 sps:$4 sm:$0xff]   ;;  %v10366_v63 = vld [vmem:[%s11541_s23 + $0x610] ss:$152 sps:$4 sm:$0xff]  }
  0xca   : > { %6355 = vmatprep.subr.bf16.mxu1 %v10273_v0  ;;  %v10369_v0 = vld [vmem:[%s15033_s1 + $0x6d4] ss:$8 sps:$4 sm:$0xff]  }
  0xcb   : > { %6243 = vmatpush2.bf16.msra.mxu0 %v10268_v1  ;;  %v10367_v1 = vld [vmem:[%s15033_s1 + $0x6d0] ss:$8 sps:$4 sm:$0xff]  }
  0xcc   : > { %6438 = vmatprep.subr.bf16.mxu0 %v10279_v4  ;;  %v10373_v4 = vld [vmem:[%s15033_s1 + $0x7d0] ss:$8 sps:$4 sm:$0xff]  }
  0xcd   : > { %6356 = vmatpush2.bf16.msra.mxu1 %v10271_v2  ;;  %v10372_v2 = vld [vmem:[%s11541_s23 + $0x618] ss:$152 sps:$4 sm:$0xff]  }
  0xce   : > { %6245 = vmatmul.mubr.bf16.vlgmr.msra.gmra.mxu0 %v10274_v3  ;;  %6551 = vmatprep.subr.bf16.mxu1 %v10285_v7  ;;  %v10375_v3 = vld [vmem:[%s15033_s1 + $0x7d4] ss:$8 sps:$4 sm:$0xff]   ;;  %v10388_v7 = vld [vmem:[%s11541_s23 + $0x74c] ss:$152 sps:$4 sm:$0xff]  }
  0xcf   : > { %6439 = vmatpush1.bf16.msra.mxu0 %v10277_v5  ;;  %6254 = vmatprep.mubr.bf16.mxu0 %v10292_v9  ;;  %v10382_v5 = vld [vmem:[%s11541_s23 + $0x744] ss:$152 sps:$4 sm:$0xff]   ;;  %v10376_v9 = vld [vmem:[%s15033_s1 + $0x6c0] ss:$8 sps:$4 sm:$0xff]  }
  0xd0   : > { %6358 = vmatmul.mubr.bf16.vlgmr.msra.gmra.mxu1 %v10280_v6  ;;  %6440 = vmatprep.subr.bf16.mxu0 %v10288_v10  ;;  %v10378_v6 = vld [vmem:[%s15033_s1 + $0x6c4] ss:$8 sps:$4 sm:$0xff]   ;;  %v10379_v10 = vld [vmem:[%s15033_s1 + $0x7c0] ss:$8 sps:$4 sm:$0xff]  }
  0xd1   : > { %6552 = vmatpush1.bf16.msra.mxu1 %v10283_v8  ;;  %6367 = vmatprep.mubr.bf16.mxu1 %v10298_v11  ;;  %v10381_v8 = vld [vmem:[%s15033_s1 + $0x7c4] ss:$8 sps:$4 sm:$0xff]   ;;  %v10387_v11 = vld [vmem:[%s15033_s1 + $0x6b4] ss:$8 sps:$4 sm:$0xff]  }
  0xd2   : > { %6553 = vmatprep.subr.bf16.mxu1 %v10291_v12  ;;  %v10384_v12 = vld [vmem:[%s11541_s23 + $0x740] ss:$152 sps:$4 sm:$0xff]  }
  0xd3   : > { %6441 = vmatpush1.bf16.msra.mxu0 %v10286_v13  ;;  %v10385_v13 = vld [vmem:[%s15033_s1 + $0x6b0] ss:$8 sps:$4 sm:$0xff]  }
  0xd4   : > { %6442 = vmatprep.subr.bf16.mxu0 %v10297_v16  ;;  %v10400_v16 = vld [vmem:[%s11541_s23 + $0x874] ss:$152 sps:$4 sm:$0xff]  }
  0xd5   : > { %6554 = vmatpush1.bf16.msra.mxu1 %v10289_v14  ;;  %v10390_v14 = vld [vmem:[%s11541_s23 + $0x748] ss:$152 sps:$4 sm:$0xff]  }
  0xd6   : > { %6255 = vmatmul.mubr.bf16.gmra.mxu0 %v10294_v15  ;;  %6555 = vmatprep.subr.bf16.mxu1 %v10303_v19  ;;  %v10393_v15 = vld [vmem:[%s15033_s1 + $0x7b4] ss:$8 sps:$4 sm:$0xff]  }
  0xd7   : > { %6443 = vmatpush1.bf16.msra.mxu0 %v10295_v17  ;;  %6264 = vmatprep.mubr.bf16.mxu0 %v10310_v21  ;;  %v10396_v17 = vld [vmem:[%s15033_s1 + $0x6a4] ss:$8 sps:$4 sm:$0xff]   ;;  %v10406_v19 = vld [vmem:[%s11541_s23 + $0x87c] ss:$152 sps:$4 sm:$0xff]  }
  0xd8   : > { %6368 = vmatmul.mubr.bf16.gmra.mxu1 %v10300_v18  ;;  %6444 = vmatprep.subr.bf16.mxu0 %v10306_v22  ;;  %v10391_v18 = vld [vmem:[%s15033_s1 + $0x7b0] ss:$8 sps:$4 sm:$0xff]   ;;  %v10399_v21 = vld [vmem:[%s15033_s1 + $0x7a4] ss:$8 sps:$4 sm:$0xff]   ;;  %v10397_v22 = vld [vmem:[%s15033_s1 + $0x7a0] ss:$8 sps:$4 sm:$0xff]  }
  0xd9   : > { %6556 = vmatpush1.bf16.msra.mxu1 %v10301_v20  ;;  %6377 = vmatprep.mubr.bf16.mxu1 %v10316_v23  ;;  %v10394_v20 = vld [vmem:[%s15033_s1 + $0x6a0] ss:$8 sps:$4 sm:$0xff]   ;;  %v1241_v23 = vlaneseq }
  0xda   : > { %6557 = vmatprep.subr.bf16.mxu1 %v10309_v24  ;;  %v10405_v24 = vld [vmem:[%s15033_s1 + $0x694] ss:$8 sps:$4 sm:$0xff]  }
  0xdb   : > { %6445 = vmatpush1.bf16.msra.mxu0 %v10304_v25  ;;  %v10402_v25 = vld [vmem:[%s11541_s23 + $0x870] ss:$152 sps:$4 sm:$0xff]  }
  0xdc   : > { %6446 = vmatprep.subr.bf16.mxu0 %v10315_v28  ;;  %v10411_v28 = vld [vmem:[%s15033_s1 + $0x794] ss:$8 sps:$4 sm:$0xff]  }
  0xdd   : > { %6558 = vmatpush1.bf16.msra.mxu1 %v10307_v26  ;;  %v10403_v26 = vld [vmem:[%s15033_s1 + $0x690] ss:$8 sps:$4 sm:$0xff]  }
  0xde   : > { %6265 = vmatmul.mubr.bf16.gmra.mxu0 %v10312_v27  ;;  %6559 = vmatprep.subr.bf16.mxu1 %v10321_v31  ;;  %v10408_v27 = vld [vmem:[%s11541_s23 + $0x878] ss:$152 sps:$4 sm:$0xff]   ;;  %v10414_v31 = vld [vmem:[%s15033_s1 + $0x684] ss:$8 sps:$4 sm:$0xff]  }
  0xdf   : > { %6447 = vmatpush1.bf16.msra.mxu0 %v10313_v29  ;;  %6274 = vmatprep.mubr.bf16.mxu0 %v10328_v33  ;;  %v10420_v29 = vld [vmem:[%s11541_s23 + $0x34] ss:$152 sps:$4 sm:$0xff]  }
  0xe0   : > { %6378 = vmatmul.mubr.bf16.gmra.mxu1 %v10318_v30  ;;  %6448 = vmatprep.subr.bf16.mxu0 %v10324_v34  ;;  %v12261_v30 = vshrl.u32 %v1241_v23, 7  ;;  %v10426_v33 = vld [vmem:[%s11541_s23 + $0x3c] ss:$152 sps:$4 sm:$0xff]   ;;  %v10412_v34 = vld [vmem:[%s15033_s1 + $0x680] ss:$8 sps:$4 sm:$0xff]  }
  0xe1   : > { %6560 = vmatpush1.bf16.msra.mxu1 %v10319_v32  ;;  %6387 = vmatprep.mubr.bf16.mxu1 %v10334_v35  ;;  %v10409_v32 = vld [vmem:[%s15033_s1 + $0x790] ss:$8 sps:$4 sm:$0xff]   ;;  %v10417_v35 = vld [vmem:[%s15033_s1 + $0x784] ss:$8 sps:$4 sm:$0xff]  }
  0xe2   : > { %6561 = vmatprep.subr.bf16.mxu1 %v10327_v36  ;;  %15066 = vst [vmem:[#allocation3_spill] sm:$0xff] %v12261_v30  ;;  %v10415_v36 = vld [vmem:[%s15033_s1 + $0x780] ss:$8 sps:$4 sm:$0xff]  }
  0xe3   : > { %6449 = vmatpush1.bf16.msra.mxu0 %v10322_v37  ;;  %v1239_v37 = vld [vmem:[%s15034_s2] sm:$0x3] }
  0xe4   : > { %6450 = vmatprep.subr.bf16.mxu0 %v10333_v40  ;;  %v10418_v40 = vld [vmem:[%s11541_s23 + $0x30] ss:$152 sps:$4 sm:$0xff]  }
  0xe5   : > { %6562 = vmatpush1.bf16.msra.mxu1 %v10325_v38  ;;  %v12283_v38 = vsub.s32 0, %v12261_v30 }
  0xe6   : > { %6275 = vmatmul.mubr.bf16.gmra.mxu0 %v10330_v39  ;;  %6563 = vmatprep.subr.bf16.mxu1 %v10339_v43  ;;  %v10423_v39 = vld [vmem:[%s15033_s1 + $0x874] ss:$8 sps:$4 sm:$0xff]   ;;  %v10424_v43 = vld [vmem:[%s11541_s23 + $0x38] ss:$152 sps:$4 sm:$0xff]  }
  0xe7   : > { %6451 = vmatpush1.bf16.msra.mxu0 %v10331_v41  ;;  %6284 = vmatprep.mubr.bf16.mxu0 %v10346_v45  ;;  %15067 = vst [vmem:[#allocation4_spill] sm:$0xff] %v12283_v38  ;;  %v10421_v41 = vld [vmem:[%s15033_s1 + $0x870] ss:$8 sps:$4 sm:$0xff]   ;;  %v12300_v45 = vrot.slane %v1239_v37, %v12283_v38 }
  0xe8   : > { %6388 = vmatmul.mubr.bf16.gmra.mxu1 %v10336_v42  ;;  %6452 = vmatprep.subr.bf16.mxu0 %v10342_v46  ;;  %v12293_v42 = vsub.s32 1, %v12261_v30  ;;  %v10436_v46 = vld [vmem:[%s11541_s23 + $0x164] ss:$152 sps:$4 sm:$0xff]  }
  0xe9   : > { %6564 = vmatpush1.bf16.msra.mxu1 %v10337_v44  ;;  %6397 = vmatprep.mubr.bf16.mxu1 %v10352_v47  ;;  %v10429_v44 = vld [vmem:[%s15033_s1 + $0x974] ss:$8 sps:$4 sm:$0xff]   ;;  %v10432_v47 = vld [vmem:[%s15033_s1 + $0x864] ss:$8 sps:$4 sm:$0xff]  }
  0xea   : > { %6565 = vmatprep.subr.bf16.mxu1 %v10345_v48  ;;  %15068 = vst [vmem:[#allocation5_spill] sm:$0xff] %v12293_v42  ;;  %v12307_v48 = vrot.slane %v1239_v37, %v12293_v42  ;;  %v10468_v37 = vld [vmem:[%s15033_s1 + $0x824] ss:$8 sps:$4 sm:$0xff]  }
  0xeb   : > { %6453 = vmatpush1.bf16.msra.mxu0 %v10340_v49  ;;  %v10427_v49 = vld [vmem:[%s15033_s1 + $0x970] ss:$8 sps:$4 sm:$0xff]  }
  0xec   : > { %6454 = vmatprep.subr.bf16.mxu0 %v10351_v52  ;;  %v10430_v52 = vld [vmem:[%s15033_s1 + $0x860] ss:$8 sps:$4 sm:$0xff]  }
  0xed   : > { %6566 = vmatpush1.bf16.msra.mxu1 %v10343_v50  ;;  %v10442_v50 = vld [vmem:[%s11541_s23 + $0x16c] ss:$152 sps:$4 sm:$0xff]  }
  0xee   : > { %6285 = vmatmul.mubr.bf16.gmra.mxu0 %v10348_v51  ;;  %6567 = vmatprep.subr.bf16.mxu1 %v10357_v55  ;;  %v10433_v55 = vld [vmem:[%s15033_s1 + $0x960] ss:$8 sps:$4 sm:$0xff]  }
  0xef   : > { %6455 = vmatpush2.bf16.msra.mxu0 %v10349_v53  ;;  %6294 = vmatprep.mubr.bf16.mxu0 %v10364_v57  ;;  %v10435_v53 = vld [vmem:[%s15033_s1 + $0x964] ss:$8 sps:$4 sm:$0xff]  }
  0xf0   : > { %6398 = vmatmul.mubr.bf16.gmra.mxu1 %v10354_v54  ;;  %6456 = vmatprep.subr.bf16.mxu0 %v10360_v58  ;;  %v10441_v58 = vld [vmem:[%s15033_s1 + $0x854] ss:$8 sps:$4 sm:$0xff]  }
  0xf1   : > { %6568 = vmatpush2.bf16.msra.mxu1 %v10355_v56  ;;  %6407 = vmatprep.mubr.bf16.mxu1 %v10370_v59 }
  0xf2   : > { %6569 = vmatprep.subr.bf16.mxu1 %v10363_v60 }
  0xf3   : > { %6457 = vmatpush2.bf16.msra.mxu0 %v10358_v61  ;;  %v10438_v61 = vld [vmem:[%s11541_s23 + $0x160] ss:$152 sps:$4 sm:$0xff]  }
  0xf4   : > { %6458 = vmatprep.subr.bf16.mxu0 %v10369_v0 }
  0xf5   : > { %6570 = vmatpush2.bf16.msra.mxu1 %v10361_v62  ;;  %v10439_v62 = vld [vmem:[%s15033_s1 + $0x850] ss:$8 sps:$4 sm:$0xff]  }
  0xf6   : > { %6295 = vmatmul.mubr.bf16.gmra.mxu0 %v10366_v63  ;;  %6571 = vmatprep.subr.bf16.mxu1 %v10375_v3 }
  0xf7   : > { %6459 = vmatpush2.bf16.msra.mxu0 %v10367_v1  ;;  %6304 = vmatprep.mubr.bf16.mxu0 %v10382_v5  ;;  %v10444_v1 = vld [vmem:[%s11541_s23 + $0x168] ss:$152 sps:$4 sm:$0xff]   ;;  %v10454_v5 = vld [vmem:[%s11541_s23 + $0x294] ss:$152 sps:$4 sm:$0xff]  }
  0xf8   : > { %6408 = vmatmul.mubr.bf16.gmra.mxu1 %v10372_v2  ;;  %6460 = vmatprep.subr.bf16.mxu0 %v10378_v6  ;;  %v10447_v2 = vld [vmem:[%s15033_s1 + $0x954] ss:$8 sps:$4 sm:$0xff]  }
  0xf9   : > { %6572 = vmatpush2.bf16.msra.mxu1 %v10373_v4  ;;  %6417 = vmatprep.mubr.bf16.mxu1 %v10388_v7 }
  0xfa   : > { %6573 = vmatprep.subr.bf16.mxu1 %v10381_v8  ;;  %v10450_v8 = vld [vmem:[%s15033_s1 + $0x844] ss:$8 sps:$4 sm:$0xff]  }
  0xfb   : > { %6461 = vmatpush2.bf16.msra.mxu0 %v10376_v9 }
  0xfc   : > { %6462 = vmatprep.subr.bf16.mxu0 %v10387_v11  ;;  %v10445_v11 = vld [vmem:[%s15033_s1 + $0x950] ss:$8 sps:$4 sm:$0xff]  }
  0xfd   : > { %6574 = vmatpush2.bf16.msra.mxu1 %v10379_v10 }
  0xfe   : > { %6305 = vmatmul.mubr.bf16.gmra.mxu0 %v10384_v12  ;;  %6575 = vmatprep.subr.bf16.mxu1 %v10393_v15  ;;  %v10460_v12 = vld [vmem:[%s11541_s23 + $0x29c] ss:$152 sps:$4 sm:$0xff]   ;;  %v10448_v15 = vld [vmem:[%s15033_s1 + $0x840] ss:$8 sps:$4 sm:$0xff]  }
  0xff   : > { %6463 = vmatpush2.bf16.msra.mxu0 %v10385_v13  ;;  %6314 = vmatprep.mubr.bf16.mxu0 %v10400_v16  ;;  %v10453_v16 = vld [vmem:[%s15033_s1 + $0x944] ss:$8 sps:$4 sm:$0xff]  }
 0x100   : > { %6418 = vmatmul.mubr.bf16.gmra.mxu1 %v10390_v14  ;;  %6464 = vmatprep.subr.bf16.mxu0 %v10396_v17 }
 0x101   : > { %6576 = vmatpush2.bf16.msra.mxu1 %v10391_v18  ;;  %6427 = vmatprep.mubr.bf16.mxu1 %v10406_v19  ;;  %v10451_v19 = vld [vmem:[%s15033_s1 + $0x940] ss:$8 sps:$4 sm:$0xff]  }
 0x102   : > { %6577 = vmatprep.subr.bf16.mxu1 %v10399_v21 }
 0x103   : > { %6465 = vmatpush2.bf16.msra.mxu0 %v10394_v20 }
 0x104   : > { %6466 = vmatprep.subr.bf16.mxu0 %v10405_v24 }
 0x105   : > { %6578 = vmatpush2.bf16.msra.mxu1 %v10397_v22  ;;  %v10459_v22 = vld [vmem:[%s15033_s1 + $0x834] ss:$8 sps:$4 sm:$0xff]  }
 0x106   : > { %6315 = vmatmul.mubr.bf16.gmra.mxu0 %v10402_v25  ;;  %6579 = vmatprep.subr.bf16.mxu1 %v10411_v28  ;;  %v10456_v25 = vld [vmem:[%s11541_s23 + $0x290] ss:$152 sps:$4 sm:$0xff]  }
 0x107   : > { %6467 = vmatpush2.bf16.msra.mxu0 %v10403_v26  ;;  %6470 = vmatprep.mubr.bf16.mxu0 %v10420_v29  ;;  %v10457_v26 = vld [vmem:[%s15033_s1 + $0x830] ss:$8 sps:$4 sm:$0xff]  }
 0x108   : > { %6428 = vmatmul.mubr.bf16.gmra.mxu1 %v10408_v27  ;;  %6468 = vmatprep.subr.bf16.mxu0 %v10414_v31  ;;  %v10462_v29 = vld [vmem:[%s11541_s23 + $0x298] ss:$152 sps:$4 sm:$0xff]   ;;  %v10465_v31 = vld [vmem:[%s15033_s1 + $0x934] ss:$8 sps:$4 sm:$0xff]  }
 0x109   : > { %6580 = vmatpush2.bf16.msra.mxu1 %v10409_v32  ;;  %6583 = vmatprep.mubr.bf16.mxu1 %v10426_v33 }
 0x10a   : > { %6581 = vmatprep.subr.bf16.mxu1 %v10417_v35 }
 0x10b   : > { %6469 = vmatpush2.bf16.msra.mxu0 %v10412_v34  ;;  %v10472_v34 = vld [vmem:[%s11541_s23 + $0x3c4] ss:$152 sps:$4 sm:$0xff]  }
 0x10c   : > { %6664 = vmatprep.subr.bf16.mxu0 %v10423_v39 }
 0x10d   : > { %6582 = vmatpush2.bf16.msra.mxu1 %v10415_v36 }
 0x10e   : > { %v5794_v51 = vpop.f32.mrf.mxu0  ;;  %6471 = vmatmul.mubr.bf16.vlgmr.msra.gmra.mxu0 %v10418_v40  ;;  %6777 = vmatprep.subr.bf16.mxu1 %v10429_v44 }
 0x10f   : > { %v5795_v54 = vadd.f32 %v5794_v51, %v12300_v45  ;;  %6665 = vmatpush1.bf16.msra.mxu0 %v10421_v41  ;;  %6480 = vmatprep.mubr.bf16.mxu0 %v10436_v46  ;;  %v10463_v41 = vld [vmem:[%s15033_s1 + $0x930] ss:$8 sps:$4 sm:$0xff]  }
 0x110   : > { %v5796_v56 = vpop.f32.mrf.mxu0  ;;  %v5907_v57 = vpop.f32.mrf.mxu1  ;;  %6584 = vmatmul.mubr.bf16.vlgmr.msra.gmra.mxu1 %v10424_v43  ;;  %6666 = vmatprep.subr.bf16.mxu0 %v10432_v47  ;;  %v10478_v43 = vld [vmem:[%s11541_s23 + $0x3cc] ss:$152 sps:$4 sm:$0xff]   ;;  %v10466_v47 = vld [vmem:[%s15033_s1 + $0x820] ss:$8 sps:$4 sm:$0xff]  }
 0x111   : > { %v5797_v59 = vadd.f32 %v5796_v56, %v12307_v48  ;;  %v12327_v60 = vadd.f32 %v5907_v57, %v5795_v54  ;;  %6778 = vmatpush1.bf16.msra.mxu1 %v10427_v49  ;;  %6593 = vmatprep.mubr.bf16.mxu1 %v10442_v50  ;;  %v10471_v49 = vld [vmem:[%s15033_s1 + $0x924] ss:$8 sps:$4 sm:$0xff]  }
 0x112   : > { %v5798_v63 = vpop.f32.mrf.mxu0  ;;  %v5909_v0 = vpop.f32.mrf.mxu1  ;;  %6779 = vmatprep.subr.bf16.mxu1 %v10435_v53 }
 0x113   : > { %v5799_v3 = vadd.f32 %v5798_v63, %v12300_v45  ;;  %v12338_v4 = vadd.f32 %v5909_v0, %v5797_v59  ;;  %6667 = vmatpush1.bf16.msra.mxu0 %v10430_v52  ;;  %v10469_v52 = vld [vmem:[%s15033_s1 + $0x920] ss:$8 sps:$4 sm:$0xff]   ;;  %v10475_v59 = vld [vmem:[%s15033_s1 + $0x810] ss:$8 sps:$4 sm:$0xff]   ;;  %v10483_v0 = vld [vmem:[%s15033_s1 + $0x914] ss:$8 sps:$4 sm:$0xff]  }
 0x114   : > { %v5800_v6 = vpop.f32.mrf.mxu0  ;;  %v5911_v7 = vpop.f32.mrf.mxu1  ;;  %6668 = vmatprep.subr.bf16.mxu0 %v10441_v58  ;;  %v10474_v58 = vld [vmem:[%s11541_s23 + $0x3c0] ss:$152 sps:$4 sm:$0xff]  }
 0x115   : > { %v5801_v9 = vadd.f32 %v5800_v6, %v12307_v48  ;;  %v12345_v10 = vadd.f32 %v5911_v7, %v5799_v3  ;;  %6780 = vmatpush1.bf16.msra.mxu1 %v10433_v55  ;;  %v10477_v55 = vld [vmem:[%s15033_s1 + $0x814] ss:$8 sps:$4 sm:$0xff]   ;;  %v10480_v63 = vld [vmem:[%s11541_s23 + $0x3c8] ss:$152 sps:$4 sm:$0xff]   ;;  %v10486_v7 = vld [vmem:[%s15033_s1 + $0x804] ss:$8 sps:$4 sm:$0xff]  }
 0x116   : > { %v5804_v13 = vpop.f32.mrf.mxu0  ;;  %v5913_v14 = vpop.f32.mrf.mxu1  ;;  %6481 = vmatmul.mubr.bf16.gmra.mxu0 %v10438_v61  ;;  %6781 = vmatprep.subr.bf16.mxu1 %v10447_v2  ;;  %v10492_v3 = vld [vmem:[%s11541_s23 + $0x4f4] ss:$152 sps:$4 sm:$0xff]  }
 0x117   : > { %v5805_v17 = vadd.f32 %v5804_v13, %v12300_v45  ;;  %v12358_v18 = vadd.f32 %v5913_v14, %v5801_v9  ;;  %6669 = vmatpush1.bf16.msra.mxu0 %v10439_v62  ;;  %6490 = vmatprep.mubr.bf16.mxu0 %v10454_v5 }
 0x118   : > { %v5806_v20 = vpop.f32.mrf.mxu0  ;;  %v5917_v21 = vpop.f32.mrf.mxu1  ;;  %6594 = vmatmul.mubr.bf16.gmra.mxu1 %v10444_v1  ;;  %6670 = vmatprep.subr.bf16.mxu0 %v10450_v8 }
 0x119   : > { %v5807_v23 = vadd.f32 %v5806_v20, %v12307_v48  ;;  %v12367_v24 = vadd.f32 %v5917_v21, %v5805_v17  ;;  %6782 = vmatpush1.bf16.msra.mxu1 %v10445_v11  ;;  %6603 = vmatprep.mubr.bf16.mxu1 %v10460_v12  ;;  %v10481_v11 = vld [vmem:[%s15033_s1 + $0x910] ss:$8 sps:$4 sm:$0xff]   ;;  %v10498_v12 = vld [vmem:[%s11541_s23 + $0x4fc] ss:$152 sps:$4 sm:$0xff]   ;;  %v10487_v20 = vld [vmem:[%s15033_s1 + $0x900] ss:$8 sps:$4 sm:$0xff]  }
 0x11a   : > { %v5808_v27 = vpop.f32.mrf.mxu0  ;;  %v5919_v28 = vpop.f32.mrf.mxu1  ;;  %6783 = vmatprep.subr.bf16.mxu1 %v10453_v16  ;;  %v10489_v16 = vld [vmem:[%s15033_s1 + $0x904] ss:$8 sps:$4 sm:$0xff]  }
 0x11b   : > { %v5809_v32 = vadd.f32 %v5808_v27, %v12300_v45  ;;  %v12378_v33 = vadd.f32 %v5919_v28, %v5807_v23  ;;  %6671 = vmatpush1.bf16.msra.mxu0 %v10448_v15  ;;  %v10484_v15 = vld [vmem:[%s15033_s1 + $0x800] ss:$8 sps:$4 sm:$0xff]   ;;  %v10495_v23 = vld [vmem:[%s15033_s1 + $0x8f4] ss:$8 sps:$4 sm:$0xff]   ;;  %v10493_v28 = vld [vmem:[%s15033_s1 + $0x8f0] ss:$8 sps:$4 sm:$0xff]  }
 0x11c   : > { %v5810_v35 = vpop.f32.mrf.mxu0  ;;  %v5921_v36 = vpop.f32.mrf.mxu1  ;;  %6672 = vmatprep.subr.bf16.mxu0 %v10459_v22  ;;  %v10490_v27 = vld [vmem:[%s11541_s23 + $0x4f0] ss:$152 sps:$4 sm:$0xff]  }
 0x11d   : > { %v5811_v39 = vadd.f32 %v5810_v35, %v12307_v48  ;;  %v12385_v40 = vadd.f32 %v5921_v36, %v5809_v32  ;;  %6784 = vmatpush1.bf16.msra.mxu1 %v10451_v19  ;;  %v10496_v32 = vld [vmem:[%s11541_s23 + $0x4f8] ss:$152 sps:$4 sm:$0xff]  }
 0x11e   : > { %v5814_v44 = vpop.f32.mrf.mxu0  ;;  %v5923_v46 = vpop.f32.mrf.mxu1  ;;  %6491 = vmatmul.mubr.bf16.gmra.mxu0 %v10456_v25  ;;  %6785 = vmatprep.subr.bf16.mxu1 %v10465_v31 }
 0x11f   : > { %v5815_v50 = vadd.f32 %v5814_v44, %v12300_v45  ;;  %v12398_v51 = vadd.f32 %v5923_v46, %v5811_v39  ;;  %6673 = vmatpush1.bf16.msra.mxu0 %v10457_v26  ;;  %6500 = vmatprep.mubr.bf16.mxu0 %v10472_v34  ;;  %v10501_v34 = vld [vmem:[%s15033_s1 + $0x9f4] ss:$8 sps:$4 sm:$0xff]  }
 0x120   : > { %v5816_v53 = vpop.f32.mrf.mxu0  ;;  %v5927_v54 = vpop.f32.mrf.mxu1  ;;  %6604 = vmatmul.mubr.bf16.gmra.mxu1 %v10462_v29  ;;  %6674 = vmatprep.subr.bf16.mxu0 %v10468_v37  ;;  %v10510_v37 = vld [vmem:[%s11541_s23 + $0x624] ss:$152 sps:$4 sm:$0xff]  }
 0x121   : > { %v5817_v56 = vadd.f32 %v5816_v53, %v12307_v48  ;;  %v12407_v57 = vadd.f32 %v5927_v54, %v5815_v50  ;;  %6786 = vmatpush1.bf16.msra.mxu1 %v10463_v41  ;;  %6613 = vmatprep.mubr.bf16.mxu1 %v10478_v43  ;;  %v10504_v43 = vld [vmem:[%s15033_s1 + $0x8e4] ss:$8 sps:$4 sm:$0xff]   ;;  %v10502_v53 = vld [vmem:[%s15033_s1 + $0x8e0] ss:$8 sps:$4 sm:$0xff]  }
 0x122   : > { %v5818_v61 = vpop.f32.mrf.mxu0  ;;  %v5929_v62 = vpop.f32.mrf.mxu1  ;;  %6787 = vmatprep.subr.bf16.mxu1 %v10471_v49  ;;  %v10516_v49 = vld [vmem:[%s11541_s23 + $0x62c] ss:$152 sps:$4 sm:$0xff]  }
 0x123   : > { %v5819_v1 = vadd.f32 %v5818_v61, %v12300_v45  ;;  %v12418_v2 = vadd.f32 %v5929_v62, %v5817_v56  ;;  %6675 = vmatpush1.bf16.msra.mxu0 %v10466_v47  ;;  %v10499_v47 = vld [vmem:[%s15033_s1 + $0x9f0] ss:$8 sps:$4 sm:$0xff]   ;;  %v10507_v54 = vld [vmem:[%s15033_s1 + $0x9e4] ss:$8 sps:$4 sm:$0xff]   ;;  %v10513_v62 = vld [vmem:[%s15033_s1 + $0x8d4] ss:$8 sps:$4 sm:$0xff]  }
 0x124   : > { %v5820_v5 = vpop.f32.mrf.mxu0  ;;  %v5931_v6 = vpop.f32.mrf.mxu1  ;;  %6676 = vmatprep.subr.bf16.mxu0 %v10477_v55 }
 0x125   : > { %v5821_v8 = vadd.f32 %v5820_v5, %v12307_v48  ;;  %v12425_v9 = vadd.f32 %v5931_v6, %v5819_v1  ;;  %6788 = vmatpush1.bf16.msra.mxu1 %v10469_v52  ;;  %v10508_v1 = vld [vmem:[%s11541_s23 + $0x620] ss:$152 sps:$4 sm:$0xff]  }
 0x126   : > { %v5824_v13 = vpop.f32.mrf.mxu0  ;;  %v5933_v14 = vpop.f32.mrf.mxu1  ;;  %6501 = vmatmul.mubr.bf16.gmra.mxu0 %v10474_v58  ;;  %6789 = vmatprep.subr.bf16.mxu1 %v10483_v0  ;;  %v10505_v58 = vld [vmem:[%s15033_s1 + $0x9e0] ss:$8 sps:$4 sm:$0xff]  }
 0x127   : > { %v5825_v17 = vadd.f32 %v5824_v13, %v12300_v45  ;;  %v12438_v19 = vadd.f32 %v5933_v14, %v5821_v8  ;;  %6677 = vmatpush1.bf16.msra.mxu0 %v10475_v59  ;;  %6510 = vmatprep.mubr.bf16.mxu0 %v10492_v3  ;;  %v10511_v3 = vld [vmem:[%s15033_s1 + $0x8d0] ss:$8 sps:$4 sm:$0xff]   ;;  %v10519_v8 = vld [vmem:[%s15033_s1 + $0x9d4] ss:$8 sps:$4 sm:$0xff]  }
 0x128   : > { %v5826_v21 = vpop.f32.mrf.mxu0  ;;  %v5937_v22 = vpop.f32.mrf.mxu1  ;;  %6614 = vmatmul.mubr.bf16.gmra.mxu1 %v10480_v63  ;;  %6678 = vmatprep.subr.bf16.mxu0 %v10486_v7  ;;  %v10514_v7 = vld [vmem:[%s11541_s23 + $0x628] ss:$152 sps:$4 sm:$0xff]   ;;  %v10528_v13 = vld [vmem:[%s11541_s23 + $0x754] ss:$152 sps:$4 sm:$0xff]  }
 0x129   : > { %v5827_v25 = vadd.f32 %v5826_v21, %v12307_v48  ;;  %v12447_v26 = vadd.f32 %v5937_v22, %v5825_v17  ;;  %6790 = vmatpush1.bf16.msra.mxu1 %v10481_v11  ;;  %6623 = vmatprep.mubr.bf16.mxu1 %v10498_v12  ;;  %v10517_v21 = vld [vmem:[%s15033_s1 + $0x9d0] ss:$8 sps:$4 sm:$0xff]   ;;  %v10534_v22 = vld [vmem:[%s11541_s23 + $0x75c] ss:$152 sps:$4 sm:$0xff]  }
 0x12a   : > { %v5828_v29 = vpop.f32.mrf.mxu0  ;;  %v5939_v31 = vpop.f32.mrf.mxu1  ;;  %6791 = vmatprep.subr.bf16.mxu1 %v10489_v16  ;;  %v10522_v16 = vld [vmem:[%s15033_s1 + $0x8c4] ss:$8 sps:$4 sm:$0xff]  }
 0x12b   : > { %v5829_v35 = vadd.f32 %v5828_v29, %v12300_v45  ;;  %v12458_v36 = vadd.f32 %v5939_v31, %v5827_v25  ;;  %6679 = vmatpush1.bf16.msra.mxu0 %v10484_v15 }
 0x12c   : > { %v5830_v39 = vpop.f32.mrf.mxu0  ;;  %v5941_v41 = vpop.f32.mrf.mxu1  ;;  %6680 = vmatprep.subr.bf16.mxu0 %v10495_v23 }
 0x12d   : > { %v5831_v44 = vadd.f32 %v5830_v39, %v12307_v48  ;;  %v12465_v46 = vadd.f32 %v5941_v41, %v5829_v35  ;;  %6792 = vmatpush1.bf16.msra.mxu1 %v10487_v20 }
 0x12e   : > { %v5834_v50 = vpop.f32.mrf.mxu0  ;;  %v5943_v52 = vpop.f32.mrf.mxu1  ;;  %6511 = vmatmul.mubr.bf16.gmra.mxu0 %v10490_v27  ;;  %6793 = vmatprep.subr.bf16.mxu1 %v10501_v34  ;;  %v10520_v27 = vld [vmem:[%s15033_s1 + $0x8c0] ss:$8 sps:$4 sm:$0xff]  }
 0x12f   : > { %v5835_v55 = vadd.f32 %v5834_v50, %v12300_v45  ;;  %v12478_v56 = vadd.f32 %v5943_v52, %v5831_v44  ;;  %6681 = vmatpush2.bf16.msra.mxu0 %v10493_v28  ;;  %6520 = vmatprep.mubr.bf16.mxu0 %v10510_v37  ;;  %v10525_v28 = vld [vmem:[%s15033_s1 + $0x9c4] ss:$8 sps:$4 sm:$0xff]   ;;  %v10531_v37 = vld [vmem:[%s15033_s1 + $0x8b4] ss:$8 sps:$4 sm:$0xff]   ;;  %v10529_v44 = vld [vmem:[%s15033_s1 + $0x8b0] ss:$8 sps:$4 sm:$0xff]  }
 0x130   : > { %v5836_v59 = vpop.f32.mrf.mxu0  ;;  %v5947_v61 = vpop.f32.mrf.mxu1  ;;  %6624 = vmatmul.mubr.bf16.gmra.mxu1 %v10496_v32  ;;  %6682 = vmatprep.subr.bf16.mxu0 %v10504_v43  ;;  %v10523_v32 = vld [vmem:[%s15033_s1 + $0x9c0] ss:$8 sps:$4 sm:$0xff]   ;;  %v10532_v50 = vld [vmem:[%s11541_s23 + $0x758] ss:$152 sps:$4 sm:$0xff]   ;;  %v10537_v52 = vld [vmem:[%s15033_s1 + $0x9b4] ss:$8 sps:$4 sm:$0xff]  }
 0x131   : > { %v5837_v63 = vadd.f32 %v5836_v59, %v12307_v48  ;;  %v12487_v0 = vadd.f32 %v5947_v61, %v5835_v55  ;;  %6794 = vmatpush2.bf16.msra.mxu1 %v10499_v47  ;;  %6633 = vmatprep.mubr.bf16.mxu1 %v10516_v49  ;;  %v10526_v43 = vld [vmem:[%s11541_s23 + $0x750] ss:$152 sps:$4 sm:$0xff]   ;;  %v10546_v55 = vld [vmem:[%s11541_s23 + $0x884] ss:$152 sps:$4 sm:$0xff]  }
 0x132   : > { %v5838_v5 = vpop.f32.mrf.mxu0  ;;  %v5949_v6 = vpop.f32.mrf.mxu1  ;;  %6795 = vmatprep.subr.bf16.mxu1 %v10507_v54  ;;  %v10540_v61 = vld [vmem:[%s15033_s1 + $0x8a4] ss:$8 sps:$4 sm:$0xff]  }
 0x133   : > { %v5839_v11 = vadd.f32 %v5838_v5, %v12300_v45  ;;  %v12498_v12 = vadd.f32 %v5949_v6, %v5837_v63  ;;  %6683 = vmatpush2.bf16.msra.mxu0 %v10502_v53 }
 0x134   : > { %v5840_v14 = vpop.f32.mrf.mxu0  ;;  %v5951_v15 = vpop.f32.mrf.mxu1  ;;  %6684 = vmatprep.subr.bf16.mxu0 %v10513_v62 }
 0x135   : > { %v5841_v17 = vadd.f32 %v5840_v14, %v12307_v48  ;;  %v12505_v20 = vadd.f32 %v5951_v15, %v5839_v11  ;;  %6796 = vmatpush2.bf16.msra.mxu1 %v10505_v58  ;;  %v10541_v14 = vld [vmem:[%s15033_s1 + $0x9a0] ss:$8 sps:$4 sm:$0xff]  }
 0x136   : > { %v5844_v23 = vpop.f32.mrf.mxu0  ;;  %v5953_v25 = vpop.f32.mrf.mxu1  ;;  %6521 = vmatmul.mubr.bf16.gmra.mxu0 %v10508_v1  ;;  %6797 = vmatprep.subr.bf16.mxu1 %v10519_v8  ;;  %v10535_v1 = vld [vmem:[%s15033_s1 + $0x9b0] ss:$8 sps:$4 sm:$0xff]   ;;  %v10543_v8 = vld [vmem:[%s15033_s1 + $0x9a4] ss:$8 sps:$4 sm:$0xff]  }
 0x137   : > { %v5845_v29 = vadd.f32 %v5844_v23, %v12300_v45  ;;  %v12518_v31 = vadd.f32 %v5953_v25, %v5841_v17  ;;  %6685 = vmatpush2.bf16.msra.mxu0 %v10511_v3  ;;  %6530 = vmatprep.mubr.bf16.mxu0 %v10528_v13  ;;  %v10552_v3 = vld [vmem:[%s11541_s23 + $0x88c] ss:$152 sps:$4 sm:$0xff]   ;;  %v10549_v17 = vld [vmem:[%s15033_s1 + $0x894] ss:$8 sps:$4 sm:$0xff]   ;;  %v10544_v23 = vld [vmem:[%s11541_s23 + $0x880] ss:$152 sps:$4 sm:$0xff]  }
 0x138   : > { %v5846_v34 = vpop.f32.mrf.mxu0  ;;  %v5957_v35 = vpop.f32.mrf.mxu1  ;;  %6634 = vmatmul.mubr.bf16.gmra.mxu1 %v10514_v7  ;;  %6686 = vmatprep.subr.bf16.mxu0 %v10522_v16  ;;  %v10538_v7 = vld [vmem:[%s15033_s1 + $0x8a0] ss:$8 sps:$4 sm:$0xff]   ;;  %v10547_v25 = vld [vmem:[%s15033_s1 + $0x890] ss:$8 sps:$4 sm:$0xff]  }
 0x139   : > { %v5847_v39 = vadd.f32 %v5846_v34, %v12307_v48  ;;  %v12527_v41 = vadd.f32 %v5957_v35, %v5845_v29  ;;  %6798 = vmatpush2.bf16.msra.mxu1 %v10517_v21  ;;  %6643 = vmatprep.mubr.bf16.mxu1 %v10534_v22  ;;  %v10550_v29 = vld [vmem:[%s11541_s23 + $0x888] ss:$152 sps:$4 sm:$0xff]  }
 0x13a   : > { %v5848_v47 = vpop.f32.mrf.mxu0  ;;  %v5959_v49 = vpop.f32.mrf.mxu1  ;;  %6799 = vmatprep.subr.bf16.mxu1 %v10525_v28 }
 0x13b   : > { %v5849_v53 = vadd.f32 %v5848_v47, %v12300_v45  ;;  %v12538_v54 = vadd.f32 %v5959_v49, %v5847_v39  ;;  %6687 = vmatpush2.bf16.msra.mxu0 %v10520_v27 }
 0x13c   : > { %v5850_v58 = vpop.f32.mrf.mxu0  ;;  %v5961_v59 = vpop.f32.mrf.mxu1  ;;  %6688 = vmatprep.subr.bf16.mxu0 %v10531_v37  ;;  %v10564_v37 = vld [vmem:[%s11541_s23 + $0x44] ss:$152 sps:$4 sm:$0xff]  }
 0x13d   : > { %v5851_v62 = vadd.f32 %v5850_v58, %v12307_v48  ;;  %v12545_v63 = vadd.f32 %v5961_v59, %v5849_v53  ;;  %6800 = vmatpush2.bf16.msra.mxu1 %v10523_v32  ;;  %v10555_v32 = vld [vmem:[%s15033_s1 + $0x994] ss:$8 sps:$4 sm:$0xff]   ;;  %v10556_v58 = vld [vmem:[%s15033_s1 + $0x880] ss:$8 sps:$4 sm:$0xff]   ;;  %v10561_v59 = vld [vmem:[%s15033_s1 + $0x984] ss:$8 sps:$4 sm:$0xff]  }
 0x13e   : > { %v5854_v5 = vpop.f32.mrf.mxu0  ;;  %v5963_v6 = vpop.f32.mrf.mxu1  ;;  %6531 = vmatmul.mubr.bf16.gmra.mxu0 %v10526_v43  ;;  %6801 = vmatprep.subr.bf16.mxu1 %v10537_v52  ;;  %v10570_v52 = vld [vmem:[%s11541_s23 + $0x4c] ss:$152 sps:$4 sm:$0xff]  }
 0x13f   : > { %v5855_v11 = vadd.f32 %v5854_v5, %v12300_v45  ;;  %v12558_v13 = vadd.f32 %v5963_v6, %v5851_v62  ;;  %6689 = vmatpush2.bf16.msra.mxu0 %v10529_v44  ;;  %6540 = vmatprep.mubr.bf16.mxu0 %v10546_v55  ;;  %v10558_v44 = vld [vmem:[%s15033_s1 + $0x884] ss:$8 sps:$4 sm:$0xff]   ;;  %v10567_v6 = vld [vmem:[%s15033_s1 + $0xa74] ss:$8 sps:$4 sm:$0xff]  }
 0x140   : > { %v5856_v15 = vpop.f32.mrf.mxu0  ;;  %v5967_v16 = vpop.f32.mrf.mxu1  ;;  %6644 = vmatmul.mubr.bf16.gmra.mxu1 %v10532_v50  ;;  %6690 = vmatprep.subr.bf16.mxu0 %v10540_v61  ;;  %v10553_v50 = vld [vmem:[%s15033_s1 + $0x990] ss:$8 sps:$4 sm:$0xff]  }
 0x141   : > { %v5857_v21 = vadd.f32 %v5856_v15, %v12307_v48  ;;  %v12567_v22 = vadd.f32 %v5967_v16, %v5855_v11  ;;  %6802 = vmatpush2.bf16.msra.mxu1 %v10535_v1  ;;  %6653 = vmatprep.mubr.bf16.mxu1 %v10552_v3  ;;  %v10559_v1 = vld [vmem:[%s15033_s1 + $0x980] ss:$8 sps:$4 sm:$0xff]  }
 0x142   : > { %v5858_v27 = vpop.f32.mrf.mxu0  ;;  %v5969_v28 = vpop.f32.mrf.mxu1  ;;  %6803 = vmatprep.subr.bf16.mxu1 %v10543_v8  ;;  %v10562_v11 = vld [vmem:[%s11541_s23 + $0x40] ss:$152 sps:$4 sm:$0xff]  }
 0x143   : > { %v5859_v34 = vadd.f32 %v5858_v27, %v12300_v45  ;;  %v12578_v35 = vadd.f32 %v5969_v28, %v5857_v21  ;;  %6691 = vmatpush2.bf16.msra.mxu0 %v10538_v7  ;;  %v10573_v21 = vld [vmem:[%s15033_s1 + $0xb74] ss:$8 sps:$4 sm:$0xff]  }
 0x144   : > { %v5860_v39 = vpop.f32.mrf.mxu0  ;;  %v5971_v43 = vpop.f32.mrf.mxu1  ;;  %6692 = vmatprep.subr.bf16.mxu0 %v10549_v17  ;;  %v10568_v17 = vld [vmem:[%s11541_s23 + $0x48] ss:$152 sps:$4 sm:$0xff]   ;;  %v10582_v27 = vld [vmem:[%s11541_s23 + $0x174] ss:$152 sps:$4 sm:$0xff]  }
 0x145   : > { %v5861_v47 = vadd.f32 %v5860_v39, %v12307_v48  ;;  %v12585_v49 = vadd.f32 %v5971_v43, %v5859_v34  ;;  %6804 = vmatpush2.bf16.msra.mxu1 %v10541_v14  ;;  %v10565_v14 = vld [vmem:[%s15033_s1 + $0xa70] ss:$8 sps:$4 sm:$0xff]   ;;  %v10588_v39 = vld [vmem:[%s11541_s23 + $0x17c] ss:$152 sps:$4 sm:$0xff]  }
 0x146   : > { %v5864_v53 = vpop.f32.mrf.mxu0  ;;  %v5973_v55 = vpop.f32.mrf.mxu1  ;;  %6541 = vmatmul.mubr.bf16.gmra.mxu0 %v10544_v23  ;;  %6805 = vmatprep.subr.bf16.mxu1 %v10555_v32  ;;  %v10576_v32 = vld [vmem:[%s15033_s1 + $0xa64] ss:$8 sps:$4 sm:$0xff]  }
 0x147   : > { %v5865_v61 = vadd.f32 %v5864_v53, %v12300_v45  ;;  %v12598_v62 = vadd.f32 %v5973_v55, %v5861_v47  ;;  %6693 = vmatpush2.bf16.msra.mxu0 %v10547_v25  ;;  %6696 = vmatprep.mubr.bf16.mxu0 %v10564_v37  ;;  %v10574_v47 = vld [vmem:[%s15033_s1 + $0xa60] ss:$8 sps:$4 sm:$0xff]  }
 0x148   : > { %v5866_v3 = vpop.f32.mrf.mxu0  ;;  %v5977_v5 = vpop.f32.mrf.mxu1  ;;  %6654 = vmatmul.mubr.bf16.gmra.mxu1 %v10550_v29  ;;  %6694 = vmatprep.subr.bf16.mxu0 %v10558_v44  ;;  %v10577_v53 = vld [vmem:[%s15033_s1 + $0xb60] ss:$8 sps:$4 sm:$0xff]  }
 0x149   : > { %v5867_v7 = vadd.f32 %v5866_v3, %v12307_v48  ;;  %v12607_v8 = vadd.f32 %v5977_v5, %v5865_v61  ;;  %6806 = vmatpush2.bf16.msra.mxu1 %v10553_v50  ;;  %6809 = vmatprep.mubr.bf16.mxu1 %v10570_v52  ;;  %v10583_v3 = vld [vmem:[%s15033_s1 + $0xa50] ss:$8 sps:$4 sm:$0xff]  }
 0x14a   : > { %v5868_v15 = vpop.f32.mrf.mxu0  ;;  %v5979_v16 = vpop.f32.mrf.mxu1  ;;  %6807 = vmatprep.subr.bf16.mxu1 %v10561_v59  ;;  %v10585_v59 = vld [vmem:[%s15033_s1 + $0xa54] ss:$8 sps:$4 sm:$0xff]  }
 0x14b   : > { %v5869_v23 = vadd.f32 %v5868_v15, %v12300_v45  ;;  %v12618_v25 = vadd.f32 %v5979_v16, %v5867_v7  ;;  %6695 = vmatpush2.bf16.msra.mxu0 %v10556_v58  ;;  %v10571_v45 = vld [vmem:[%s15033_s1 + $0xb70] ss:$8 sps:$4 sm:$0xff]   ;;  %v10600_v15 = vld [vmem:[%s11541_s23 + $0x2a4] ss:$152 sps:$4 sm:$0xff]  }
 0x14c   : > { %v5870_v28 = vpop.f32.mrf.mxu0  ;;  %v5981_v29 = vpop.f32.mrf.mxu1  ;;  %6890 = vmatprep.subr.bf16.mxu0 %v10567_v6  ;;  %v10586_v7 = vld [vmem:[%s11541_s23 + $0x178] ss:$152 sps:$4 sm:$0xff]  }
 0x14d   : > { %v5871_v34 = vadd.f32 %v5870_v28, %v12307_v48  ;;  %v12625_v37 = vadd.f32 %v5981_v29, %v5869_v23  ;;  %6808 = vmatpush2.bf16.msra.mxu1 %v10559_v1  ;;  %v10579_v48 = vld [vmem:[%s15033_s1 + $0xb64] ss:$8 sps:$4 sm:$0xff]  }
 0x14e   : > { %v5983_v43 = vpop.f32.mrf.mxu1  ;;  %v6020_v44 = vpop.f32.mrf.mxu0  ;;  %6697 = vmatmul.mubr.bf16.vlgmr.msra.gmra.mxu0 %v10562_v11  ;;  %7003 = vmatprep.subr.bf16.mxu1 %v10573_v21  ;;  %v10591_v11 = vld [vmem:[%s15033_s1 + $0xb54] ss:$8 sps:$4 sm:$0xff]   ;;  %v10594_v21 = vld [vmem:[%s15033_s1 + $0xa44] ss:$8 sps:$4 sm:$0xff]  }
 0x14f   : > { %v12637_v50 = vadd.f32 %v5983_v43, %v5871_v34  ;;  %v6021_v52 = vadd.f32 %v6020_v44, %v12327_v60  ;;  %6891 = vmatpush1.bf16.msra.mxu0 %v10565_v14  ;;  %6706 = vmatprep.mubr.bf16.mxu0 %v10582_v27  ;;  %v10580_v60 = vld [vmem:[%s11541_s23 + $0x170] ss:$152 sps:$4 sm:$0xff]   ;;  %v10606_v28 = vld [vmem:[%s11541_s23 + $0x2ac] ss:$152 sps:$4 sm:$0xff]  }
 0x150   : > { %v6022_v55 = vpop.f32.mrf.mxu0  ;;  %v6133_v58 = vpop.f32.mrf.mxu1  ;;  %6810 = vmatmul.mubr.bf16.vlgmr.msra.gmra.mxu1 %v10568_v17  ;;  %6892 = vmatprep.subr.bf16.mxu0 %v10576_v32  ;;  %v10592_v34 = vld [vmem:[%s15033_s1 + $0xa40] ss:$8 sps:$4 sm:$0xff]  }
 0x151   : > { %v6023_v61 = vadd.f32 %v6022_v55, %v12338_v4  ;;  %v12647_v1 = vadd.f32 %v6133_v58, %v6021_v52  ;;  %7004 = vmatpush1.bf16.msra.mxu1 %v10571_v45  ;;  %6819 = vmatprep.mubr.bf16.mxu1 %v10588_v39  ;;  %v10595_v43 = vld [vmem:[%s15033_s1 + $0xb40] ss:$8 sps:$4 sm:$0xff]   ;;  %v10601_v55 = vld [vmem:[%s15033_s1 + $0xa30] ss:$8 sps:$4 sm:$0xff]  }
 0x152   : > { %v6024_v5 = vpop.f32.mrf.mxu0  ;;  %v6135_v6 = vpop.f32.mrf.mxu1  ;;  %7005 = vmatprep.subr.bf16.mxu1 %v10579_v48  ;;  %v10603_v48 = vld [vmem:[%s15033_s1 + $0xa34] ss:$8 sps:$4 sm:$0xff]  }
 0x153   : > { %v6025_v4 = vadd.f32 %v6024_v5, %v12345_v10  ;;  %v12658_v14 = vadd.f32 %v6135_v6, %v6023_v61  ;;  %6893 = vmatpush1.bf16.msra.mxu0 %v10574_v47  ;;  %v10589_v10 = vld [vmem:[%s15033_s1 + $0xb50] ss:$8 sps:$4 sm:$0xff]   ;;  %v10604_v61 = vld [vmem:[%s11541_s23 + $0x2a8] ss:$152 sps:$4 sm:$0xff]   ;;  %v10618_v5 = vld [vmem:[%s11541_s23 + $0x3d4] ss:$152 sps:$4 sm:$0xff]  }
 0x154   : > { %v6026_v16 = vpop.f32.mrf.mxu0  ;;  %v6137_v17 = vpop.f32.mrf.mxu1  ;;  %6894 = vmatprep.subr.bf16.mxu0 %v10585_v59 }
 0x155   : > { %v6027_v23 = vadd.f32 %v6026_v16, %v12358_v18  ;;  %v12665_v27 = vadd.f32 %v6137_v17, %v6025_v4  ;;  %7006 = vmatpush1.bf16.msra.mxu1 %v10577_v53  ;;  %v10597_v18 = vld [vmem:[%s15033_s1 + $0xb44] ss:$8 sps:$4 sm:$0xff]   ;;  %v10598_v53 = vld [vmem:[%s11541_s23 + $0x2a0] ss:$152 sps:$4 sm:$0xff]   ;;  %v10624_v16 = vld [vmem:[%s11541_s23 + $0x3dc] ss:$152 sps:$4 sm:$0xff]  }
 0x156   : > { %v6030_v29 = vpop.f32.mrf.mxu0  ;;  %v6139_v32 = vpop.f32.mrf.mxu1  ;;  %6707 = vmatmul.mubr.bf16.gmra.mxu0 %v10580_v60  ;;  %7007 = vmatprep.subr.bf16.mxu1 %v10591_v11  ;;  %v10609_v60 = vld [vmem:[%s15033_s1 + $0xb34] ss:$8 sps:$4 sm:$0xff]   ;;  %v10612_v11 = vld [vmem:[%s15033_s1 + $0xa24] ss:$8 sps:$4 sm:$0xff]  }
 0x157   : > { %v6031_v45 = vadd.f32 %v6030_v29, %v12367_v24  ;;  %v12678_v39 = vadd.f32 %v6139_v32, %v6027_v23  ;;  %6895 = vmatpush1.bf16.msra.mxu0 %v10583_v3  ;;  %6716 = vmatprep.mubr.bf16.mxu0 %v10600_v15  ;;  %v10610_v23 = vld [vmem:[%s15033_s1 + $0xa20] ss:$8 sps:$4 sm:$0xff]  }
 0x158   : > { %v6032_v44 = vpop.f32.mrf.mxu0  ;;  %v6143_v47 = vpop.f32.mrf.mxu1  ;;  %6820 = vmatmul.mubr.bf16.gmra.mxu1 %v10586_v7  ;;  %6896 = vmatprep.subr.bf16.mxu0 %v10594_v21  ;;  %v10613_v29 = vld [vmem:[%s15033_s1 + $0xb20] ss:$8 sps:$4 sm:$0xff]  }
 0x159   : > { %v6033_v24 = vadd.f32 %v6032_v44, %v12378_v33  ;;  %v12687_v52 = vadd.f32 %v6143_v47, %v6031_v45  ;;  %7008 = vmatpush1.bf16.msra.mxu1 %v10589_v10  ;;  %6829 = vmatprep.mubr.bf16.mxu1 %v10606_v28  ;;  %v10619_v44 = vld [vmem:[%s15033_s1 + $0xa10] ss:$8 sps:$4 sm:$0xff]  }
 0x15a   : > { %v6034_v58 = vpop.f32.mrf.mxu0  ;;  %v6145_v59 = vpop.f32.mrf.mxu1  ;;  %7009 = vmatprep.subr.bf16.mxu1 %v10597_v18  ;;  %v10621_v18 = vld [vmem:[%s15033_s1 + $0xa14] ss:$8 sps:$4 sm:$0xff]  }
 0x15b   : > { %v6035_v33 = vadd.f32 %v6034_v58, %v12385_v40  ;;  %v12698_v3 = vadd.f32 %v6145_v59, %v6033_v24  ;;  %6897 = vmatpush1.bf16.msra.mxu0 %v10592_v34  ;;  %v10607_v40 = vld [vmem:[%s15033_s1 + $0xb30] ss:$8 sps:$4 sm:$0xff]   ;;  %v10636_v58 = vld [vmem:[%s11541_s23 + $0x504] ss:$152 sps:$4 sm:$0xff]  }
 0x15c   : > { %v6036_v6 = vpop.f32.mrf.mxu0  ;;  %v6147_v7 = vpop.f32.mrf.mxu1  ;;  %6898 = vmatprep.subr.bf16.mxu0 %v10603_v48  ;;  %v10622_v24 = vld [vmem:[%s11541_s23 + $0x3d8] ss:$152 sps:$4 sm:$0xff]  }
 0x15d   : > { %v6037_v4 = vadd.f32 %v6036_v6, %v12398_v51  ;;  %v12705_v15 = vadd.f32 %v6147_v7, %v6035_v33  ;;  %7010 = vmatpush1.bf16.msra.mxu1 %v10595_v43  ;;  %v10615_v51 = vld [vmem:[%s15033_s1 + $0xb24] ss:$8 sps:$4 sm:$0xff]   ;;  %v10616_v43 = vld [vmem:[%s11541_s23 + $0x3d0] ss:$152 sps:$4 sm:$0xff]  }
 0x15e   : > { %v6040_v17 = vpop.f32.mrf.mxu0  ;;  %v6149_v21 = vpop.f32.mrf.mxu1  ;;  %6717 = vmatmul.mubr.bf16.gmra.mxu0 %v10598_v53  ;;  %7011 = vmatprep.subr.bf16.mxu1 %v10609_v60  ;;  %v10627_v53 = vld [vmem:[%s15033_s1 + $0xb14] ss:$8 sps:$4 sm:$0xff]   ;;  %v10630_v60 = vld [vmem:[%s15033_s1 + $0xa04] ss:$8 sps:$4 sm:$0xff]  }
 0x15f   : > { %v6041_v10 = vadd.f32 %v6040_v17, %v12407_v57  ;;  %v12718_v28 = vadd.f32 %v6149_v21, %v6037_v4  ;;  %6899 = vmatpush1.bf16.msra.mxu0 %v10601_v55  ;;  %6726 = vmatprep.mubr.bf16.mxu0 %v10618_v5  ;;  %v10642_v6 = vld [vmem:[%s11541_s23 + $0x50c] ss:$152 sps:$4 sm:$0xff]   ;;  %v10628_v4 = vld [vmem:[%s15033_s1 + $0xa00] ss:$8 sps:$4 sm:$0xff]  }
 0x160   : > { %v6042_v32 = vpop.f32.mrf.mxu0  ;;  %v6153_v34 = vpop.f32.mrf.mxu1  ;;  %6830 = vmatmul.mubr.bf16.gmra.mxu1 %v10604_v61  ;;  %6900 = vmatprep.subr.bf16.mxu0 %v10612_v11  ;;  %v10631_v17 = vld [vmem:[%s15033_s1 + $0xb00] ss:$8 sps:$4 sm:$0xff]  }
 0x161   : > { %v6043_v57 = vadd.f32 %v6042_v32, %v12418_v2  ;;  %v12727_v45 = vadd.f32 %v6153_v34, %v6041_v10  ;;  %7012 = vmatpush1.bf16.msra.mxu1 %v10607_v40  ;;  %6839 = vmatprep.mubr.bf16.mxu1 %v10624_v16  ;;  %v10637_v32 = vld [vmem:[%s15033_s1 + $0xaf0] ss:$8 sps:$4 sm:$0xff]  }
 0x162   : > { %v6044_v47 = vpop.f32.mrf.mxu0  ;;  %v6155_v48 = vpop.f32.mrf.mxu1  ;;  %7013 = vmatprep.subr.bf16.mxu1 %v10615_v51  ;;  %v10639_v51 = vld [vmem:[%s15033_s1 + $0xaf4] ss:$8 sps:$4 sm:$0xff]  }
 0x163   : > { %v6045_v2 = vadd.f32 %v6044_v47, %v12425_v9  ;;  %v12738_v55 = vadd.f32 %v6155_v48, %v6043_v57  ;;  %6901 = vmatpush1.bf16.msra.mxu0 %v10610_v23  ;;  %v10625_v9 = vld [vmem:[%s15033_s1 + $0xb10] ss:$8 sps:$4 sm:$0xff]   ;;  %v10640_v57 = vld [vmem:[%s11541_s23 + $0x508] ss:$152 sps:$4 sm:$0xff]   ;;  %v10654_v47 = vld [vmem:[%s11541_s23 + $0x634] ss:$152 sps:$4 sm:$0xff]  }
 0x164   : > { %v6046_v59 = vpop.f32.mrf.mxu0  ;;  %v6157_v61 = vpop.f32.mrf.mxu1  ;;  %6902 = vmatprep.subr.bf16.mxu0 %v10621_v18 }
 0x165   : > { %v6047_v33 = vadd.f32 %v6046_v59, %v12438_v19  ;;  %v12745_v5 = vadd.f32 %v6157_v61, %v6045_v2  ;;  %7014 = vmatpush1.bf16.msra.mxu1 %v10613_v29  ;;  %v10633_v19 = vld [vmem:[%s15033_s1 + $0xb04] ss:$8 sps:$4 sm:$0xff]   ;;  %v10634_v29 = vld [vmem:[%s11541_s23 + $0x500] ss:$152 sps:$4 sm:$0xff]   ;;  %v10660_v59 = vld [vmem:[%s11541_s23 + $0x63c] ss:$152 sps:$4 sm:$0xff]  }
 0x166   : > { %v6050_v7 = vpop.f32.mrf.mxu0  ;;  %v6159_v11 = vpop.f32.mrf.mxu1  ;;  %6727 = vmatmul.mubr.bf16.gmra.mxu0 %v10616_v43  ;;  %7015 = vmatprep.subr.bf16.mxu1 %v10627_v53  ;;  %v10645_v43 = vld [vmem:[%s15033_s1 + $0xbf4] ss:$8 sps:$4 sm:$0xff]   ;;  %v10648_v53 = vld [vmem:[%s15033_s1 + $0xae4] ss:$8 sps:$4 sm:$0xff]  }
 0x167   : > { %v6051_v40 = vadd.f32 %v6050_v7, %v12447_v26  ;;  %v12758_v16 = vadd.f32 %v6159_v11, %v6047_v33  ;;  %6903 = vmatpush1.bf16.msra.mxu0 %v10619_v44  ;;  %6736 = vmatprep.mubr.bf16.mxu0 %v10636_v58  ;;  %v10646_v33 = vld [vmem:[%s15033_s1 + $0xae0] ss:$8 sps:$4 sm:$0xff]  }
 0x168   : > { %v6052_v21 = vpop.f32.mrf.mxu0  ;;  %v6163_v23 = vpop.f32.mrf.mxu1  ;;  %6840 = vmatmul.mubr.bf16.gmra.mxu1 %v10622_v24  ;;  %6904 = vmatprep.subr.bf16.mxu0 %v10630_v60  ;;  %v10649_v7 = vld [vmem:[%s15033_s1 + $0xbe0] ss:$8 sps:$4 sm:$0xff]  }
 0x169   : > { %v6053_v26 = vadd.f32 %v6052_v21, %v12458_v36  ;;  %v12767_v10 = vadd.f32 %v6163_v23, %v6051_v40  ;;  %7016 = vmatpush1.bf16.msra.mxu1 %v10625_v9  ;;  %6849 = vmatprep.mubr.bf16.mxu1 %v10642_v6  ;;  %v10655_v21 = vld [vmem:[%s15033_s1 + $0xad0] ss:$8 sps:$4 sm:$0xff]  }
 0x16a   : > { %v6054_v34 = vpop.f32.mrf.mxu0  ;;  %v6165_v18 = vpop.f32.mrf.mxu1  ;;  %7017 = vmatprep.subr.bf16.mxu1 %v10633_v19  ;;  %v10657_v19 = vld [vmem:[%s15033_s1 + $0xad4] ss:$8 sps:$4 sm:$0xff]  }
 0x16b   : > { %v6055_v36 = vadd.f32 %v6054_v34, %v12465_v46  ;;  %v12778_v44 = vadd.f32 %v6165_v18, %v6053_v26  ;;  %6905 = vmatpush1.bf16.msra.mxu0 %v10628_v4  ;;  %v10643_v46 = vld [vmem:[%s15033_s1 + $0xbf0] ss:$8 sps:$4 sm:$0xff]   ;;  %v10672_v34 = vld [vmem:[%s11541_s23 + $0x764] ss:$152 sps:$4 sm:$0xff]  }
 0x16c   : > { %v6056_v48 = vpop.f32.mrf.mxu0  ;;  %v6167_v24 = vpop.f32.mrf.mxu1  ;;  %6906 = vmatprep.subr.bf16.mxu0 %v10639_v51  ;;  %v10658_v26 = vld [vmem:[%s11541_s23 + $0x638] ss:$152 sps:$4 sm:$0xff]  }
 0x16d   : > { %v6057_v2 = vadd.f32 %v6056_v48, %v12478_v56  ;;  %v12785_v58 = vadd.f32 %v6167_v24, %v6055_v36  ;;  %7018 = vmatpush1.bf16.msra.mxu1 %v10631_v17  ;;  %v10651_v56 = vld [vmem:[%s15033_s1 + $0xbe4] ss:$8 sps:$4 sm:$0xff]   ;;  %v10652_v17 = vld [vmem:[%s11541_s23 + $0x630] ss:$152 sps:$4 sm:$0xff]  }
 0x16e   : > { %v6060_v61 = vpop.f32.mrf.mxu0  ;;  %v6169_v60 = vpop.f32.mrf.mxu1  ;;  %6737 = vmatmul.mubr.bf16.gmra.mxu0 %v10634_v29  ;;  %7019 = vmatprep.subr.bf16.mxu1 %v10645_v43  ;;  %v10663_v29 = vld [vmem:[%s15033_s1 + $0xbd4] ss:$8 sps:$4 sm:$0xff]   ;;  %v10666_v43 = vld [vmem:[%s15033_s1 + $0xac4] ss:$8 sps:$4 sm:$0xff]  }
 0x16f   : > { %v6061_v9 = vadd.f32 %v6060_v61, %v12487_v0  ;;  %v12798_v6 = vadd.f32 %v6169_v60, %v6057_v2  ;;  %6907 = vmatpush2.bf16.msra.mxu0 %v10637_v32  ;;  %6746 = vmatprep.mubr.bf16.mxu0 %v10654_v47  ;;  %v10678_v48 = vld [vmem:[%s11541_s23 + $0x76c] ss:$152 sps:$4 sm:$0xff]   ;;  %v10664_v2 = vld [vmem:[%s15033_s1 + $0xac0] ss:$8 sps:$4 sm:$0xff]  }
 0x170   : > { %v6062_v11 = vpop.f32.mrf.mxu0  ;;  %v6173_v4 = vpop.f32.mrf.mxu1  ;;  %6850 = vmatmul.mubr.bf16.gmra.mxu1 %v10640_v57  ;;  %6908 = vmatprep.subr.bf16.mxu0 %v10648_v53  ;;  %v10667_v61 = vld [vmem:[%s15033_s1 + $0xbc0] ss:$8 sps:$4 sm:$0xff]  }
 0x171   : > { %v6063_v0 = vadd.f32 %v6062_v11, %v12498_v12  ;;  %v12807_v40 = vadd.f32 %v6173_v4, %v6061_v9  ;;  %7020 = vmatpush2.bf16.msra.mxu1 %v10643_v46  ;;  %6859 = vmatprep.mubr.bf16.mxu1 %v10660_v59  ;;  %v10673_v11 = vld [vmem:[%s15033_s1 + $0xab0] ss:$8 sps:$4 sm:$0xff]  }
 0x172   : > { %v6064_v23 = vpop.f32.mrf.mxu0  ;;  %v6175_v51 = vpop.f32.mrf.mxu1  ;;  %7021 = vmatprep.subr.bf16.mxu1 %v10651_v56  ;;  %v10675_v56 = vld [vmem:[%s15033_s1 + $0xab4] ss:$8 sps:$4 sm:$0xff]  }
 0x173   : > { %v6065_v12 = vadd.f32 %v6064_v23, %v12505_v20  ;;  %v12818_v32 = vadd.f32 %v6175_v51, %v6063_v0  ;;  %6909 = vmatpush2.bf16.msra.mxu0 %v10646_v33  ;;  %v10661_v20 = vld [vmem:[%s15033_s1 + $0xbd0] ss:$8 sps:$4 sm:$0xff]   ;;  %v10676_v0 = vld [vmem:[%s11541_s23 + $0x768] ss:$152 sps:$4 sm:$0xff]   ;;  %v10690_v23 = vld [vmem:[%s11541_s23 + $0x894] ss:$152 sps:$4 sm:$0xff]  }
 0x174   : > { %v6066_v18 = vpop.f32.mrf.mxu0  ;;  %v6177_v57 = vpop.f32.mrf.mxu1  ;;  %6910 = vmatprep.subr.bf16.mxu0 %v10657_v19 }
 0x175   : > { %v6067_v36 = vadd.f32 %v6066_v18, %v12518_v31  ;;  %v12825_v47 = vadd.f32 %v6177_v57, %v6065_v12  ;;  %7022 = vmatpush2.bf16.msra.mxu1 %v10649_v7  ;;  %v10669_v31 = vld [vmem:[%s15033_s1 + $0xbc4] ss:$8 sps:$4 sm:$0xff]   ;;  %v10670_v7 = vld [vmem:[%s11541_s23 + $0x760] ss:$152 sps:$4 sm:$0xff]   ;;  %v10696_v18 = vld [vmem:[%s11541_s23 + $0x89c] ss:$152 sps:$4 sm:$0xff]  }
 0x176   : > { %v6070_v24 = vpop.f32.mrf.mxu0  ;;  %v6179_v53 = vpop.f32.mrf.mxu1  ;;  %6747 = vmatmul.mubr.bf16.gmra.mxu0 %v10652_v17  ;;  %7023 = vmatprep.subr.bf16.mxu1 %v10663_v29  ;;  %v10681_v17 = vld [vmem:[%s15033_s1 + $0xbb4] ss:$8 sps:$4 sm:$0xff]   ;;  %v10684_v29 = vld [vmem:[%s15033_s1 + $0xaa4] ss:$8 sps:$4 sm:$0xff]  }
 0x177   : > { %v6071_v46 = vadd.f32 %v6070_v24, %v12527_v41  ;;  %v12838_v59 = vadd.f32 %v6179_v53, %v6067_v36  ;;  %6911 = vmatpush2.bf16.msra.mxu0 %v10655_v21  ;;  %6756 = vmatprep.mubr.bf16.mxu0 %v10672_v34  ;;  %v10682_v36 = vld [vmem:[%s15033_s1 + $0xaa0] ss:$8 sps:$4 sm:$0xff]  }
 0x178   : > { %v6072_v60 = vpop.f32.mrf.mxu0  ;;  %v6183_v33 = vpop.f32.mrf.mxu1  ;;  %6860 = vmatmul.mubr.bf16.gmra.mxu1 %v10658_v26  ;;  %6912 = vmatprep.subr.bf16.mxu0 %v10666_v43  ;;  %v10685_v24 = vld [vmem:[%s15033_s1 + $0xba0] ss:$8 sps:$4 sm:$0xff]  }
 0x179   : > { %v6073_v41 = vadd.f32 %v6072_v60, %v12538_v54  ;;  %v12847_v9 = vadd.f32 %v6183_v33, %v6071_v46  ;;  %7024 = vmatpush2.bf16.msra.mxu1 %v10661_v20  ;;  %6869 = vmatprep.mubr.bf16.mxu1 %v10678_v48  ;;  %v10691_v60 = vld [vmem:[%s15033_s1 + $0xa90] ss:$8 sps:$4 sm:$0xff]  }
 0x17a   : > { %v6074_v4 = vpop.f32.mrf.mxu0  ;;  %v6185_v19 = vpop.f32.mrf.mxu1  ;;  %7025 = vmatprep.subr.bf16.mxu1 %v10669_v31  ;;  %v10693_v31 = vld [vmem:[%s15033_s1 + $0xa94] ss:$8 sps:$4 sm:$0xff]  }
 0x17b   : > { %v6075_v54 = vadd.f32 %v6074_v4, %v12545_v63  ;;  %v12858_v21 = vadd.f32 %v6185_v19, %v6073_v41  ;;  %6913 = vmatpush2.bf16.msra.mxu0 %v10664_v2  ;;  %v10679_v63 = vld [vmem:[%s15033_s1 + $0xbb0] ss:$8 sps:$4 sm:$0xff]   ;;  %v10708_v4 = vld [vmem:[%s11541_s23 + $0x54] ss:$152 sps:$4 sm:$0xff]  }
 0x17c   : > { %v6076_v51 = vpop.f32.mrf.mxu0  ;;  %v6187_v26 = vpop.f32.mrf.mxu1  ;;  %6914 = vmatprep.subr.bf16.mxu0 %v10675_v56  ;;  %v10694_v41 = vld [vmem:[%s11541_s23 + $0x898] ss:$152 sps:$4 sm:$0xff]  }
 0x17d   : > { %v6077_v12 = vadd.f32 %v6076_v51, %v12558_v13  ;;  %v12865_v34 = vadd.f32 %v6187_v26, %v6075_v54  ;;  %7026 = vmatpush2.bf16.msra.mxu1 %v10667_v61  ;;  %v10687_v13 = vld [vmem:[%s15033_s1 + $0xba4] ss:$8 sps:$4 sm:$0xff]   ;;  %v10688_v61 = vld [vmem:[%s11541_s23 + $0x890] ss:$152 sps:$4 sm:$0xff]   ;;  %v10714_v51 = vld [vmem:[%s11541_s23 + $0x5c] ss:$152 sps:$4 sm:$0xff]  }
 0x17e   : > { %v6080_v57 = vpop.f32.mrf.mxu0  ;;  %v6189_v43 = vpop.f32.mrf.mxu1  ;;  %6757 = vmatmul.mubr.bf16.gmra.mxu0 %v10670_v7  ;;  %7027 = vmatprep.subr.bf16.mxu1 %v10681_v17  ;;  %v10699_v7 = vld [vmem:[%s15033_s1 + $0xb94] ss:$8 sps:$4 sm:$0xff]   ;;  %v10702_v17 = vld [vmem:[%s15033_s1 + $0xa84] ss:$8 sps:$4 sm:$0xff]  }
 0x17f   : > { %v6081_v20 = vadd.f32 %v6080_v57, %v12567_v22  ;;  %v12878_v48 = vadd.f32 %v6189_v43, %v6077_v12  ;;  %6915 = vmatpush2.bf16.msra.mxu0 %v10673_v11  ;;  %6766 = vmatprep.mubr.bf16.mxu0 %v10690_v23  ;;  %v10700_v12 = vld [vmem:[%s15033_s1 + $0xa80] ss:$8 sps:$4 sm:$0xff]  }
 0x180   : > { %v6082_v53 = vpop.f32.mrf.mxu0  ;;  %v6193_v2 = vpop.f32.mrf.mxu1  ;;  %6870 = vmatmul.mubr.bf16.gmra.mxu1 %v10676_v0  ;;  %6916 = vmatprep.subr.bf16.mxu0 %v10684_v29  ;;  %v10703_v57 = vld [vmem:[%s15033_s1 + $0xb80] ss:$8 sps:$4 sm:$0xff]  }
 0x181   : > { %v6083_v22 = vadd.f32 %v6082_v53, %v12578_v35  ;;  %v12887_v46 = vadd.f32 %v6193_v2, %v6081_v20  ;;  %7028 = vmatpush2.bf16.msra.mxu1 %v10679_v63  ;;  %6879 = vmatprep.mubr.bf16.mxu1 %v10696_v18  ;;  %v10709_v53 = vld [vmem:[%s15033_s1 + $0xc70] ss:$8 sps:$4 sm:$0xff]  }
 0x182   : > { %v6084_v33 = vpop.f32.mrf.mxu0  ;;  %v6195_v56 = vpop.f32.mrf.mxu1  ;;  %7029 = vmatprep.subr.bf16.mxu1 %v10687_v13  ;;  %v10711_v13 = vld [vmem:[%s15033_s1 + $0xc74] ss:$8 sps:$4 sm:$0xff]  }
 0x183   : > { %v6085_v35 = vadd.f32 %v6084_v33, %v12585_v49  ;;  %v12898_v11 = vadd.f32 %v6195_v56, %v6083_v22  ;;  %6917 = vmatpush2.bf16.msra.mxu0 %v10682_v36  ;;  %v10697_v49 = vld [vmem:[%s15033_s1 + $0xb90] ss:$8 sps:$4 sm:$0xff]   ;;  %v10726_v33 = vld [vmem:[%s11541_s23 + $0x184] ss:$152 sps:$4 sm:$0xff]  }
 0x184   : > { %v6086_v19 = vpop.f32.mrf.mxu0  ;;  %v6197_v0 = vpop.f32.mrf.mxu1  ;;  %6918 = vmatprep.subr.bf16.mxu0 %v10693_v31  ;;  %v10712_v22 = vld [vmem:[%s11541_s23 + $0x58] ss:$152 sps:$4 sm:$0xff]  }
 0x185   : > { %v6087_v54 = vadd.f32 %v6086_v19, %v12598_v62  ;;  %v12905_v23 = vadd.f32 %v6197_v0, %v6085_v35  ;;  %7030 = vmatpush2.bf16.msra.mxu1 %v10685_v24  ;;  %v10705_v62 = vld [vmem:[%s15033_s1 + $0xb84] ss:$8 sps:$4 sm:$0xff]   ;;  %v10706_v24 = vld [vmem:[%s11541_s23 + $0x50] ss:$152 sps:$4 sm:$0xff]  }
 0x186   : > { %v6090_v26 = vpop.f32.mrf.mxu0  ;;  %v6199_v29 = vpop.f32.mrf.mxu1  ;;  %6767 = vmatmul.mubr.bf16.gmra.mxu0 %v10688_v61  ;;  %7031 = vmatprep.subr.bf16.mxu1 %v10699_v7  ;;  %v10717_v61 = vld [vmem:[%s15033_s1 + $0xd74] ss:$8 sps:$4 sm:$0xff]   ;;  %v10720_v7 = vld [vmem:[%s15033_s1 + $0xc64] ss:$8 sps:$4 sm:$0xff]  }
 0x187   : > { %v6091_v63 = vadd.f32 %v6090_v26, %v12607_v8  ;;  %v12918_v18 = vadd.f32 %v6199_v29, %v6087_v54  ;;  %6919 = vmatpush2.bf16.msra.mxu0 %v10691_v60  ;;  %6922 = vmatprep.mubr.bf16.mxu0 %v10708_v4  ;;  %v10732_v19 = vld [vmem:[%s11541_s23 + $0x18c] ss:$152 sps:$4 sm:$0xff]   ;;  %v10718_v54 = vld [vmem:[%s15033_s1 + $0xc60] ss:$8 sps:$4 sm:$0xff]  }
 0x188   : > { %v6092_v43 = vpop.f32.mrf.mxu0  ;;  %v6203_v36 = vpop.f32.mrf.mxu1  ;;  %6880 = vmatmul.mubr.bf16.gmra.mxu1 %v10694_v41  ;;  %6920 = vmatprep.subr.bf16.mxu0 %v10702_v17  ;;  %v10721_v26 = vld [vmem:[%s15033_s1 + $0xd60] ss:$8 sps:$4 sm:$0xff]  }
 0x189   : > { %v6093_v8 = vadd.f32 %v6092_v43, %v12618_v25  ;;  %v12927_v20 = vadd.f32 %v6203_v36, %v6091_v63  ;;  %7032 = vmatpush2.bf16.msra.mxu1 %v10697_v49  ;;  %7035 = vmatprep.mubr.bf16.mxu1 %v10714_v51  ;;  %v10727_v43 = vld [vmem:[%s15033_s1 + $0xc50] ss:$8 sps:$4 sm:$0xff]  }
 0x18a   : > { %v6094_v2 = vpop.f32.mrf.mxu0  ;;  %v6205_v31 = vpop.f32.mrf.mxu1  ;;  %7033 = vmatprep.subr.bf16.mxu1 %v10705_v62  ;;  %v10729_v62 = vld [vmem:[%s15033_s1 + $0xc54] ss:$8 sps:$4 sm:$0xff]  }
 0x18b   : > { %v6095_v25 = vadd.f32 %v6094_v2, %v12625_v37  ;;  %v12938_v60 = vadd.f32 %v6205_v31, %v6093_v8  ;;  %6921 = vmatpush2.bf16.msra.mxu0 %v10700_v12  ;;  %v10715_v37 = vld [vmem:[%s15033_s1 + $0xd70] ss:$8 sps:$4 sm:$0xff]   ;;  %v10730_v8 = vld [vmem:[%s11541_s23 + $0x188] ss:$152 sps:$4 sm:$0xff]   ;;  %v10744_v2 = vld [vmem:[%s11541_s23 + $0x2b4] ss:$152 sps:$4 sm:$0xff]  }
 0x18c   : > { %v6096_v56 = vpop.f32.mrf.mxu0  ;;  %v6207_v41 = vpop.f32.mrf.mxu1  ;;  %7116 = vmatprep.subr.bf16.mxu0 %v10711_v13 }
 0x18d   : > { %v6097_v35 = vadd.f32 %v6096_v56, %v12637_v50  ;;  %v12945_v4 = vadd.f32 %v6207_v41, %v6095_v25  ;;  %7034 = vmatpush2.bf16.msra.mxu1 %v10703_v57  ;;  %v10723_v50 = vld [vmem:[%s15033_s1 + $0xd64] ss:$8 sps:$4 sm:$0xff]   ;;  %v10750_v56 = vld [vmem:[%s11541_s23 + $0x2bc] ss:$152 sps:$4 sm:$0xff]  }
 0x18e   : > { %v6209_v0 = vpop.f32.mrf.mxu1  ;;  %v6246_v17 = vpop.f32.mrf.mxu0  ;;  %6923 = vmatmul.mubr.bf16.vlgmr.msra.gmra.mxu0 %v10706_v24  ;;  %7229 = vmatprep.subr.bf16.mxu1 %v10717_v61  ;;  %v10735_v24 = vld [vmem:[%s15033_s1 + $0xd54] ss:$8 sps:$4 sm:$0xff]   ;;  %v10738_v61 = vld [vmem:[%s15033_s1 + $0xc44] ss:$8 sps:$4 sm:$0xff]  }
 0x18f   : > { %v12957_v49 = vadd.f32 %v6209_v0, %v6097_v35  ;;  %v6247_v51 = vadd.f32 %v6246_v17, %v12647_v1  ;;  %7117 = vmatpush1.bf16.msra.mxu0 %v10709_v53  ;;  %6932 = vmatprep.mubr.bf16.mxu0 %v10726_v33  ;;  %v10724_v1 = vld [vmem:[%s11541_s23 + $0x180] ss:$152 sps:$4 sm:$0xff]  }
 0x190   : > { %v6248_v29 = vpop.f32.mrf.mxu0  ;;  %v6359_v12 = vpop.f32.mrf.mxu1  ;;  %7036 = vmatmul.mubr.bf16.vlgmr.msra.gmra.mxu1 %v10712_v22  ;;  %7118 = vmatprep.subr.bf16.mxu0 %v10720_v7  ;;  %v10736_v35 = vld [vmem:[%s15033_s1 + $0xc40] ss:$8 sps:$4 sm:$0xff]  }
 0x191   : > { %v6249_v63 = vadd.f32 %v6248_v29, %v12658_v14  ;;  %v12967_v57 = vadd.f32 %v6359_v12, %v6247_v51  ;;  %7230 = vmatpush1.bf16.msra.mxu1 %v10715_v37  ;;  %7045 = vmatprep.mubr.bf16.mxu1 %v10732_v19  ;;  %v10739_v0 = vld [vmem:[%s15033_s1 + $0xd40] ss:$8 sps:$4 sm:$0xff]   ;;  %v10745_v29 = vld [vmem:[%s15033_s1 + $0xc30] ss:$8 sps:$4 sm:$0xff]  }
 0x192   : > { %v6250_v36 = vpop.f32.mrf.mxu0  ;;  %v6361_v13 = vpop.f32.mrf.mxu1  ;;  %7231 = vmatprep.subr.bf16.mxu1 %v10723_v50  ;;  %v10747_v50 = vld [vmem:[%s15033_s1 + $0xc34] ss:$8 sps:$4 sm:$0xff]  }
 0x193   : > { %v6251_v14 = vadd.f32 %v6250_v36, %v12665_v27  ;;  %v12978_v53 = vadd.f32 %v6361_v13, %v6249_v63  ;;  %7119 = vmatpush1.bf16.msra.mxu0 %v10718_v54  ;;  %v10733_v27 = vld [vmem:[%s15033_s1 + $0xd50] ss:$8 sps:$4 sm:$0xff]   ;;  %v10762_v36 = vld [vmem:[%s11541_s23 + $0x3e4] ss:$152 sps:$4 sm:$0xff]  }
 0x194   : > { %v6252_v31 = vpop.f32.mrf.mxu0  ;;  %v6363_v22 = vpop.f32.mrf.mxu1  ;;  %7120 = vmatprep.subr.bf16.mxu0 %v10729_v62  ;;  %v10748_v63 = vld [vmem:[%s11541_s23 + $0x2b8] ss:$152 sps:$4 sm:$0xff]  }
 0x195   : > { %v6253_v25 = vadd.f32 %v6252_v31, %v12678_v39  ;;  %v12985_v33 = vadd.f32 %v6363_v22, %v6251_v14  ;;  %7232 = vmatpush1.bf16.msra.mxu1 %v10721_v26  ;;  %v10741_v39 = vld [vmem:[%s15033_s1 + $0xd44] ss:$8 sps:$4 sm:$0xff]   ;;  %v10742_v26 = vld [vmem:[%s11541_s23 + $0x2b0] ss:$152 sps:$4 sm:$0xff]  }
 0x196   : > { %v6256_v41 = vpop.f32.mrf.mxu0  ;;  %v6365_v7 = vpop.f32.mrf.mxu1  ;;  %6933 = vmatmul.mubr.bf16.gmra.mxu0 %v10724_v1  ;;  %7233 = vmatprep.subr.bf16.mxu1 %v10735_v24  ;;  %v10753_v1 = vld [vmem:[%s15033_s1 + $0xd34] ss:$8 sps:$4 sm:$0xff]   ;;  %v10756_v24 = vld [vmem:[%s15033_s1 + $0xc24] ss:$8 sps:$4 sm:$0xff]  }
 0x197   : > { %v6257_v37 = vadd.f32 %v6256_v41, %v12687_v52  ;;  %v12998_v19 = vadd.f32 %v6365_v7, %v6253_v25  ;;  %7121 = vmatpush1.bf16.msra.mxu0 %v10727_v43  ;;  %6942 = vmatprep.mubr.bf16.mxu0 %v10744_v2  ;;  %v10768_v31 = vld [vmem:[%s11541_s23 + $0x3ec] ss:$152 sps:$4 sm:$0xff]   ;;  %v10754_v25 = vld [vmem:[%s15033_s1 + $0xc20] ss:$8 sps:$4 sm:$0xff]  }
 0x198   : > { %v6258_v17 = vpop.f32.mrf.mxu0  ;;  %v6369_v54 = vpop.f32.mrf.mxu1  ;;  %7046 = vmatmul.mubr.bf16.gmra.mxu1 %v10730_v8  ;;  %7122 = vmatprep.subr.bf16.mxu0 %v10738_v61  ;;  %v10757_v41 = vld [vmem:[%s15033_s1 + $0xd20] ss:$8 sps:$4 sm:$0xff]  }
 0x199   : > { %v6259_v52 = vadd.f32 %v6258_v17, %v12698_v3  ;;  %v13007_v51 = vadd.f32 %v6369_v54, %v6257_v37  ;;  %7234 = vmatpush1.bf16.msra.mxu1 %v10733_v27  ;;  %7055 = vmatprep.mubr.bf16.mxu1 %v10750_v56  ;;  %v10763_v17 = vld [vmem:[%s15033_s1 + $0xc10] ss:$8 sps:$4 sm:$0xff]  }
 0x19a   : > { %v6260_v12 = vpop.f32.mrf.mxu0  ;;  %v6371_v62 = vpop.f32.mrf.mxu1  ;;  %7235 = vmatprep.subr.bf16.mxu1 %v10741_v39  ;;  %v10765_v39 = vld [vmem:[%s15033_s1 + $0xc14] ss:$8 sps:$4 sm:$0xff]  }
 0x19b   : > { %v6261_v3 = vadd.f32 %v6260_v12, %v12705_v15  ;;  %v13018_v43 = vadd.f32 %v6371_v62, %v6259_v52  ;;  %7123 = vmatpush1.bf16.msra.mxu0 %v10736_v35  ;;  %v10751_v15 = vld [vmem:[%s15033_s1 + $0xd30] ss:$8 sps:$4 sm:$0xff]   ;;  %v10766_v52 = vld [vmem:[%s11541_s23 + $0x3e8] ss:$152 sps:$4 sm:$0xff]   ;;  %v10780_v12 = vld [vmem:[%s11541_s23 + $0x514] ss:$152 sps:$4 sm:$0xff]  }
 0x19c   : > { %v6262_v13 = vpop.f32.mrf.mxu0  ;;  %v6373_v8 = vpop.f32.mrf.mxu1  ;;  %7124 = vmatprep.subr.bf16.mxu0 %v10747_v50 }
 0x19d   : > { %v6263_v14 = vadd.f32 %v6262_v13, %v12718_v28  ;;  %v13025_v2 = vadd.f32 %v6373_v8, %v6261_v3  ;;  %7236 = vmatpush1.bf16.msra.mxu1 %v10739_v0  ;;  %v10759_v28 = vld [vmem:[%s15033_s1 + $0xd24] ss:$8 sps:$4 sm:$0xff]   ;;  %v10760_v0 = vld [vmem:[%s11541_s23 + $0x3e0] ss:$152 sps:$4 sm:$0xff]   ;;  %v10786_v13 = vld [vmem:[%s11541_s23 + $0x51c] ss:$152 sps:$4 sm:$0xff]  }
 0x19e   : > { %v6266_v22 = vpop.f32.mrf.mxu0  ;;  %v6375_v61 = vpop.f32.mrf.mxu1  ;;  %6943 = vmatmul.mubr.bf16.gmra.mxu0 %v10742_v26  ;;  %7237 = vmatprep.subr.bf16.mxu1 %v10753_v1  ;;  %v10771_v26 = vld [vmem:[%s15033_s1 + $0xd14] ss:$8 sps:$4 sm:$0xff]   ;;  %v10774_v1 = vld [vmem:[%s15033_s1 + $0xc04] ss:$8 sps:$4 sm:$0xff]  }
 0x19f   : > { %v6267_v27 = vadd.f32 %v6266_v22, %v12727_v45  ;;  %v13038_v56 = vadd.f32 %v6375_v61, %v6263_v14  ;;  %7125 = vmatpush1.bf16.msra.mxu0 %v10745_v29  ;;  %6952 = vmatprep.mubr.bf16.mxu0 %v10762_v36  ;;  %v10772_v14 = vld [vmem:[%s15033_s1 + $0xc00] ss:$8 sps:$4 sm:$0xff]  }
 0x1a0   : > { %v6268_v7 = vpop.f32.mrf.mxu0  ;;  %v6379_v35 = vpop.f32.mrf.mxu1  ;;  %7056 = vmatmul.mubr.bf16.gmra.mxu1 %v10748_v63  ;;  %7126 = vmatprep.subr.bf16.mxu0 %v10756_v24  ;;  %v10775_v22 = vld [vmem:[%s15033_s1 + $0xd00] ss:$8 sps:$4 sm:$0xff]  }
 0x1a1   : > { %v6269_v45 = vadd.f32 %v6268_v7, %v12738_v55  ;;  %v13047_v37 = vadd.f32 %v6379_v35, %v6267_v27  ;;  %7238 = vmatpush1.bf16.msra.mxu1 %v10751_v15  ;;  %7065 = vmatprep.mubr.bf16.mxu1 %v10768_v31  ;;  %v10781_v7 = vld [vmem:[%s15033_s1 + $0xcf0] ss:$8 sps:$4 sm:$0xff]  }
 0x1a2   : > { %v6270_v54 = vpop.f32.mrf.mxu0  ;;  %v6381_v50 = vpop.f32.mrf.mxu1  ;;  %7239 = vmatprep.subr.bf16.mxu1 %v10759_v28  ;;  %v10783_v28 = vld [vmem:[%s15033_s1 + $0xcf4] ss:$8 sps:$4 sm:$0xff]  }
 0x1a3   : > { %v6271_v55 = vadd.f32 %v6270_v54, %v12745_v5  ;;  %v13058_v29 = vadd.f32 %v6381_v50, %v6269_v45  ;;  %7127 = vmatpush1.bf16.msra.mxu0 %v10754_v25  ;;  %v10769_v5 = vld [vmem:[%s15033_s1 + $0xd10] ss:$8 sps:$4 sm:$0xff]   ;;  %v10798_v54 = vld [vmem:[%s11541_s23 + $0x644] ss:$152 sps:$4 sm:$0xff]  }
 0x1a4   : > { %v6272_v62 = vpop.f32.mrf.mxu0  ;;  %v6383_v63 = vpop.f32.mrf.mxu1  ;;  %7128 = vmatprep.subr.bf16.mxu0 %v10765_v39  ;;  %v10784_v45 = vld [vmem:[%s11541_s23 + $0x518] ss:$152 sps:$4 sm:$0xff]  }
 0x1a5   : > { %v6273_v3 = vadd.f32 %v6272_v62, %v12758_v16  ;;  %v13065_v36 = vadd.f32 %v6383_v63, %v6271_v55  ;;  %7240 = vmatpush1.bf16.msra.mxu1 %v10757_v41  ;;  %v10777_v16 = vld [vmem:[%s15033_s1 + $0xd04] ss:$8 sps:$4 sm:$0xff]   ;;  %v10778_v41 = vld [vmem:[%s11541_s23 + $0x510] ss:$152 sps:$4 sm:$0xff]  }
 0x1a6   : > { %v6276_v8 = vpop.f32.mrf.mxu0  ;;  %v6385_v24 = vpop.f32.mrf.mxu1  ;;  %6953 = vmatmul.mubr.bf16.gmra.mxu0 %v10760_v0  ;;  %7241 = vmatprep.subr.bf16.mxu1 %v10771_v26  ;;  %v10789_v0 = vld [vmem:[%s15033_s1 + $0xdf4] ss:$8 sps:$4 sm:$0xff]   ;;  %v10792_v26 = vld [vmem:[%s15033_s1 + $0xce4] ss:$8 sps:$4 sm:$0xff]  }
 0x1a7   : > { %v6277_v15 = vadd.f32 %v6276_v8, %v12767_v10  ;;  %v13078_v31 = vadd.f32 %v6385_v24, %v6273_v3  ;;  %7129 = vmatpush1.bf16.msra.mxu0 %v10763_v17  ;;  %6962 = vmatprep.mubr.bf16.mxu0 %v10780_v12  ;;  %v10804_v62 = vld [vmem:[%s11541_s23 + $0x64c] ss:$152 sps:$4 sm:$0xff]   ;;  %v10790_v3 = vld [vmem:[%s15033_s1 + $0xce0] ss:$8 sps:$4 sm:$0xff]  }
 0x1a8   : > { %v6278_v61 = vpop.f32.mrf.mxu0  ;;  %v6389_v25 = vpop.f32.mrf.mxu1  ;;  %7066 = vmatmul.mubr.bf16.gmra.mxu1 %v10766_v52  ;;  %7130 = vmatprep.subr.bf16.mxu0 %v10774_v1  ;;  %v10793_v8 = vld [vmem:[%s15033_s1 + $0xde0] ss:$8 sps:$4 sm:$0xff]  }
 0x1a9   : > { %v6279_v10 = vadd.f32 %v6278_v61, %v12778_v44  ;;  %v13087_v27 = vadd.f32 %v6389_v25, %v6277_v15  ;;  %7242 = vmatpush1.bf16.msra.mxu1 %v10769_v5  ;;  %7075 = vmatprep.mubr.bf16.mxu1 %v10786_v13  ;;  %v10799_v61 = vld [vmem:[%s15033_s1 + $0xcd0] ss:$8 sps:$4 sm:$0xff]  }
 0x1aa   : > { %v6280_v35 = vpop.f32.mrf.mxu0  ;;  %v6391_v39 = vpop.f32.mrf.mxu1  ;;  %7243 = vmatprep.subr.bf16.mxu1 %v10777_v16  ;;  %v10801_v16 = vld [vmem:[%s15033_s1 + $0xcd4] ss:$8 sps:$4 sm:$0xff]  }
 0x1ab   : > { %v6281_v44 = vadd.f32 %v6280_v35, %v12785_v58  ;;  %v13098_v17 = vadd.f32 %v6391_v39, %v6279_v10  ;;  %7131 = vmatpush1.bf16.msra.mxu0 %v10772_v14  ;;  %v10787_v58 = vld [vmem:[%s15033_s1 + $0xdf0] ss:$8 sps:$4 sm:$0xff]   ;;  %v10802_v10 = vld [vmem:[%s11541_s23 + $0x648] ss:$152 sps:$4 sm:$0xff]   ;;  %v10816_v35 = vld [vmem:[%s11541_s23 + $0x774] ss:$152 sps:$4 sm:$0xff]  }
 0x1ac   : > { %v6282_v50 = vpop.f32.mrf.mxu0  ;;  %v6393_v52 = vpop.f32.mrf.mxu1  ;;  %7132 = vmatprep.subr.bf16.mxu0 %v10783_v28 }
 0x1ad   : > { %v6283_v55 = vadd.f32 %v6282_v50, %v12798_v6  ;;  %v13105_v12 = vadd.f32 %v6393_v52, %v6281_v44  ;;  %7244 = vmatpush1.bf16.msra.mxu1 %v10775_v22  ;;  %v10795_v6 = vld [vmem:[%s15033_s1 + $0xde4] ss:$8 sps:$4 sm:$0xff]   ;;  %v10796_v22 = vld [vmem:[%s11541_s23 + $0x640] ss:$152 sps:$4 sm:$0xff]   ;;  %v10822_v50 = vld [vmem:[%s11541_s23 + $0x77c] ss:$152 sps:$4 sm:$0xff]  }
 0x1ae   : > { %v6286_v63 = vpop.f32.mrf.mxu0  ;;  %v6395_v1 = vpop.f32.mrf.mxu1  ;;  %6963 = vmatmul.mubr.bf16.gmra.mxu0 %v10778_v41  ;;  %7245 = vmatprep.subr.bf16.mxu1 %v10789_v0  ;;  %v10807_v41 = vld [vmem:[%s15033_s1 + $0xdd4] ss:$8 sps:$4 sm:$0xff]   ;;  %v10810_v0 = vld [vmem:[%s15033_s1 + $0xcc4] ss:$8 sps:$4 sm:$0xff]  }
 0x1af   : > { %v6287_v5 = vadd.f32 %v6286_v63, %v12807_v40  ;;  %v13118_v13 = vadd.f32 %v6395_v1, %v6283_v55  ;;  %7133 = vmatpush2.bf16.msra.mxu0 %v10781_v7  ;;  %6972 = vmatprep.mubr.bf16.mxu0 %v10798_v54  ;;  %v10808_v55 = vld [vmem:[%s15033_s1 + $0xcc0] ss:$8 sps:$4 sm:$0xff]  }
 0x1b0   : > { %v6288_v24 = vpop.f32.mrf.mxu0  ;;  %v6399_v14 = vpop.f32.mrf.mxu1  ;;  %7076 = vmatmul.mubr.bf16.gmra.mxu1 %v10784_v45  ;;  %7134 = vmatprep.subr.bf16.mxu0 %v10792_v26  ;;  %v10811_v63 = vld [vmem:[%s15033_s1 + $0xdc0] ss:$8 sps:$4 sm:$0xff]  }
 0x1b1   : > { %v6289_v40 = vadd.f32 %v6288_v24, %v12818_v32  ;;  %v13127_v15 = vadd.f32 %v6399_v14, %v6287_v5  ;;  %7246 = vmatpush2.bf16.msra.mxu1 %v10787_v58  ;;  %7085 = vmatprep.mubr.bf16.mxu1 %v10804_v62  ;;  %v10817_v24 = vld [vmem:[%s15033_s1 + $0xcb0] ss:$8 sps:$4 sm:$0xff]  }
 0x1b2   : > { %v6290_v25 = vpop.f32.mrf.mxu0  ;;  %v6401_v28 = vpop.f32.mrf.mxu1  ;;  %7247 = vmatprep.subr.bf16.mxu1 %v10795_v6  ;;  %v10819_v6 = vld [vmem:[%s15033_s1 + $0xcb4] ss:$8 sps:$4 sm:$0xff]  }
 0x1b3   : > { %v6291_v32 = vadd.f32 %v6290_v25, %v12825_v47  ;;  %v13138_v7 = vadd.f32 %v6401_v28, %v6289_v40  ;;  %7135 = vmatpush2.bf16.msra.mxu0 %v10790_v3  ;;  %v10805_v47 = vld [vmem:[%s15033_s1 + $0xdd0] ss:$8 sps:$4 sm:$0xff]   ;;  %v10834_v25 = vld [vmem:[%s11541_s23 + $0x8a4] ss:$152 sps:$4 sm:$0xff]  }
 0x1b4   : > { %v6292_v39 = vpop.f32.mrf.mxu0  ;;  %v6403_v45 = vpop.f32.mrf.mxu1  ;;  %7136 = vmatprep.subr.bf16.mxu0 %v10801_v16  ;;  %v10820_v40 = vld [vmem:[%s11541_s23 + $0x778] ss:$152 sps:$4 sm:$0xff]  }
 0x1b5   : > { %v6293_v44 = vadd.f32 %v6292_v39, %v12838_v59  ;;  %v13145_v54 = vadd.f32 %v6403_v45, %v6291_v32  ;;  %7248 = vmatpush2.bf16.msra.mxu1 %v10793_v8  ;;  %v10813_v59 = vld [vmem:[%s15033_s1 + $0xdc4] ss:$8 sps:$4 sm:$0xff]   ;;  %v10814_v8 = vld [vmem:[%s11541_s23 + $0x770] ss:$152 sps:$4 sm:$0xff]  }
 0x1b6   : > { %v6296_v52 = vpop.f32.mrf.mxu0  ;;  %v6405_v26 = vpop.f32.mrf.mxu1  ;;  %6973 = vmatmul.mubr.bf16.gmra.mxu0 %v10796_v22  ;;  %7249 = vmatprep.subr.bf16.mxu1 %v10807_v41  ;;  %v10825_v22 = vld [vmem:[%s15033_s1 + $0xdb4] ss:$8 sps:$4 sm:$0xff]   ;;  %v10828_v41 = vld [vmem:[%s15033_s1 + $0xca4] ss:$8 sps:$4 sm:$0xff]  }
 0x1b7   : > { %v6297_v58 = vadd.f32 %v6296_v52, %v12847_v9  ;;  %v13158_v62 = vadd.f32 %v6405_v26, %v6293_v44  ;;  %7137 = vmatpush2.bf16.msra.mxu0 %v10799_v61  ;;  %6982 = vmatprep.mubr.bf16.mxu0 %v10816_v35  ;;  %v10840_v39 = vld [vmem:[%s11541_s23 + $0x8ac] ss:$152 sps:$4 sm:$0xff]   ;;  %v10826_v44 = vld [vmem:[%s15033_s1 + $0xca0] ss:$8 sps:$4 sm:$0xff]  }
 0x1b8   : > { %v6298_v1 = vpop.f32.mrf.mxu0  ;;  %v6409_v3 = vpop.f32.mrf.mxu1  ;;  %7086 = vmatmul.mubr.bf16.gmra.mxu1 %v10802_v10  ;;  %7138 = vmatprep.subr.bf16.mxu0 %v10810_v0  ;;  %v10829_v52 = vld [vmem:[%s15033_s1 + $0xda0] ss:$8 sps:$4 sm:$0xff]  }
 0x1b9   : > { %v6299_v9 = vadd.f32 %v6298_v1, %v12858_v21  ;;  %v13167_v5 = vadd.f32 %v6409_v3, %v6297_v58  ;;  %7250 = vmatpush2.bf16.msra.mxu1 %v10805_v47  ;;  %7095 = vmatprep.mubr.bf16.mxu1 %v10822_v50  ;;  %v10835_v1 = vld [vmem:[%s15033_s1 + $0xc90] ss:$8 sps:$4 sm:$0xff]  }
 0x1ba   : > { %v6300_v14 = vpop.f32.mrf.mxu0  ;;  %v6411_v16 = vpop.f32.mrf.mxu1  ;;  %7251 = vmatprep.subr.bf16.mxu1 %v10813_v59  ;;  %v10837_v59 = vld [vmem:[%s15033_s1 + $0xc94] ss:$8 sps:$4 sm:$0xff]  }
 0x1bb   : > { %v6301_v21 = vadd.f32 %v6300_v14, %v12865_v34  ;;  %v13178_v61 = vadd.f32 %v6411_v16, %v6299_v9  ;;  %7139 = vmatpush2.bf16.msra.mxu0 %v10808_v55  ;;  %v10823_v34 = vld [vmem:[%s15033_s1 + $0xdb0] ss:$8 sps:$4 sm:$0xff]   ;;  %v10838_v9 = vld [vmem:[%s11541_s23 + $0x8a8] ss:$152 sps:$4 sm:$0xff]   ;;  %v10852_v14 = vld [vmem:[%s11541_s23 + $0x64] ss:$152 sps:$4 sm:$0xff]  }
 0x1bc   : > { %v6302_v28 = vpop.f32.mrf.mxu0  ;;  %v6413_v10 = vpop.f32.mrf.mxu1  ;;  %7140 = vmatprep.subr.bf16.mxu0 %v10819_v6 }
 0x1bd   : > { %v6303_v32 = vadd.f32 %v6302_v28, %v12878_v48  ;;  %v13185_v35 = vadd.f32 %v6413_v10, %v6301_v21  ;;  %7252 = vmatpush2.bf16.msra.mxu1 %v10811_v63  ;;  %v10831_v48 = vld [vmem:[%s15033_s1 + $0xda4] ss:$8 sps:$4 sm:$0xff]   ;;  %v10832_v63 = vld [vmem:[%s11541_s23 + $0x8a0] ss:$152 sps:$4 sm:$0xff]  }
 0x1be   : > { %v6306_v45 = vpop.f32.mrf.mxu0  ;;  %v6415_v0 = vpop.f32.mrf.mxu1  ;;  %6983 = vmatmul.mubr.bf16.gmra.mxu0 %v10814_v8  ;;  %7253 = vmatprep.subr.bf16.mxu1 %v10825_v22  ;;  %v10843_v8 = vld [vmem:[%s15033_s1 + $0xd94] ss:$8 sps:$4 sm:$0xff]   ;;  %v10846_v22 = vld [vmem:[%s15033_s1 + $0xc84] ss:$8 sps:$4 sm:$0xff]  }
 0x1bf   : > { %v6307_v47 = vadd.f32 %v6306_v45, %v12887_v46  ;;  %v13198_v50 = vadd.f32 %v6415_v0, %v6303_v32  ;;  %7141 = vmatpush2.bf16.msra.mxu0 %v10817_v24  ;;  %6992 = vmatprep.mubr.bf16.mxu0 %v10834_v25  ;;  %v10858_v28 = vld [vmem:[%s11541_s23 + $0x6c] ss:$152 sps:$4 sm:$0xff]   ;;  %v10844_v32 = vld [vmem:[%s15033_s1 + $0xc80] ss:$8 sps:$4 sm:$0xff]  }
 0x1c0   : > { %v6308_v26 = vpop.f32.mrf.mxu0  ;;  %v6419_v55 = vpop.f32.mrf.mxu1  ;;  %7096 = vmatmul.mubr.bf16.gmra.mxu1 %v10820_v40  ;;  %7142 = vmatprep.subr.bf16.mxu0 %v10828_v41  ;;  %v10847_v45 = vld [vmem:[%s15033_s1 + $0xd80] ss:$8 sps:$4 sm:$0xff]  }
 0x1c1   : > { %v6309_v46 = vadd.f32 %v6308_v26, %v12898_v11  ;;  %v13207_v58 = vadd.f32 %v6419_v55, %v6307_v47  ;;  %7254 = vmatpush2.bf16.msra.mxu1 %v10823_v34  ;;  %7105 = vmatprep.mubr.bf16.mxu1 %v10840_v39  ;;  %v10853_v26 = vld [vmem:[%s15033_s1 + $0xe70] ss:$8 sps:$4 sm:$0xff]  }
 0x1c2   : > { %v6310_v3 = vpop.f32.mrf.mxu0  ;;  %v6421_v6 = vpop.f32.mrf.mxu1  ;;  %7255 = vmatprep.subr.bf16.mxu1 %v10831_v48  ;;  %v10855_v48 = vld [vmem:[%s15033_s1 + $0xe74] ss:$8 sps:$4 sm:$0xff]  }
 0x1c3   : > { %v6311_v11 = vadd.f32 %v6310_v3, %v12905_v23  ;;  %v13218_v24 = vadd.f32 %v6421_v6, %v6309_v46  ;;  %7143 = vmatpush2.bf16.msra.mxu0 %v10826_v44  ;;  %v10841_v23 = vld [vmem:[%s15033_s1 + $0xd90] ss:$8 sps:$4 sm:$0xff]   ;;  %v10856_v46 = vld [vmem:[%s11541_s23 + $0x68] ss:$152 sps:$4 sm:$0xff]   ;;  %v10870_v3 = vld [vmem:[%s11541_s23 + $0x194] ss:$152 sps:$4 sm:$0xff]  }
 0x1c4   : > { %v6312_v16 = vpop.f32.mrf.mxu0  ;;  %v6423_v40 = vpop.f32.mrf.mxu1  ;;  %7144 = vmatprep.subr.bf16.mxu0 %v10837_v59 }
 0x1c5   : > { %v6313_v21 = vadd.f32 %v6312_v16, %v12918_v18  ;;  %v13225_v25 = vadd.f32 %v6423_v40, %v6311_v11  ;;  %7256 = vmatpush2.bf16.msra.mxu1 %v10829_v52  ;;  %v10849_v18 = vld [vmem:[%s15033_s1 + $0xd84] ss:$8 sps:$4 sm:$0xff]   ;;  %v10850_v52 = vld [vmem:[%s11541_s23 + $0x60] ss:$152 sps:$4 sm:$0xff]   ;;  %v10876_v16 = vld [vmem:[%s11541_s23 + $0x19c] ss:$152 sps:$4 sm:$0xff]  }
 0x1c6   : > { %v6316_v10 = vpop.f32.mrf.mxu0  ;;  %v6425_v41 = vpop.f32.mrf.mxu1  ;;  %6993 = vmatmul.mubr.bf16.gmra.mxu0 %v10832_v63  ;;  %7257 = vmatprep.subr.bf16.mxu1 %v10843_v8  ;;  %v10861_v63 = vld [vmem:[%s15033_s1 + $0xf74] ss:$8 sps:$4 sm:$0xff]   ;;  %v10864_v8 = vld [vmem:[%s15033_s1 + $0xe64] ss:$8 sps:$4 sm:$0xff]  }
 0x1c7   : > { %v6317_v34 = vadd.f32 %v6316_v10, %v12927_v20  ;;  %v13238_v39 = vadd.f32 %v6425_v41, %v6313_v21  ;;  %7145 = vmatpush2.bf16.msra.mxu0 %v10835_v1  ;;  %7148 = vmatprep.mubr.bf16.mxu0 %v10852_v14  ;;  %v10862_v21 = vld [vmem:[%s15033_s1 + $0xe60] ss:$8 sps:$4 sm:$0xff]  }
 0x1c8   : > { %v6318_v0 = vpop.f32.mrf.mxu0  ;;  %v6429_v44 = vpop.f32.mrf.mxu1  ;;  %7106 = vmatmul.mubr.bf16.gmra.mxu1 %v10838_v9  ;;  %7146 = vmatprep.subr.bf16.mxu0 %v10846_v22  ;;  %v10865_v10 = vld [vmem:[%s15033_s1 + $0xf60] ss:$8 sps:$4 sm:$0xff]  }
 0x1c9   : > { %v6319_v20 = vadd.f32 %v6318_v0, %v12938_v60  ;;  %v13247_v47 = vadd.f32 %v6429_v44, %v6317_v34  ;;  %7258 = vmatpush2.bf16.msra.mxu1 %v10841_v23  ;;  %7261 = vmatprep.mubr.bf16.mxu1 %v10858_v28  ;;  %v10871_v0 = vld [vmem:[%s15033_s1 + $0xe50] ss:$8 sps:$4 sm:$0xff]  }
 0x1ca   : > { %v6320_v55 = vpop.f32.mrf.mxu0  ;;  %v6431_v59 = vpop.f32.mrf.mxu1  ;;  %7259 = vmatprep.subr.bf16.mxu1 %v10849_v18  ;;  %v10873_v18 = vld [vmem:[%s15033_s1 + $0xe54] ss:$8 sps:$4 sm:$0xff]  }
 0x1cb   : > { %v6321_v60 = vadd.f32 %v6320_v55, %v12945_v4  ;;  %v13258_v1 = vadd.f32 %v6431_v59, %v6319_v20  ;;  %7147 = vmatpush2.bf16.msra.mxu0 %v10844_v32  ;;  %v10859_v4 = vld [vmem:[%s15033_s1 + $0xf70] ss:$8 sps:$4 sm:$0xff]   ;;  %v10888_v55 = vld [vmem:[%s11541_s23 + $0x2c4] ss:$152 sps:$4 sm:$0xff]  }
 0x1cc   : > { %v6322_v6 = vpop.f32.mrf.mxu0  ;;  %v6433_v9 = vpop.f32.mrf.mxu1  ;;  %7342 = vmatprep.subr.bf16.mxu0 %v10855_v48  ;;  %v10874_v20 = vld [vmem:[%s11541_s23 + $0x198] ss:$152 sps:$4 sm:$0xff]  }
 0x1cd   : > { %v6323_v11 = vadd.f32 %v6322_v6, %v12957_v49  ;;  %v13265_v14 = vadd.f32 %v6433_v9, %v6321_v60  ;;  %7260 = vmatpush2.bf16.msra.mxu1 %v10847_v45  ;;  %v10867_v49 = vld [vmem:[%s15033_s1 + $0xf64] ss:$8 sps:$4 sm:$0xff]  }
 0x1ce   : > { %v6435_v40 = vpop.f32.mrf.mxu1  ;;  %v6472_v22 = vpop.f32.mrf.mxu0  ;;  %7149 = vmatmul.mubr.bf16.vlgmr.msra.gmra.mxu0 %v10850_v52  ;;  %7455 = vmatprep.subr.bf16.mxu1 %v10861_v63  ;;  %v10879_v52 = vld [vmem:[%s15033_s1 + $0xf54] ss:$8 sps:$4 sm:$0xff]   ;;  %v10882_v63 = vld [vmem:[%s15033_s1 + $0xe44] ss:$8 sps:$4 sm:$0xff]  }
 0x1cf   : > { %v13277_v23 = vadd.f32 %v6435_v40, %v6323_v11  ;;  %v6473_v28 = vadd.f32 %v6472_v22, %v12967_v57  ;;  %7343 = vmatpush1.bf16.msra.mxu0 %v10853_v26  ;;  %7158 = vmatprep.mubr.bf16.mxu0 %v10870_v3  ;;  %v10868_v57 = vld [vmem:[%s11541_s23 + $0x190] ss:$152 sps:$4 sm:$0xff]   ;;  %v10894_v6 = vld [vmem:[%s11541_s23 + $0x2cc] ss:$152 sps:$4 sm:$0xff]  }
 0x1d0   : > { %v6474_v41 = vpop.f32.mrf.mxu0  ;;  %v6585_v32 = vpop.f32.mrf.mxu1  ;;  %7262 = vmatmul.mubr.bf16.vlgmr.msra.gmra.mxu1 %v10856_v46  ;;  %7344 = vmatprep.subr.bf16.mxu0 %v10864_v8  ;;  %v10880_v11 = vld [vmem:[%s15033_s1 + $0xe40] ss:$8 sps:$4 sm:$0xff]  }
 0x1d1   : > { %v6475_v34 = vadd.f32 %v6474_v41, %v12978_v53  ;;  %v13287_v45 = vadd.f32 %v6585_v32, %v6473_v28  ;;  %7456 = vmatpush1.bf16.msra.mxu1 %v10859_v4  ;;  %7271 = vmatprep.mubr.bf16.mxu1 %v10876_v16  ;;  %v10883_v40 = vld [vmem:[%s15033_s1 + $0xf40] ss:$8 sps:$4 sm:$0xff]   ;;  %v10889_v41 = vld [vmem:[%s15033_s1 + $0xe30] ss:$8 sps:$4 sm:$0xff]  }
 0x1d2   : > { %v6476_v44 = vpop.f32.mrf.mxu0  ;;  %v6587_v48 = vpop.f32.mrf.mxu1  ;;  %7457 = vmatprep.subr.bf16.mxu1 %v10867_v49  ;;  %v10891_v49 = vld [vmem:[%s15033_s1 + $0xe34] ss:$8 sps:$4 sm:$0xff]  }
 0x1d3   : > { %v6477_v53 = vadd.f32 %v6476_v44, %v12985_v33  ;;  %v13298_v26 = vadd.f32 %v6587_v48, %v6475_v34  ;;  %7345 = vmatpush1.bf16.msra.mxu0 %v10862_v21  ;;  %v10877_v33 = vld [vmem:[%s15033_s1 + $0xf50] ss:$8 sps:$4 sm:$0xff]   ;;  %v10892_v34 = vld [vmem:[%s11541_s23 + $0x2c8] ss:$152 sps:$4 sm:$0xff]   ;;  %v10906_v44 = vld [vmem:[%s11541_s23 + $0x3f4] ss:$152 sps:$4 sm:$0xff]  }
 0x1d4   : > { %v6478_v59 = vpop.f32.mrf.mxu0  ;;  %v6589_v46 = vpop.f32.mrf.mxu1  ;;  %7346 = vmatprep.subr.bf16.mxu0 %v10873_v18 }
 0x1d5   : > { %v6479_v60 = vadd.f32 %v6478_v59, %v12998_v19  ;;  %v13305_v3 = vadd.f32 %v6589_v46, %v6477_v53  ;;  %7458 = vmatpush1.bf16.msra.mxu1 %v10865_v10  ;;  %v10885_v19 = vld [vmem:[%s15033_s1 + $0xf44] ss:$8 sps:$4 sm:$0xff]   ;;  %v10886_v10 = vld [vmem:[%s11541_s23 + $0x2c0] ss:$152 sps:$4 sm:$0xff]   ;;  %v10912_v59 = vld [vmem:[%s11541_s23 + $0x3fc] ss:$152 sps:$4 sm:$0xff]  }
 0x1d6   : > { %v6482_v9 = vpop.f32.mrf.mxu0  ;;  %v6591_v8 = vpop.f32.mrf.mxu1  ;;  %7159 = vmatmul.mubr.bf16.gmra.mxu0 %v10868_v57  ;;  %7459 = vmatprep.subr.bf16.mxu1 %v10879_v52  ;;  %v10897_v57 = vld [vmem:[%s15033_s1 + $0xf34] ss:$8 sps:$4 sm:$0xff]   ;;  %v10900_v52 = vld [vmem:[%s15033_s1 + $0xe24] ss:$8 sps:$4 sm:$0xff]  }
 0x1d7   : > { %v6483_v4 = vadd.f32 %v6482_v9, %v13007_v51  ;;  %v13318_v16 = vadd.f32 %v6591_v8, %v6479_v60  ;;  %7347 = vmatpush1.bf16.msra.mxu0 %v10871_v0  ;;  %7168 = vmatprep.mubr.bf16.mxu0 %v10888_v55  ;;  %v10898_v60 = vld [vmem:[%s15033_s1 + $0xe20] ss:$8 sps:$4 sm:$0xff]  }
 0x1d8   : > { %v6484_v22 = vpop.f32.mrf.mxu0  ;;  %v6595_v21 = vpop.f32.mrf.mxu1  ;;  %7272 = vmatmul.mubr.bf16.gmra.mxu1 %v10874_v20  ;;  %7348 = vmatprep.subr.bf16.mxu0 %v10882_v63  ;;  %v10901_v9 = vld [vmem:[%s15033_s1 + $0xf20] ss:$8 sps:$4 sm:$0xff]  }
 0x1d9   : > { %v6485_v51 = vadd.f32 %v6484_v22, %v13018_v43  ;;  %v13327_v28 = vadd.f32 %v6595_v21, %v6483_v4  ;;  %7460 = vmatpush1.bf16.msra.mxu1 %v10877_v33  ;;  %7281 = vmatprep.mubr.bf16.mxu1 %v10894_v6  ;;  %v10907_v22 = vld [vmem:[%s15033_s1 + $0xe10] ss:$8 sps:$4 sm:$0xff]  }
 0x1da   : > { %v6486_v32 = vpop.f32.mrf.mxu0  ;;  %v6597_v18 = vpop.f32.mrf.mxu1  ;;  %7461 = vmatprep.subr.bf16.mxu1 %v10885_v19  ;;  %v10909_v19 = vld [vmem:[%s15033_s1 + $0xe14] ss:$8 sps:$4 sm:$0xff]  }
 0x1db   : > { %v6487_v43 = vadd.f32 %v6486_v32, %v13025_v2  ;;  %v13338_v0 = vadd.f32 %v6597_v18, %v6485_v51  ;;  %7349 = vmatpush1.bf16.msra.mxu0 %v10880_v11  ;;  %v10895_v2 = vld [vmem:[%s15033_s1 + $0xf30] ss:$8 sps:$4 sm:$0xff]   ;;  %v10924_v32 = vld [vmem:[%s11541_s23 + $0x524] ss:$152 sps:$4 sm:$0xff]  }
 0x1dc   : > { %v6488_v48 = vpop.f32.mrf.mxu0  ;;  %v6599_v20 = vpop.f32.mrf.mxu1  ;;  %7350 = vmatprep.subr.bf16.mxu0 %v10891_v49  ;;  %v10910_v51 = vld [vmem:[%s11541_s23 + $0x3f8] ss:$152 sps:$4 sm:$0xff]  }
 0x1dd   : > { %v6489_v53 = vadd.f32 %v6488_v48, %v13038_v56  ;;  %v13345_v55 = vadd.f32 %v6599_v20, %v6487_v43  ;;  %7462 = vmatpush1.bf16.msra.mxu1 %v10883_v40  ;;  %v10903_v56 = vld [vmem:[%s15033_s1 + $0xf24] ss:$8 sps:$4 sm:$0xff]   ;;  %v10904_v40 = vld [vmem:[%s11541_s23 + $0x3f0] ss:$152 sps:$4 sm:$0xff]  }
 0x1de   : > { %v6492_v46 = vpop.f32.mrf.mxu0  ;;  %v6601_v63 = vpop.f32.mrf.mxu1  ;;  %7169 = vmatmul.mubr.bf16.gmra.mxu0 %v10886_v10  ;;  %7463 = vmatprep.subr.bf16.mxu1 %v10897_v57  ;;  %v10915_v10 = vld [vmem:[%s15033_s1 + $0xf14] ss:$8 sps:$4 sm:$0xff]   ;;  %v10918_v57 = vld [vmem:[%s15033_s1 + $0xe04] ss:$8 sps:$4 sm:$0xff]  }
 0x1df   : > { %v6493_v33 = vadd.f32 %v6492_v46, %v13047_v37  ;;  %v13358_v6 = vadd.f32 %v6601_v63, %v6489_v53  ;;  %7351 = vmatpush1.bf16.msra.mxu0 %v10889_v41  ;;  %7178 = vmatprep.mubr.bf16.mxu0 %v10906_v44  ;;  %v10930_v48 = vld [vmem:[%s11541_s23 + $0x52c] ss:$152 sps:$4 sm:$0xff]   ;;  %v10916_v53 = vld [vmem:[%s15033_s1 + $0xe00] ss:$8 sps:$4 sm:$0xff]  }
 0x1e0   : > { %v6494_v8 = vpop.f32.mrf.mxu0  ;;  %v6605_v11 = vpop.f32.mrf.mxu1  ;;  %7282 = vmatmul.mubr.bf16.gmra.mxu1 %v10892_v34  ;;  %7352 = vmatprep.subr.bf16.mxu0 %v10900_v52  ;;  %v10919_v46 = vld [vmem:[%s15033_s1 + $0xf00] ss:$8 sps:$4 sm:$0xff]  }
 0x1e1   : > { %v6495_v37 = vadd.f32 %v6494_v8, %v13058_v29  ;;  %v13367_v4 = vadd.f32 %v6605_v11, %v6493_v33  ;;  %7464 = vmatpush1.bf16.msra.mxu1 %v10895_v2  ;;  %7291 = vmatprep.mubr.bf16.mxu1 %v10912_v59  ;;  %v10925_v8 = vld [vmem:[%s15033_s1 + $0xef0] ss:$8 sps:$4 sm:$0xff]  }
 0x1e2   : > { %v6496_v21 = vpop.f32.mrf.mxu0  ;;  %v6607_v49 = vpop.f32.mrf.mxu1  ;;  %7465 = vmatprep.subr.bf16.mxu1 %v10903_v56  ;;  %v10927_v56 = vld [vmem:[%s15033_s1 + $0xef4] ss:$8 sps:$4 sm:$0xff]  }
 0x1e3   : > { %v6497_v29 = vadd.f32 %v6496_v21, %v13065_v36  ;;  %v13378_v41 = vadd.f32 %v6607_v49, %v6495_v37  ;;  %7353 = vmatpush1.bf16.msra.mxu0 %v10898_v60  ;;  %v10913_v36 = vld [vmem:[%s15033_s1 + $0xf10] ss:$8 sps:$4 sm:$0xff]   ;;  %v10928_v37 = vld [vmem:[%s11541_s23 + $0x528] ss:$152 sps:$4 sm:$0xff]   ;;  %v10942_v21 = vld [vmem:[%s11541_s23 + $0x654] ss:$152 sps:$4 sm:$0xff]  }
 0x1e4   : > { %v6498_v18 = vpop.f32.mrf.mxu0  ;;  %v6609_v34 = vpop.f32.mrf.mxu1  ;;  %7354 = vmatprep.subr.bf16.mxu0 %v10909_v19 }
 0x1e5   : > { %v6499_v43 = vadd.f32 %v6498_v18, %v13078_v31  ;;  %v13385_v44 = vadd.f32 %v6609_v34, %v6497_v29  ;;  %7466 = vmatpush1.bf16.msra.mxu1 %v10901_v9  ;;  %v10921_v31 = vld [vmem:[%s15033_s1 + $0xf04] ss:$8 sps:$4 sm:$0xff]   ;;  %v10922_v9 = vld [vmem:[%s11541_s23 + $0x520] ss:$152 sps:$4 sm:$0xff]   ;;  %v10948_v18 = vld [vmem:[%s11541_s23 + $0x65c] ss:$152 sps:$4 sm:$0xff]  }
 0x1e6   : > { %v6502_v20 = vpop.f32.mrf.mxu0  ;;  %v6611_v52 = vpop.f32.mrf.mxu1  ;;  %7179 = vmatmul.mubr.bf16.gmra.mxu0 %v10904_v40  ;;  %7467 = vmatprep.subr.bf16.mxu1 %v10915_v10  ;;  %v10933_v40 = vld [vmem:[%s15033_s1 + $0xff4] ss:$8 sps:$4 sm:$0xff]   ;;  %v10936_v10 = vld [vmem:[%s15033_s1 + $0xee4] ss:$8 sps:$4 sm:$0xff]  }
 0x1e7   : > { %v6503_v2 = vadd.f32 %v6502_v20, %v13087_v27  ;;  %v13398_v59 = vadd.f32 %v6611_v52, %v6499_v43  ;;  %7355 = vmatpush1.bf16.msra.mxu0 %v10907_v22  ;;  %7188 = vmatprep.mubr.bf16.mxu0 %v10924_v32  ;;  %v10934_v43 = vld [vmem:[%s15033_s1 + $0xee0] ss:$8 sps:$4 sm:$0xff]  }
 0x1e8   : > { %v6504_v63 = vpop.f32.mrf.mxu0  ;;  %v6615_v60 = vpop.f32.mrf.mxu1  ;;  %7292 = vmatmul.mubr.bf16.gmra.mxu1 %v10910_v51  ;;  %7356 = vmatprep.subr.bf16.mxu0 %v10918_v57  ;;  %v10937_v20 = vld [vmem:[%s15033_s1 + $0xfe0] ss:$8 sps:$4 sm:$0xff]  }
 0x1e9   : > { %v6505_v27 = vadd.f32 %v6504_v63, %v13098_v17  ;;  %v13407_v33 = vadd.f32 %v6615_v60, %v6503_v2  ;;  %7468 = vmatpush1.bf16.msra.mxu1 %v10913_v36  ;;  %7301 = vmatprep.mubr.bf16.mxu1 %v10930_v48  ;;  %v10943_v63 = vld [vmem:[%s15033_s1 + $0xed0] ss:$8 sps:$4 sm:$0xff]  }
 0x1ea   : > { %v6506_v11 = vpop.f32.mrf.mxu0  ;;  %v6617_v19 = vpop.f32.mrf.mxu1  ;;  %7469 = vmatprep.subr.bf16.mxu1 %v10921_v31  ;;  %v10945_v31 = vld [vmem:[%s15033_s1 + $0xed4] ss:$8 sps:$4 sm:$0xff]  }
 0x1eb   : > { %v6507_v17 = vadd.f32 %v6506_v11, %v13105_v12  ;;  %v13418_v22 = vadd.f32 %v6617_v19, %v6505_v27  ;;  %7357 = vmatpush1.bf16.msra.mxu0 %v10916_v53  ;;  %v10931_v12 = vld [vmem:[%s15033_s1 + $0xff0] ss:$8 sps:$4 sm:$0xff]   ;;  %v10960_v11 = vld [vmem:[%s11541_s23 + $0x784] ss:$152 sps:$4 sm:$0xff]  }
 0x1ec   : > { %v6508_v49 = vpop.f32.mrf.mxu0  ;;  %v6619_v51 = vpop.f32.mrf.mxu1  ;;  %7358 = vmatprep.subr.bf16.mxu0 %v10927_v56  ;;  %v10946_v27 = vld [vmem:[%s11541_s23 + $0x658] ss:$152 sps:$4 sm:$0xff]  }
 0x1ed   : > { %v6509_v29 = vadd.f32 %v6508_v49, %v13118_v13  ;;  %v13425_v32 = vadd.f32 %v6619_v51, %v6507_v17  ;;  %7470 = vmatpush1.bf16.msra.mxu1 %v10919_v46  ;;  %v10939_v13 = vld [vmem:[%s15033_s1 + $0xfe4] ss:$8 sps:$4 sm:$0xff]   ;;  %v10940_v46 = vld [vmem:[%s11541_s23 + $0x650] ss:$152 sps:$4 sm:$0xff]  }
 0x1ee   : > { %v6512_v34 = vpop.f32.mrf.mxu0  ;;  %v6621_v57 = vpop.f32.mrf.mxu1  ;;  %7189 = vmatmul.mubr.bf16.gmra.mxu0 %v10922_v9  ;;  %7471 = vmatprep.subr.bf16.mxu1 %v10933_v40  ;;  %v10951_v9 = vld [vmem:[%s15033_s1 + $0xfd4] ss:$8 sps:$4 sm:$0xff]   ;;  %v10954_v40 = vld [vmem:[%s15033_s1 + $0xec4] ss:$8 sps:$4 sm:$0xff]  }
 0x1ef   : > { %v6513_v36 = vadd.f32 %v6512_v34, %v13127_v15  ;;  %v13438_v48 = vadd.f32 %v6621_v57, %v6509_v29  ;;  %7359 = vmatpush2.bf16.msra.mxu0 %v10925_v8  ;;  %7198 = vmatprep.mubr.bf16.mxu0 %v10942_v21  ;;  %v10966_v49 = vld [vmem:[%s11541_s23 + $0x78c] ss:$152 sps:$4 sm:$0xff]   ;;  %v10952_v29 = vld [vmem:[%s15033_s1 + $0xec0] ss:$8 sps:$4 sm:$0xff]  }
 0x1f0   : > { %v6514_v52 = vpop.f32.mrf.mxu0  ;;  %v6625_v53 = vpop.f32.mrf.mxu1  ;;  %7302 = vmatmul.mubr.bf16.gmra.mxu1 %v10928_v37  ;;  %7360 = vmatprep.subr.bf16.mxu0 %v10936_v10  ;;  %v10955_v34 = vld [vmem:[%s15033_s1 + $0xfc0] ss:$8 sps:$4 sm:$0xff]  }
 0x1f1   : > { %v6515_v15 = vadd.f32 %v6514_v52, %v13138_v7  ;;  %v13447_v2 = vadd.f32 %v6625_v53, %v6513_v36  ;;  %7472 = vmatpush2.bf16.msra.mxu1 %v10931_v12  ;;  %7311 = vmatprep.mubr.bf16.mxu1 %v10948_v18  ;;  %v10961_v52 = vld [vmem:[%s15033_s1 + $0xeb0] ss:$8 sps:$4 sm:$0xff]  }
 0x1f2   : > { %v6516_v60 = vpop.f32.mrf.mxu0  ;;  %v6627_v56 = vpop.f32.mrf.mxu1  ;;  %7473 = vmatprep.subr.bf16.mxu1 %v10939_v13  ;;  %v10963_v13 = vld [vmem:[%s15033_s1 + $0xeb4] ss:$8 sps:$4 sm:$0xff]  }
 0x1f3   : > { %v6517_v7 = vadd.f32 %v6516_v60, %v13145_v54  ;;  %v13458_v8 = vadd.f32 %v6627_v56, %v6515_v15  ;;  %7361 = vmatpush2.bf16.msra.mxu0 %v10934_v43  ;;  %v10949_v54 = vld [vmem:[%s15033_s1 + $0xfd0] ss:$8 sps:$4 sm:$0xff]   ;;  %v10964_v15 = vld [vmem:[%s11541_s23 + $0x788] ss:$152 sps:$4 sm:$0xff]   ;;  %v10978_v60 = vld [vmem:[%s11541_s23 + $0x8b4] ss:$152 sps:$4 sm:$0xff]  }
 0x1f4   : > { %v6518_v19 = vpop.f32.mrf.mxu0  ;;  %v6629_v37 = vpop.f32.mrf.mxu1  ;;  %7362 = vmatprep.subr.bf16.mxu0 %v10945_v31 }
 0x1f5   : > { %v6519_v17 = vadd.f32 %v6518_v19, %v13158_v62  ;;  %v13465_v21 = vadd.f32 %v6629_v37, %v6517_v7  ;;  %7474 = vmatpush2.bf16.msra.mxu1 %v10937_v20  ;;  %v10957_v62 = vld [vmem:[%s15033_s1 + $0xfc4] ss:$8 sps:$4 sm:$0xff]   ;;  %v10958_v20 = vld [vmem:[%s11541_s23 + $0x780] ss:$152 sps:$4 sm:$0xff]   ;;  %v10984_v19 = vld [vmem:[%s11541_s23 + $0x8bc] ss:$152 sps:$4 sm:$0xff]  }
 0x1f6   : > { %v6522_v51 = vpop.f32.mrf.mxu0  ;;  %v6631_v10 = vpop.f32.mrf.mxu1  ;;  %7199 = vmatmul.mubr.bf16.gmra.mxu0 %v10940_v46  ;;  %7475 = vmatprep.subr.bf16.mxu1 %v10951_v9  ;;  %v10969_v46 = vld [vmem:[%s15033_s1 + $0xfb4] ss:$8 sps:$4 sm:$0xff]   ;;  %v10972_v9 = vld [vmem:[%s15033_s1 + $0xea4] ss:$8 sps:$4 sm:$0xff]  }
 0x1f7   : > { %v6523_v12 = vadd.f32 %v6522_v51, %v13167_v5  ;;  %v13478_v18 = vadd.f32 %v6631_v10, %v6519_v17  ;;  %7363 = vmatpush2.bf16.msra.mxu0 %v10943_v63  ;;  %7208 = vmatprep.mubr.bf16.mxu0 %v10960_v11  ;;  %v10970_v17 = vld [vmem:[%s15033_s1 + $0xea0] ss:$8 sps:$4 sm:$0xff]  }
 0x1f8   : > { %v6524_v57 = vpop.f32.mrf.mxu0  ;;  %v6635_v43 = vpop.f32.mrf.mxu1  ;;  %7312 = vmatmul.mubr.bf16.gmra.mxu1 %v10946_v27  ;;  %7364 = vmatprep.subr.bf16.mxu0 %v10954_v40  ;;  %v10973_v51 = vld [vmem:[%s15033_s1 + $0xfa0] ss:$8 sps:$4 sm:$0xff]  }
 0x1f9   : > { %v6525_v5 = vadd.f32 %v6524_v57, %v13178_v61  ;;  %v13487_v36 = vadd.f32 %v6635_v43, %v6523_v12  ;;  %7476 = vmatpush2.bf16.msra.mxu1 %v10949_v54  ;;  %7321 = vmatprep.mubr.bf16.mxu1 %v10966_v49  ;;  %v10979_v57 = vld [vmem:[%s15033_s1 + $0xe90] ss:$8 sps:$4 sm:$0xff]  }
 0x1fa   : > { %v6526_v53 = vpop.f32.mrf.mxu0  ;;  %v6637_v31 = vpop.f32.mrf.mxu1  ;;  %7477 = vmatprep.subr.bf16.mxu1 %v10957_v62  ;;  %v10981_v62 = vld [vmem:[%s15033_s1 + $0xe94] ss:$8 sps:$4 sm:$0xff]  }
 0x1fb   : > { %v6527_v61 = vadd.f32 %v6526_v53, %v13185_v35  ;;  %v13498_v63 = vadd.f32 %v6637_v31, %v6525_v5  ;;  %7365 = vmatpush2.bf16.msra.mxu0 %v10952_v29  ;;  %v10967_v35 = vld [vmem:[%s15033_s1 + $0xfb0] ss:$8 sps:$4 sm:$0xff]   ;;  %v10996_v53 = vld [vmem:[%s11541_s23 + $0x74] ss:$152 sps:$4 sm:$0xff]  }
 0x1fc   : > { %v6528_v56 = vpop.f32.mrf.mxu0  ;;  %v6639_v27 = vpop.f32.mrf.mxu1  ;;  %7366 = vmatprep.subr.bf16.mxu0 %v10963_v13  ;;  %v10982_v5 = vld [vmem:[%s11541_s23 + $0x8b8] ss:$152 sps:$4 sm:$0xff]  }
 0x1fd   : > { %v6529_v7 = vadd.f32 %v6528_v56, %v13198_v50  ;;  %v13505_v11 = vadd.f32 %v6639_v27, %v6527_v61  ;;  %7478 = vmatpush2.bf16.msra.mxu1 %v10955_v34  ;;  %v10975_v50 = vld [vmem:[%s15033_s1 + $0xfa4] ss:$8 sps:$4 sm:$0xff]   ;;  %v10976_v34 = vld [vmem:[%s11541_s23 + $0x8b0] ss:$152 sps:$4 sm:$0xff]   ;;  %v11002_v56 = vld [vmem:[%s11541_s23 + $0x7c] ss:$152 sps:$4 sm:$0xff]  }
 0x1fe   : > { %v6532_v37 = vpop.f32.mrf.mxu0  ;;  %v6641_v40 = vpop.f32.mrf.mxu1  ;;  %7209 = vmatmul.mubr.bf16.gmra.mxu0 %v10958_v20  ;;  %7479 = vmatprep.subr.bf16.mxu1 %v10969_v46  ;;  %v10987_v20 = vld [vmem:[%s15033_s1 + $0xf94] ss:$8 sps:$4 sm:$0xff]   ;;  %v10990_v46 = vld [vmem:[%s15033_s1 + $0xe84] ss:$8 sps:$4 sm:$0xff]  }
 0x1ff   : > { %v6533_v54 = vadd.f32 %v6532_v37, %v13207_v58  ;;  %v13518_v49 = vadd.f32 %v6641_v40, %v6529_v7  ;;  %7367 = vmatpush2.bf16.msra.mxu0 %v10961_v52  ;;  %7218 = vmatprep.mubr.bf16.mxu0 %v10978_v60  ;;  %v10988_v7 = vld [vmem:[%s15033_s1 + $0xe80] ss:$8 sps:$4 sm:$0xff]  }
 0x200   : > { %v6534_v10 = vpop.f32.mrf.mxu0  ;;  %v6645_v29 = vpop.f32.mrf.mxu1  ;;  %7322 = vmatmul.mubr.bf16.gmra.mxu1 %v10964_v15  ;;  %7368 = vmatprep.subr.bf16.mxu0 %v10972_v9  ;;  %v10991_v37 = vld [vmem:[%s15033_s1 + $0xf80] ss:$8 sps:$4 sm:$0xff]  }
 0x201   : > { %v6535_v58 = vadd.f32 %v6534_v10, %v13218_v24  ;;  %v13527_v12 = vadd.f32 %v6645_v29, %v6533_v54  ;;  %7480 = vmatpush2.bf16.msra.mxu1 %v10967_v35  ;;  %7331 = vmatprep.mubr.bf16.mxu1 %v10984_v19  ;;  %v10997_v10 = vld [vmem:[%s15033_s1 + $0x1070] ss:$8 sps:$4 sm:$0xff]  }
 0x202   : > { %v6536_v43 = vpop.f32.mrf.mxu0  ;;  %v6647_v13 = vpop.f32.mrf.mxu1  ;;  %7481 = vmatprep.subr.bf16.mxu1 %v10975_v50  ;;  %v10999_v50 = vld [vmem:[%s15033_s1 + $0x1074] ss:$8 sps:$4 sm:$0xff]  }
 0x203   : > { %v6537_v24 = vadd.f32 %v6536_v43, %v13225_v25  ;;  %v13538_v52 = vadd.f32 %v6647_v13, %v6535_v58  ;;  %7369 = vmatpush2.bf16.msra.mxu0 %v10970_v17  ;;  %v10985_v25 = vld [vmem:[%s15033_s1 + $0xf90] ss:$8 sps:$4 sm:$0xff]   ;;  %v11014_v43 = vld [vmem:[%s11541_s23 + $0x1a4] ss:$152 sps:$4 sm:$0xff]  }
 0x204   : > { %v6538_v31 = vpop.f32.mrf.mxu0  ;;  %v6649_v15 = vpop.f32.mrf.mxu1  ;;  %7370 = vmatprep.subr.bf16.mxu0 %v10981_v62  ;;  %v11000_v58 = vld [vmem:[%s11541_s23 + $0x78] ss:$152 sps:$4 sm:$0xff]  }
 0x205   : > { %v6539_v61 = vadd.f32 %v6538_v31, %v13238_v39  ;;  %v13545_v60 = vadd.f32 %v6649_v15, %v6537_v24  ;;  %7482 = vmatpush2.bf16.msra.mxu1 %v10973_v51  ;;  %v10993_v39 = vld [vmem:[%s15033_s1 + $0xf84] ss:$8 sps:$4 sm:$0xff]   ;;  %v10994_v51 = vld [vmem:[%s11541_s23 + $0x70] ss:$152 sps:$4 sm:$0xff]  }
 0x206   : > { %v6542_v27 = vpop.f32.mrf.mxu0  ;;  %v6651_v9 = vpop.f32.mrf.mxu1  ;;  %7219 = vmatmul.mubr.bf16.gmra.mxu0 %v10976_v34  ;;  %7483 = vmatprep.subr.bf16.mxu1 %v10987_v20  ;;  %v11005_v34 = vld [vmem:[%s15033_s1 + $0x1174] ss:$8 sps:$4 sm:$0xff]   ;;  %v11008_v20 = vld [vmem:[%s15033_s1 + $0x1064] ss:$8 sps:$4 sm:$0xff]  }
 0x207   : > { %v6543_v35 = vadd.f32 %v6542_v27, %v13247_v47  ;;  %v13558_v19 = vadd.f32 %v6651_v9, %v6539_v61  ;;  %7371 = vmatpush2.bf16.msra.mxu0 %v10979_v57  ;;  %7374 = vmatprep.mubr.bf16.mxu0 %v10996_v53  ;;  %v11020_v31 = vld [vmem:[%s11541_s23 + $0x1ac] ss:$152 sps:$4 sm:$0xff]   ;;  %v11006_v61 = vld [vmem:[%s15033_s1 + $0x1060] ss:$8 sps:$4 sm:$0xff]  }
 0x208   : > { %v6544_v40 = vpop.f32.mrf.mxu0  ;;  %v6655_v17 = vpop.f32.mrf.mxu1  ;;  %7332 = vmatmul.mubr.bf16.gmra.mxu1 %v10982_v5  ;;  %7372 = vmatprep.subr.bf16.mxu0 %v10990_v46  ;;  %v11009_v27 = vld [vmem:[%s15033_s1 + $0x1160] ss:$8 sps:$4 sm:$0xff]  }
 0x209   : > { %v6545_v47 = vadd.f32 %v6544_v40, %v13258_v1  ;;  %v13567_v54 = vadd.f32 %v6655_v17, %v6543_v35  ;;  %7484 = vmatpush2.bf16.msra.mxu1 %v10985_v25  ;;  %7487 = vmatprep.mubr.bf16.mxu1 %v11002_v56  ;;  %v11015_v40 = vld [vmem:[%s15033_s1 + $0x1050] ss:$8 sps:$4 sm:$0xff]  }
 0x20a   : > { %v6546_v29 = vpop.f32.mrf.mxu0  ;;  %v6657_v62 = vpop.f32.mrf.mxu1  ;;  %7485 = vmatprep.subr.bf16.mxu1 %v10993_v39  ;;  %v11017_v39 = vld [vmem:[%s15033_s1 + $0x1054] ss:$8 sps:$4 sm:$0xff]  }
 0x20b   : > { %v6547_v1 = vadd.f32 %v6546_v29, %v13265_v14  ;;  %v13578_v57 = vadd.f32 %v6657_v62, %v6545_v47  ;;  %7373 = vmatpush2.bf16.msra.mxu0 %v10988_v7  ;;  %v11003_v14 = vld [vmem:[%s15033_s1 + $0x1170] ss:$8 sps:$4 sm:$0xff]   ;;  %v11018_v47 = vld [vmem:[%s11541_s23 + $0x1a8] ss:$152 sps:$4 sm:$0xff]   ;;  %v11032_v29 = vld [vmem:[%s11541_s23 + $0x2d4] ss:$152 sps:$4 sm:$0xff]  }
 0x20c   : > { %v6548_v13 = vpop.f32.mrf.mxu0  ;;  %v6659_v5 = vpop.f32.mrf.mxu1  ;;  %7568 = vmatprep.subr.bf16.mxu0 %v10999_v50 }
 0x20d   : > { %v6549_v24 = vadd.f32 %v6548_v13, %v13277_v23  ;;  %v13585_v53 = vadd.f32 %v6659_v5, %v6547_v1  ;;  %7486 = vmatpush2.bf16.msra.mxu1 %v10991_v37  ;;  %v11011_v23 = vld [vmem:[%s15033_s1 + $0x1164] ss:$8 sps:$4 sm:$0xff]   ;;  %v11038_v13 = vld [vmem:[%s11541_s23 + $0x2dc] ss:$152 sps:$4 sm:$0xff]  }
 0x20e   : > { %v6661_v15 = vpop.f32.mrf.mxu1  ;;  %v6698_v46 = vpop.f32.mrf.mxu0  ;;  %7375 = vmatmul.mubr.bf16.vlgmr.msra.gmra.mxu0 %v10994_v51  ;;  %7681 = vmatprep.subr.bf16.mxu1 %v11005_v34  ;;  %v11023_v51 = vld [vmem:[%s15033_s1 + $0x1154] ss:$8 sps:$4 sm:$0xff]   ;;  %v11026_v34 = vld [vmem:[%s15033_s1 + $0x1044] ss:$8 sps:$4 sm:$0xff]  }
 0x20f   : > { %v13597_v25 = vadd.f32 %v6661_v15, %v6549_v24  ;;  %v6699_v56 = vadd.f32 %v6698_v46, %v13287_v45  ;;  %7569 = vmatpush1.bf16.msra.mxu0 %v10997_v10  ;;  %7384 = vmatprep.mubr.bf16.mxu0 %v11014_v43  ;;  %v11012_v45 = vld [vmem:[%s11541_s23 + $0x1a0] ss:$152 sps:$4 sm:$0xff]  }
 0x210   : > { %v6700_v9 = vpop.f32.mrf.mxu0  ;;  %v6811_v7 = vpop.f32.mrf.mxu1  ;;  %7488 = vmatmul.mubr.bf16.vlgmr.msra.gmra.mxu1 %v11000_v58  ;;  %7570 = vmatprep.subr.bf16.mxu0 %v11008_v20  ;;  %v11024_v24 = vld [vmem:[%s15033_s1 + $0x1040] ss:$8 sps:$4 sm:$0xff]  }
 0x211   : > { %v6701_v35 = vadd.f32 %v6700_v9, %v13298_v26  ;;  %v13607_v37 = vadd.f32 %v6811_v7, %v6699_v56  ;;  %7682 = vmatpush1.bf16.msra.mxu1 %v11003_v14  ;;  %7497 = vmatprep.mubr.bf16.mxu1 %v11020_v31  ;;  %v11027_v15 = vld [vmem:[%s15033_s1 + $0x1140] ss:$8 sps:$4 sm:$0xff]   ;;  %v11033_v9 = vld [vmem:[%s15033_s1 + $0x1030] ss:$8 sps:$4 sm:$0xff]  }
 0x212   : > { %v6702_v17 = vpop.f32.mrf.mxu0  ;;  %v6813_v50 = vpop.f32.mrf.mxu1  ;;  %7683 = vmatprep.subr.bf16.mxu1 %v11011_v23  ;;  %v11035_v23 = vld [vmem:[%s15033_s1 + $0x1034] ss:$8 sps:$4 sm:$0xff]  }
 0x213   : > { %v6703_v26 = vadd.f32 %v6702_v17, %v13305_v3  ;;  %v13618_v10 = vadd.f32 %v6813_v50, %v6701_v35  ;;  %7571 = vmatpush1.bf16.msra.mxu0 %v11006_v61  ;;  %v11021_v3 = vld [vmem:[%s15033_s1 + $0x1150] ss:$8 sps:$4 sm:$0xff]   ;;  %v11050_v17 = vld [vmem:[%s11541_s23 + $0x404] ss:$152 sps:$4 sm:$0xff]  }
 0x214   : > { %v6704_v62 = vpop.f32.mrf.mxu0  ;;  %v6815_v58 = vpop.f32.mrf.mxu1  ;;  %7572 = vmatprep.subr.bf16.mxu0 %v11017_v39  ;;  %v11036_v35 = vld [vmem:[%s11541_s23 + $0x2d8] ss:$152 sps:$4 sm:$0xff]  }
 0x215   : > { %v6705_v1 = vadd.f32 %v6704_v62, %v13318_v16  ;;  %v13625_v43 = vadd.f32 %v6815_v58, %v6703_v26  ;;  %7684 = vmatpush1.bf16.msra.mxu1 %v11009_v27  ;;  %v11029_v16 = vld [vmem:[%s15033_s1 + $0x1144] ss:$8 sps:$4 sm:$0xff]   ;;  %v11030_v27 = vld [vmem:[%s11541_s23 + $0x2d0] ss:$152 sps:$4 sm:$0xff]  }
 0x216   : > { %v6708_v5 = vpop.f32.mrf.mxu0  ;;  %v6817_v20 = vpop.f32.mrf.mxu1  ;;  %7385 = vmatmul.mubr.bf16.gmra.mxu0 %v11012_v45  ;;  %7685 = vmatprep.subr.bf16.mxu1 %v11023_v51  ;;  %v11041_v45 = vld [vmem:[%s15033_s1 + $0x1134] ss:$8 sps:$4 sm:$0xff]   ;;  %v11044_v51 = vld [vmem:[%s15033_s1 + $0x1024] ss:$8 sps:$4 sm:$0xff]  }
 0x217   : > { %v6709_v14 = vadd.f32 %v6708_v5, %v13327_v28  ;;  %v13638_v31 = vadd.f32 %v6817_v20, %v6705_v1  ;;  %7573 = vmatpush1.bf16.msra.mxu0 %v11015_v40  ;;  %7394 = vmatprep.mubr.bf16.mxu0 %v11032_v29  ;;  %v11056_v62 = vld [vmem:[%s11541_s23 + $0x40c] ss:$152 sps:$4 sm:$0xff]   ;;  %v11042_v1 = vld [vmem:[%s15033_s1 + $0x1020] ss:$8 sps:$4 sm:$0xff]  }
 0x218   : > { %v6710_v46 = vpop.f32.mrf.mxu0  ;;  %v6821_v61 = vpop.f32.mrf.mxu1  ;;  %7498 = vmatmul.mubr.bf16.gmra.mxu1 %v11018_v47  ;;  %7574 = vmatprep.subr.bf16.mxu0 %v11026_v34  ;;  %v11045_v5 = vld [vmem:[%s15033_s1 + $0x1120] ss:$8 sps:$4 sm:$0xff]  }
 0x219   : > { %v6711_v28 = vadd.f32 %v6710_v46, %v13338_v0  ;;  %v13647_v56 = vadd.f32 %v6821_v61, %v6709_v14  ;;  %7686 = vmatpush1.bf16.msra.mxu1 %v11021_v3  ;;  %7507 = vmatprep.mubr.bf16.mxu1 %v11038_v13  ;;  %v11051_v46 = vld [vmem:[%s15033_s1 + $0x1010] ss:$8 sps:$4 sm:$0xff]  }
 0x21a   : > { %v6712_v7 = vpop.f32.mrf.mxu0  ;;  %v6823_v39 = vpop.f32.mrf.mxu1  ;;  %7687 = vmatprep.subr.bf16.mxu1 %v11029_v16  ;;  %v11053_v16 = vld [vmem:[%s15033_s1 + $0x1014] ss:$8 sps:$4 sm:$0xff]  }
 0x21b   : > { %v6713_v0 = vadd.f32 %v6712_v7, %v13345_v55  ;;  %v13658_v40 = vadd.f32 %v6823_v39, %v6711_v28  ;;  %7575 = vmatpush1.bf16.msra.mxu0 %v11024_v24  ;;  %v11039_v55 = vld [vmem:[%s15033_s1 + $0x1130] ss:$8 sps:$4 sm:$0xff]   ;;  %v11054_v28 = vld [vmem:[%s11541_s23 + $0x408] ss:$152 sps:$4 sm:$0xff]   ;;  %v11068_v7 = vld [vmem:[%s11541_s23 + $0x534] ss:$152 sps:$4 sm:$0xff]  }
 0x21c   : > { %v6714_v50 = vpop.f32.mrf.mxu0  ;;  %v6825_v47 = vpop.f32.mrf.mxu1  ;;  %7576 = vmatprep.subr.bf16.mxu0 %v11035_v23 }
 0x21d   : > { %v6715_v26 = vadd.f32 %v6714_v50, %v13358_v6  ;;  %v13665_v29 = vadd.f32 %v6825_v47, %v6713_v0  ;;  %7688 = vmatpush1.bf16.msra.mxu1 %v11027_v15  ;;  %v11047_v6 = vld [vmem:[%s15033_s1 + $0x1124] ss:$8 sps:$4 sm:$0xff]   ;;  %v11048_v15 = vld [vmem:[%s11541_s23 + $0x400] ss:$152 sps:$4 sm:$0xff]   ;;  %v11074_v50 = vld [vmem:[%s11541_s23 + $0x53c] ss:$152 sps:$4 sm:$0xff]  }
 0x21e   : > { %v6718_v58 = vpop.f32.mrf.mxu0  ;;  %v6827_v34 = vpop.f32.mrf.mxu1  ;;  %7395 = vmatmul.mubr.bf16.gmra.mxu0 %v11030_v27  ;;  %7689 = vmatprep.subr.bf16.mxu1 %v11041_v45  ;;  %v11059_v27 = vld [vmem:[%s15033_s1 + $0x1114] ss:$8 sps:$4 sm:$0xff]   ;;  %v11062_v45 = vld [vmem:[%s15033_s1 + $0x1004] ss:$8 sps:$4 sm:$0xff]  }
 0x21f   : > { %v6719_v3 = vadd.f32 %v6718_v58, %v13367_v4  ;;  %v13678_v13 = vadd.f32 %v6827_v34, %v6715_v26  ;;  %7577 = vmatpush1.bf16.msra.mxu0 %v11033_v9  ;;  %7404 = vmatprep.mubr.bf16.mxu0 %v11050_v17  ;;  %v11060_v26 = vld [vmem:[%s15033_s1 + $0x1000] ss:$8 sps:$4 sm:$0xff]  }
 0x220   : > { %v6720_v20 = vpop.f32.mrf.mxu0  ;;  %v6831_v24 = vpop.f32.mrf.mxu1  ;;  %7508 = vmatmul.mubr.bf16.gmra.mxu1 %v11036_v35  ;;  %7578 = vmatprep.subr.bf16.mxu0 %v11044_v51  ;;  %v11063_v58 = vld [vmem:[%s15033_s1 + $0x1100] ss:$8 sps:$4 sm:$0xff]  }
 0x221   : > { %v6721_v4 = vadd.f32 %v6720_v20, %v13378_v41  ;;  %v13687_v14 = vadd.f32 %v6831_v24, %v6719_v3  ;;  %7690 = vmatpush1.bf16.msra.mxu1 %v11039_v55  ;;  %7517 = vmatprep.mubr.bf16.mxu1 %v11056_v62  ;;  %v11069_v20 = vld [vmem:[%s15033_s1 + $0x10f0] ss:$8 sps:$4 sm:$0xff]  }
 0x222   : > { %v6722_v61 = vpop.f32.mrf.mxu0  ;;  %v6833_v23 = vpop.f32.mrf.mxu1  ;;  %7691 = vmatprep.subr.bf16.mxu1 %v11047_v6  ;;  %v11071_v6 = vld [vmem:[%s15033_s1 + $0x10f4] ss:$8 sps:$4 sm:$0xff]  }
 0x223   : > { %v6723_v41 = vadd.f32 %v6722_v61, %v13385_v44  ;;  %v13698_v9 = vadd.f32 %v6833_v23, %v6721_v4  ;;  %7579 = vmatpush1.bf16.msra.mxu0 %v11042_v1  ;;  %v11057_v44 = vld [vmem:[%s15033_s1 + $0x1110] ss:$8 sps:$4 sm:$0xff]   ;;  %v11086_v61 = vld [vmem:[%s11541_s23 + $0x664] ss:$152 sps:$4 sm:$0xff]  }
 0x224   : > { %v6724_v39 = vpop.f32.mrf.mxu0  ;;  %v6835_v35 = vpop.f32.mrf.mxu1  ;;  %7580 = vmatprep.subr.bf16.mxu0 %v11053_v16  ;;  %v11072_v4 = vld [vmem:[%s11541_s23 + $0x538] ss:$152 sps:$4 sm:$0xff]  }
 0x225   : > { %v6725_v0 = vadd.f32 %v6724_v39, %v13398_v59  ;;  %v13705_v17 = vadd.f32 %v6835_v35, %v6723_v41  ;;  %7692 = vmatpush1.bf16.msra.mxu1 %v11045_v5  ;;  %v11065_v59 = vld [vmem:[%s15033_s1 + $0x1104] ss:$8 sps:$4 sm:$0xff]   ;;  %v11066_v5 = vld [vmem:[%s11541_s23 + $0x530] ss:$152 sps:$4 sm:$0xff]  }
 0x226   : > { %v6728_v47 = vpop.f32.mrf.mxu0  ;;  %v6837_v51 = vpop.f32.mrf.mxu1  ;;  %7405 = vmatmul.mubr.bf16.gmra.mxu0 %v11048_v15  ;;  %7693 = vmatprep.subr.bf16.mxu1 %v11059_v27  ;;  %v11077_v15 = vld [vmem:[%s15033_s1 + $0x11f4] ss:$8 sps:$4 sm:$0xff]   ;;  %v11080_v27 = vld [vmem:[%s15033_s1 + $0x10e4] ss:$8 sps:$4 sm:$0xff]  }
 0x227   : > { %v6729_v55 = vadd.f32 %v6728_v47, %v13407_v33  ;;  %v13718_v62 = vadd.f32 %v6837_v51, %v6725_v0  ;;  %7581 = vmatpush1.bf16.msra.mxu0 %v11051_v46  ;;  %7414 = vmatprep.mubr.bf16.mxu0 %v11068_v7  ;;  %v11092_v39 = vld [vmem:[%s11541_s23 + $0x66c] ss:$152 sps:$4 sm:$0xff]   ;;  %v11078_v0 = vld [vmem:[%s15033_s1 + $0x10e0] ss:$8 sps:$4 sm:$0xff]  }
 0x228   : > { %v6730_v34 = vpop.f32.mrf.mxu0  ;;  %v6841_v1 = vpop.f32.mrf.mxu1  ;;  %7518 = vmatmul.mubr.bf16.gmra.mxu1 %v11054_v28  ;;  %7582 = vmatprep.subr.bf16.mxu0 %v11062_v45  ;;  %v11081_v47 = vld [vmem:[%s15033_s1 + $0x11e0] ss:$8 sps:$4 sm:$0xff]  }
 0x229   : > { %v6731_v33 = vadd.f32 %v6730_v34, %v13418_v22  ;;  %v13727_v3 = vadd.f32 %v6841_v1, %v6729_v55  ;;  %7694 = vmatpush1.bf16.msra.mxu1 %v11057_v44  ;;  %7527 = vmatprep.mubr.bf16.mxu1 %v11074_v50  ;;  %v11087_v34 = vld [vmem:[%s15033_s1 + $0x10d0] ss:$8 sps:$4 sm:$0xff]  }
 0x22a   : > { %v6732_v24 = vpop.f32.mrf.mxu0  ;;  %v6843_v16 = vpop.f32.mrf.mxu1  ;;  %7695 = vmatprep.subr.bf16.mxu1 %v11065_v59  ;;  %v11089_v59 = vld [vmem:[%s15033_s1 + $0x10d4] ss:$8 sps:$4 sm:$0xff]  }
 0x22b   : > { %v6733_v22 = vadd.f32 %v6732_v24, %v13425_v32  ;;  %v13738_v46 = vadd.f32 %v6843_v16, %v6731_v33  ;;  %7583 = vmatpush1.bf16.msra.mxu0 %v11060_v26  ;;  %v11075_v32 = vld [vmem:[%s15033_s1 + $0x11f0] ss:$8 sps:$4 sm:$0xff]   ;;  %v11090_v33 = vld [vmem:[%s11541_s23 + $0x668] ss:$152 sps:$4 sm:$0xff]   ;;  %v11104_v24 = vld [vmem:[%s11541_s23 + $0x794] ss:$152 sps:$4 sm:$0xff]  }
 0x22c   : > { %v6734_v23 = vpop.f32.mrf.mxu0  ;;  %v6845_v28 = vpop.f32.mrf.mxu1  ;;  %7584 = vmatprep.subr.bf16.mxu0 %v11071_v6 }
 0x22d   : > { %v6735_v41 = vadd.f32 %v6734_v23, %v13438_v48  ;;  %v13745_v7 = vadd.f32 %v6845_v28, %v6733_v22  ;;  %7696 = vmatpush1.bf16.msra.mxu1 %v11063_v58  ;;  %v11083_v48 = vld [vmem:[%s15033_s1 + $0x11e4] ss:$8 sps:$4 sm:$0xff]   ;;  %v11084_v58 = vld [vmem:[%s11541_s23 + $0x660] ss:$152 sps:$4 sm:$0xff]   ;;  %v11110_v23 = vld [vmem:[%s11541_s23 + $0x79c] ss:$152 sps:$4 sm:$0xff]  }
 0x22e   : > { %v6738_v35 = vpop.f32.mrf.mxu0  ;;  %v6847_v45 = vpop.f32.mrf.mxu1  ;;  %7415 = vmatmul.mubr.bf16.gmra.mxu0 %v11066_v5  ;;  %7697 = vmatprep.subr.bf16.mxu1 %v11077_v15  ;;  %v11095_v5 = vld [vmem:[%s15033_s1 + $0x11d4] ss:$8 sps:$4 sm:$0xff]   ;;  %v11098_v15 = vld [vmem:[%s15033_s1 + $0x10c4] ss:$8 sps:$4 sm:$0xff]  }
 0x22f   : > { %v6739_v44 = vadd.f32 %v6738_v35, %v13447_v2  ;;  %v13758_v50 = vadd.f32 %v6847_v45, %v6735_v41  ;;  %7585 = vmatpush2.bf16.msra.mxu0 %v11069_v20  ;;  %7424 = vmatprep.mubr.bf16.mxu0 %v11086_v61  ;;  %v11096_v41 = vld [vmem:[%s15033_s1 + $0x10c0] ss:$8 sps:$4 sm:$0xff]  }
 0x230   : > { %v6740_v51 = vpop.f32.mrf.mxu0  ;;  %v6851_v26 = vpop.f32.mrf.mxu1  ;;  %7528 = vmatmul.mubr.bf16.gmra.mxu1 %v11072_v4  ;;  %7586 = vmatprep.subr.bf16.mxu0 %v11080_v27  ;;  %v11099_v35 = vld [vmem:[%s15033_s1 + $0x11c0] ss:$8 sps:$4 sm:$0xff]  }
 0x231   : > { %v6741_v2 = vadd.f32 %v6740_v51, %v13458_v8  ;;  %v13767_v55 = vadd.f32 %v6851_v26, %v6739_v44  ;;  %7698 = vmatpush2.bf16.msra.mxu1 %v11075_v32  ;;  %7537 = vmatprep.mubr.bf16.mxu1 %v11092_v39  ;;  %v11105_v51 = vld [vmem:[%s15033_s1 + $0x10b0] ss:$8 sps:$4 sm:$0xff]  }
 0x232   : > { %v6742_v1 = vpop.f32.mrf.mxu0  ;;  %v6853_v6 = vpop.f32.mrf.mxu1  ;;  %7699 = vmatprep.subr.bf16.mxu1 %v11083_v48  ;;  %v11107_v48 = vld [vmem:[%s15033_s1 + $0x10b4] ss:$8 sps:$4 sm:$0xff]  }
 0x233   : > { %v6743_v8 = vadd.f32 %v6742_v1, %v13465_v21  ;;  %v13778_v20 = vadd.f32 %v6853_v6, %v6741_v2  ;;  %7587 = vmatpush2.bf16.msra.mxu0 %v11078_v0  ;;  %v11093_v21 = vld [vmem:[%s15033_s1 + $0x11d0] ss:$8 sps:$4 sm:$0xff]   ;;  %v11122_v1 = vld [vmem:[%s11541_s23 + $0x8c4] ss:$152 sps:$4 sm:$0xff]  }
 0x234   : > { %v6744_v16 = vpop.f32.mrf.mxu0  ;;  %v6855_v4 = vpop.f32.mrf.mxu1  ;;  %7588 = vmatprep.subr.bf16.mxu0 %v11089_v59  ;;  %v11108_v2 = vld [vmem:[%s11541_s23 + $0x798] ss:$152 sps:$4 sm:$0xff]  }
 0x235   : > { %v6745_v22 = vadd.f32 %v6744_v16, %v13478_v18  ;;  %v13785_v61 = vadd.f32 %v6855_v4, %v6743_v8  ;;  %7700 = vmatpush2.bf16.msra.mxu1 %v11081_v47  ;;  %v11101_v18 = vld [vmem:[%s15033_s1 + $0x11c4] ss:$8 sps:$4 sm:$0xff]   ;;  %v11102_v47 = vld [vmem:[%s11541_s23 + $0x790] ss:$152 sps:$4 sm:$0xff]  }
 0x236   : > { %v6748_v28 = vpop.f32.mrf.mxu0  ;;  %v6857_v27 = vpop.f32.mrf.mxu1  ;;  %7425 = vmatmul.mubr.bf16.gmra.mxu0 %v11084_v58  ;;  %7701 = vmatprep.subr.bf16.mxu1 %v11095_v5  ;;  %v11113_v58 = vld [vmem:[%s15033_s1 + $0x11b4] ss:$8 sps:$4 sm:$0xff]   ;;  %v11116_v5 = vld [vmem:[%s15033_s1 + $0x10a4] ss:$8 sps:$4 sm:$0xff]  }
 0x237   : > { %v6749_v32 = vadd.f32 %v6748_v28, %v13487_v36  ;;  %v13798_v39 = vadd.f32 %v6857_v27, %v6745_v22  ;;  %7589 = vmatpush2.bf16.msra.mxu0 %v11087_v34  ;;  %7434 = vmatprep.mubr.bf16.mxu0 %v11104_v24  ;;  %v11128_v16 = vld [vmem:[%s11541_s23 + $0x8cc] ss:$152 sps:$4 sm:$0xff]   ;;  %v11114_v22 = vld [vmem:[%s15033_s1 + $0x10a0] ss:$8 sps:$4 sm:$0xff]  }
 0x238   : > { %v6750_v45 = vpop.f32.mrf.mxu0  ;;  %v6861_v0 = vpop.f32.mrf.mxu1  ;;  %7538 = vmatmul.mubr.bf16.gmra.mxu1 %v11090_v33  ;;  %7590 = vmatprep.subr.bf16.mxu0 %v11098_v15  ;;  %v11117_v28 = vld [vmem:[%s15033_s1 + $0x11a0] ss:$8 sps:$4 sm:$0xff]  }
 0x239   : > { %v6751_v36 = vadd.f32 %v6750_v45, %v13498_v63  ;;  %v13807_v44 = vadd.f32 %v6861_v0, %v6749_v32  ;;  %7702 = vmatpush2.bf16.msra.mxu1 %v11093_v21  ;;  %7547 = vmatprep.mubr.bf16.mxu1 %v11110_v23  ;;  %v11123_v45 = vld [vmem:[%s15033_s1 + $0x1090] ss:$8 sps:$4 sm:$0xff]  }
 0x23a   : > { %v6752_v26 = vpop.f32.mrf.mxu0  ;;  %v6863_v59 = vpop.f32.mrf.mxu1  ;;  %7703 = vmatprep.subr.bf16.mxu1 %v11101_v18  ;;  %v11125_v18 = vld [vmem:[%s15033_s1 + $0x1094] ss:$8 sps:$4 sm:$0xff]  }
 0x23b   : > { %v6753_v63 = vadd.f32 %v6752_v26, %v13505_v11  ;;  %v13818_v34 = vadd.f32 %v6863_v59, %v6751_v36  ;;  %7591 = vmatpush2.bf16.msra.mxu0 %v11096_v41  ;;  %v11111_v11 = vld [vmem:[%s15033_s1 + $0x11b0] ss:$8 sps:$4 sm:$0xff]   ;;  %v11126_v36 = vld [vmem:[%s11541_s23 + $0x8c8] ss:$152 sps:$4 sm:$0xff]   ;;  %v11140_v26 = vld [vmem:[%s11541_s23 + $0x84] ss:$152 sps:$4 sm:$0xff]  }
 0x23c   : > { %v6754_v6 = vpop.f32.mrf.mxu0  ;;  %v6865_v33 = vpop.f32.mrf.mxu1  ;;  %7592 = vmatprep.subr.bf16.mxu0 %v11107_v48 }
 0x23d   : > { %v6755_v8 = vadd.f32 %v6754_v6, %v13518_v49  ;;  %v13825_v24 = vadd.f32 %v6865_v33, %v6753_v63  ;;  %7704 = vmatpush2.bf16.msra.mxu1 %v11099_v35  ;;  %v11119_v49 = vld [vmem:[%s15033_s1 + $0x11a4] ss:$8 sps:$4 sm:$0xff]   ;;  %v11120_v35 = vld [vmem:[%s11541_s23 + $0x8c0] ss:$152 sps:$4 sm:$0xff]  }
 0x23e   : > { %v6758_v4 = vpop.f32.mrf.mxu0  ;;  %v6867_v15 = vpop.f32.mrf.mxu1  ;;  %7435 = vmatmul.mubr.bf16.gmra.mxu0 %v11102_v47  ;;  %7705 = vmatprep.subr.bf16.mxu1 %v11113_v58  ;;  %v11131_v47 = vld [vmem:[%s15033_s1 + $0x1194] ss:$8 sps:$4 sm:$0xff]   ;;  %v11134_v58 = vld [vmem:[%s15033_s1 + $0x1084] ss:$8 sps:$4 sm:$0xff]  }
 0x23f   : > { %v6759_v21 = vadd.f32 %v6758_v4, %v13527_v12  ;;  %v13838_v23 = vadd.f32 %v6867_v15, %v6755_v8  ;;  %7593 = vmatpush2.bf16.msra.mxu0 %v11105_v51  ;;  %7444 = vmatprep.mubr.bf16.mxu0 %v11122_v1  ;;  %v11146_v6 = vld [vmem:[%s11541_s23 + $0x8c] ss:$152 sps:$4 sm:$0xff]  }
 0x240   : > { %v6760_v27 = vpop.f32.mrf.mxu0  ;;  %v6871_v41 = vpop.f32.mrf.mxu1  ;;  %7548 = vmatmul.mubr.bf16.gmra.mxu1 %v11108_v2  ;;  %7594 = vmatprep.subr.bf16.mxu0 %v11116_v5  ;;  %v11137_v8 = vld [vmem:[%s15033_s1 + $0x1184] ss:$8 sps:$4 sm:$0xff]  }
 0x241   : > { %v6761_v12 = vadd.f32 %v6760_v27, %v13538_v52  ;;  %v13847_v32 = vadd.f32 %v6871_v41, %v6759_v21  ;;  %7706 = vmatpush2.bf16.msra.mxu1 %v11111_v11  ;;  %7557 = vmatprep.mubr.bf16.mxu1 %v11128_v16  ;;  %v11132_v16 = vld [vmem:[%s15033_s1 + $0x1080] ss:$8 sps:$4 sm:$0xff]  }
 0x242   : > { %v6762_v0 = vpop.f32.mrf.mxu0  ;;  %v6873_v48 = vpop.f32.mrf.mxu1  ;;  %7707 = vmatprep.subr.bf16.mxu1 %v11119_v49  ;;  %v11135_v21 = vld [vmem:[%s15033_s1 + $0x1180] ss:$8 sps:$4 sm:$0xff]  }
 0x243   : > { %v6763_v52 = vadd.f32 %v6762_v0, %v13545_v60  ;;  %v13858_v51 = vadd.f32 %v6873_v48, %v6761_v12  ;;  %7595 = vmatpush2.bf16.msra.mxu0 %v11114_v22  ;;  %v11129_v60 = vld [vmem:[%s15033_s1 + $0x1190] ss:$8 sps:$4 sm:$0xff]   ;;  %v11143_v22 = vld [vmem:[%s15033_s1 + $0x1274] ss:$8 sps:$4 sm:$0xff]   ;;  %v11144_v12 = vld [vmem:[%s11541_s23 + $0x88] ss:$152 sps:$4 sm:$0xff]  }
 0x244   : > { %v6764_v59 = vpop.f32.mrf.mxu0  ;;  %v6875_v2 = vpop.f32.mrf.mxu1  ;;  %7596 = vmatprep.subr.bf16.mxu0 %v11125_v18  ;;  %v11141_v18 = vld [vmem:[%s15033_s1 + $0x1270] ss:$8 sps:$4 sm:$0xff]  }
 0x245   : > { %v6765_v63 = vadd.f32 %v6764_v59, %v13558_v19  ;;  %v13865_v1 = vadd.f32 %v6875_v2, %v6763_v52  ;;  %7708 = vmatpush2.bf16.msra.mxu1 %v11117_v28  ;;  %v11138_v28 = vld [vmem:[%s11541_s23 + $0x80] ss:$152 sps:$4 sm:$0xff]  }
 0x246   : > { %v6768_v33 = vpop.f32.mrf.mxu0  ;;  %v6877_v5 = vpop.f32.mrf.mxu1  ;;  %7445 = vmatmul.mubr.bf16.gmra.mxu0 %v11120_v35  ;;  %7709 = vmatprep.subr.bf16.mxu1 %v11131_v47 }
 0x247   : > { %v6769_v11 = vadd.f32 %v6768_v33, %v13567_v54  ;;  %v13875_v19 = vadd.f32 %v6877_v5, %v6765_v63  ;;  %7597 = vmatpush2.bf16.msra.mxu0 %v11123_v45  ;;  %7600 = vmatprep.mubr.bf16.mxu0 %v11140_v26  ;;  %v11149_v45 = vld [vmem:[%s11541_s23 + $0x1b4] ss:$152 sps:$4 sm:$0xff]  }
 0x248   : > { %v6770_v4 = vpop.f32.mrf.mxu0  ;;  %v6881_v15 = vpop.f32.mrf.mxu1  ;;  %7558 = vmatmul.mubr.bf16.gmra.mxu1 %v11126_v36  ;;  %7598 = vmatprep.subr.bf16.mxu0 %v11134_v58  ;;  %v11152_v36 = vld [vmem:[%s15033_s1 + $0x1264] ss:$8 sps:$4 sm:$0xff]   ;;  %v11155_v26 = vld [vmem:[%s11541_s23 + $0x1bc] ss:$152 sps:$4 sm:$0xff]  }
 0x249   : > { %v6771_v54 = vadd.f32 %v6770_v4, %v13578_v57  ;;  %v13884_v49 = vadd.f32 %v6881_v15, %v6769_v11  ;;  %7710 = vmatpush2.bf16.msra.mxu1 %v11129_v60  ;;  %7713 = vmatprep.mubr.bf16.mxu1 %v11146_v6  ;;  %v11161_v6 = vld [vmem:[%s15033_s1 + $0x1254] ss:$8 sps:$4 sm:$0xff]  }
 0x24a   : > { %v6772_v27 = vpop.f32.mrf.mxu0  ;;  %v6883_v41 = vpop.f32.mrf.mxu1  ;;  %7711 = vmatprep.subr.bf16.mxu1 %v11137_v8  ;;  %v11158_v4 = vld [vmem:[%s11541_s23 + $0x2e4] ss:$152 sps:$4 sm:$0xff]  }
 0x24b   : > { %v6773_v57 = vadd.f32 %v6772_v27, %v13585_v53  ;;  %v13895_v35 = vadd.f32 %v6883_v41, %v6771_v54  ;;  %7599 = vmatpush2.bf16.msra.mxu0 %v11132_v16  ;;  %v11153_v16 = vld [vmem:[%s11541_s23 + $0x1b8] ss:$152 sps:$4 sm:$0xff]  }
 0x24c   : > { %v6774_v0 = vpop.f32.mrf.mxu0  ;;  %v6885_v48 = vpop.f32.mrf.mxu1  ;;  %7794 = vmatprep.subr.bf16.mxu0 %v11143_v22  ;;  %v11159_v54 = vld [vmem:[%s15033_s1 + $0x1250] ss:$8 sps:$4 sm:$0xff]  }
 0x24d   : > { %v6775_v47 = vadd.f32 %v6774_v0, %v13597_v25  ;;  %v13902_v52 = vadd.f32 %v6885_v48, %v6773_v57  ;;  %7712 = vmatpush2.bf16.msra.mxu1 %v11135_v21  ;;  %v11150_v25 = vld [vmem:[%s15033_s1 + $0x1260] ss:$8 sps:$4 sm:$0xff]  }
 0x24e   : > { %v6887_v59 = vpop.f32.mrf.mxu1  ;;  %v6924_v53 = vpop.f32.mrf.mxu0  ;;  %7601 = vmatmul.mubr.bf16.vlgmr.msra.gmra.mxu0 %v11138_v28  ;;  %v11167_v28 = vld [vmem:[%s15033_s1 + $0x1244] ss:$8 sps:$4 sm:$0xff]   ;;  %v11165_v0 = vld [vmem:[%s15033_s1 + $0x1240] ss:$8 sps:$4 sm:$0xff]  }
 0x24f   : > { %v13905_v2 = vadd.f32 %v6887_v59, %v6775_v47  ;;  %v6925_v58 = vadd.f32 %v6924_v53, %v13607_v37  ;;  %7795 = vmatpush1.bf16.msra.mxu0 %v11141_v18  ;;  %7610 = vmatprep.mubr.bf16.mxu0 %v11149_v45  ;;  %v11147_v37 = vld [vmem:[%s11541_s23 + $0x1b0] ss:$152 sps:$4 sm:$0xff]   ;;  %v11164_v18 = vld [vmem:[%s11541_s23 + $0x2ec] ss:$152 sps:$4 sm:$0xff]  }
 0x250   : > { %v6926_v63 = vpop.f32.mrf.mxu0  ;;  %v7037_v60 = vpop.f32.mrf.mxu1  ;;  %7714 = vmatmul.mubr.bf16.vlgmr.msra.gmra.mxu1 %v11144_v12  ;;  %7796 = vmatprep.subr.bf16.mxu0 %v11152_v36  ;;  %v11176_v36 = vld [vmem:[%s15033_s1 + $0x1234] ss:$8 sps:$4 sm:$0xff]  }
 0x251   : > { %v6927_v33 = vadd.f32 %v6926_v63, %v13618_v10  ;;  %v13915_v5 = vadd.f32 %v7037_v60, %v6925_v58  ;;  %7723 = vmatprep.mubr.bf16.mxu1 %v11155_v26  ;;  %v11156_v26 = vld [vmem:[%s11541_s23 + $0x2e0] ss:$152 sps:$4 sm:$0xff]   ;;  %v11170_v58 = vld [vmem:[%s11541_s23 + $0x414] ss:$152 sps:$4 sm:$0xff]  }
 0x252   : > { %v6928_v8 = vpop.f32.mrf.mxu0  ;;  %v7039_v11 = vpop.f32.mrf.mxu1  ;;  %v11174_v60 = vld [vmem:[%s15033_s1 + $0x1230] ss:$8 sps:$4 sm:$0xff]  }
 0x253   : > { %v6929_v15 = vadd.f32 %v6928_v8, %v13625_v43  ;;  %v13921_v22 = vadd.f32 %v7039_v11, %v6927_v33  ;;  %7797 = vmatpush1.bf16.msra.mxu0 %v11150_v25 }
 0x254   : > { %v6930_v21 = vpop.f32.mrf.mxu0  ;;  %v7041_v10 = vpop.f32.mrf.mxu1  ;;  %7798 = vmatprep.subr.bf16.mxu0 %v11161_v6 }
 0x255   : > { %v6931_v27 = vadd.f32 %v6930_v21, %v13638_v31  ;;  %v13930_v41 = vadd.f32 %v7041_v10, %v6929_v15  ;;  %v11183_v21 = vld [vmem:[%s15033_s1 + $0x1220] ss:$8 sps:$4 sm:$0xff]  }
 0x256   : > { %v6934_v43 = vpop.f32.mrf.mxu0  ;;  %v7043_v12 = vpop.f32.mrf.mxu1  ;;  %7611 = vmatmul.mubr.bf16.gmra.mxu0 %v11147_v37  ;;  %v11185_v37 = vld [vmem:[%s15033_s1 + $0x1224] ss:$8 sps:$4 sm:$0xff]  }
 0x257   : > { %v6935_v57 = vadd.f32 %v6934_v43, %v13647_v56  ;;  %v13934_v45 = vadd.f32 %v7043_v12, %v6931_v27  ;;  %7620 = vmatprep.mubr.bf16.mxu0 %v11158_v4  ;;  %7799 = vmatpush1.bf16.msra.mxu0 %v11159_v54  ;;  %v11194_v27 = vld [vmem:[%s15033_s1 + $0x1214] ss:$8 sps:$4 sm:$0xff]   ;;  %v11192_v12 = vld [vmem:[%s15033_s1 + $0x1210] ss:$8 sps:$4 sm:$0xff]  }
 0x258   : > { %v6936_v48 = vpop.f32.mrf.mxu0  ;;  %v7047_v31 = vpop.f32.mrf.mxu1  ;;  %7724 = vmatmul.mubr.bf16.gmra.mxu1 %v11153_v16  ;;  %7800 = vmatprep.subr.bf16.mxu0 %v11167_v28  ;;  %v11168_v28 = vld [vmem:[%s11541_s23 + $0x410] ss:$152 sps:$4 sm:$0xff]   ;;  %v11179_v43 = vld [vmem:[%s11541_s23 + $0x544] ss:$152 sps:$4 sm:$0xff]  }
 0x259   : > { %v6937_v56 = vadd.f32 %v6936_v48, %v13658_v40  ;;  %v13943_v47 = vadd.f32 %v7047_v31, %v6935_v57  ;;  %7733 = vmatprep.mubr.bf16.mxu1 %v11164_v18  ;;  %v11162_v40 = vld [vmem:[%s11541_s23 + $0x2e8] ss:$152 sps:$4 sm:$0xff]   ;;  %v11171_v48 = vld [vmem:[%s11541_s23 + $0x418] ss:$152 sps:$4 sm:$0xff]   ;;  %v11203_v31 = vld [vmem:[%s15033_s1 + $0x1204] ss:$8 sps:$4 sm:$0xff]  }
 0x25a   : > { %v6938_v59 = vpop.f32.mrf.mxu0  ;;  %v7049_v53 = vpop.f32.mrf.mxu1 }
 0x25b   : > { %v6939_v25 = vadd.f32 %v6938_v59, %v13665_v29  ;;  %v13948_v63 = vadd.f32 %v7049_v53, %v6937_v56  ;;  %7801 = vmatpush1.bf16.msra.mxu0 %v11165_v0  ;;  %v11173_v29 = vld [vmem:[%s11541_s23 + $0x41c] ss:$152 sps:$4 sm:$0xff]  }
 0x25c   : > { %v6940_v6 = vpop.f32.mrf.mxu0  ;;  %v7051_v33 = vpop.f32.mrf.mxu1  ;;  %7802 = vmatprep.subr.bf16.mxu0 %v11176_v36 }
 0x25d   : > { %v6941_v8 = vadd.f32 %v6940_v6, %v13678_v13  ;;  %v13958_v11 = vadd.f32 %v7051_v33, %v6939_v25 }
 0x25e   : > { %v6944_v16 = vpop.f32.mrf.mxu0  ;;  %v7053_v4 = vpop.f32.mrf.mxu1  ;;  %7621 = vmatmul.mubr.bf16.gmra.mxu0 %v11156_v26  ;;  %v1238_v26 = vld [vmem:[%s15033_s1 + $0x1280] sm:$0x33] }
 0x25f   : > { %v6945_v15 = vadd.f32 %v6944_v16, %v13687_v14  ;;  %v13962_v54 = vadd.f32 %v7053_v4, %v6941_v8  ;;  %7630 = vmatprep.mubr.bf16.mxu0 %v11170_v58  ;;  %7803 = vmatpush1.bf16.msra.mxu0 %v11174_v60  ;;  %v9771_v16 = vcombine.low %v1238_v26, %v1238_v26 }
 0x260   : > { %v6946_v10 = vpop.f32.mrf.mxu0  ;;  %v7057_v13 = vpop.f32.mrf.mxu1  ;;  %7734 = vmatmul.mubr.bf16.gmra.mxu1 %v11162_v40  ;;  %7804 = vmatprep.subr.bf16.mxu0 %v11185_v37 }
 0x261   : > { %v6947_v14 = vadd.f32 %v6946_v10, %v13698_v9  ;;  %v13972_v18 = vadd.f32 %v7057_v13, %v6945_v15  ;;  %7743 = vmatprep.mubr.bf16.mxu1 %v11173_v29  ;;  %v11182_v9 = vld [vmem:[%s11541_s23 + $0x54c] ss:$152 sps:$4 sm:$0xff]   ;;  %v9772_v29 = vcombine.high %v1238_v26, %v1238_v26  ;;  %v11180_v13 = vld [vmem:[%s11541_s23 + $0x548] ss:$152 sps:$4 sm:$0xff]  }
 0x262   : > { %v6948_v57 = vpop.f32.mrf.mxu0  ;;  %v7059_v0 = vpop.f32.mrf.mxu1 }
 0x263   : > { %v6949_v36 = vadd.f32 %v6948_v57, %v13705_v17  ;;  %v13983_v56 = vadd.f32 %v7059_v0, %v6947_v14  ;;  %7805 = vmatpush1.bf16.msra.mxu0 %v11183_v21  ;;  %v11201_v17 = vld [vmem:[%s15033_s1 + $0x1200] ss:$8 sps:$4 sm:$0xff]   ;;  %v11188_v21 = vld [vmem:[%s11541_s23 + $0x674] ss:$152 sps:$4 sm:$0xff]   ;;  %v5755_v57 = vsel %vm5753_vm0, %v9771_v16, 0 }
 0x264   : > { %v6950_v59 = vpop.f32.mrf.mxu0  ;;  %v7061_v53 = vpop.f32.mrf.mxu1  ;;  %7806 = vmatprep.subr.bf16.mxu0 %v11194_v27  ;;  %v11191_v14 = vld [vmem:[%s11541_s23 + $0x67c] ss:$152 sps:$4 sm:$0xff]  }
 0x265   : > { %v6951_v58 = vadd.f32 %v6950_v59, %v13718_v62  ;;  %v13990_v25 = vadd.f32 %v7061_v53, %v6949_v36  ;;  %v11177_v62 = vld [vmem:[%s11541_s23 + $0x540] ss:$152 sps:$4 sm:$0xff]   ;;  %v11186_v59 = vld [vmem:[%s11541_s23 + $0x670] ss:$152 sps:$4 sm:$0xff]  }
 0x266   : > { %v6954_v60 = vpop.f32.mrf.mxu0  ;;  %v7063_v6 = vpop.f32.mrf.mxu1  ;;  %7631 = vmatmul.mubr.bf16.gmra.mxu0 %v11168_v28 }
 0x267   : > { %v6955_v33 = vadd.f32 %v6954_v60, %v13727_v3  ;;  %v13996_v40 = vadd.f32 %v7063_v6, %v6951_v58  ;;  %7640 = vmatprep.mubr.bf16.mxu0 %v11179_v43  ;;  %7807 = vmatpush1.bf16.msra.mxu0 %v11192_v12  ;;  %v11197_v58 = vld [vmem:[%s11541_s23 + $0x7a4] ss:$152 sps:$4 sm:$0xff]   ;;  %v11189_v6 = vld [vmem:[%s11541_s23 + $0x678] ss:$152 sps:$4 sm:$0xff]  }
 0x268   : > { %v6956_v37 = vpop.f32.mrf.mxu0  ;;  %v7067_v8 = vpop.f32.mrf.mxu1  ;;  %7744 = vmatmul.mubr.bf16.gmra.mxu1 %v11171_v48  ;;  %7808 = vmatprep.subr.bf16.mxu0 %v11203_v31 }
 0x269   : > { %v6957_v4 = vadd.f32 %v6956_v37, %v13738_v46  ;;  %v14000_v15 = vadd.f32 %v7067_v8, %v6955_v33  ;;  %7753 = vmatprep.mubr.bf16.mxu1 %v11182_v9  ;;  %v11200_v37 = vld [vmem:[%s11541_s23 + $0x7ac] ss:$152 sps:$4 sm:$0xff]  }
 0x26a   : > { %v6958_v3 = vpop.f32.mrf.mxu0  ;;  %v7069_v10 = vpop.f32.mrf.mxu1 }
 0x26b   : > { %v6959_v28 = vadd.f32 %v6958_v3, %v13745_v7  ;;  %v14005_v27 = vadd.f32 %v7069_v10, %v6957_v4  ;;  %7809 = vmatpush1.bf16.msra.mxu0 %v11201_v17 }
 0x26c   : > { %v6960_v43 = vpop.f32.mrf.mxu0  ;;  %v7071_v12 = vpop.f32.mrf.mxu1  ;;  %9773 = vmatprep.subr.msk.bf16.mxu0 %vm5753_vm0, %v9772_v29 }
 0x26d   : > { %v6961_v46 = vadd.f32 %v6960_v43, %v13758_v50  ;;  %v14009_v0 = vadd.f32 %v7071_v12, %v6959_v28 }
 0x26e   : > { %v6964_v48 = vpop.f32.mrf.mxu0  ;;  %v7073_v31 = vpop.f32.mrf.mxu1  ;;  %7641 = vmatmul.mubr.bf16.gmra.mxu0 %v11177_v62 }
 0x26f   : > { %v6965_v7 = vadd.f32 %v6964_v48, %v13767_v55  ;;  %v14012_v36 = vadd.f32 %v7073_v31, %v6961_v46  ;;  %7650 = vmatprep.mubr.bf16.mxu0 %v11188_v21  ;;  %7825 = vmatpush2.bf16.msra.mxu0 %v5755_v57  ;;  %v11206_v57 = vld [vmem:[%s11541_s23 + $0x8d4] ss:$152 sps:$4 sm:$0xff]   ;;  %v11198_v48 = vld [vmem:[%s11541_s23 + $0x7a8] ss:$152 sps:$4 sm:$0xff]  }
 0x270   : > { %v6966_v9 = vpop.f32.mrf.mxu0  ;;  %v7077_v26 = vpop.f32.mrf.mxu1  ;;  %7754 = vmatmul.mubr.bf16.gmra.mxu1 %v11180_v13 }
 0x271   : > { %v6967_v50 = vadd.f32 %v6966_v9, %v13778_v20  ;;  %v14016_v53 = vadd.f32 %v7077_v26, %v6965_v7  ;;  %7763 = vmatprep.mubr.bf16.mxu1 %v11191_v14  ;;  %v11195_v14 = vld [vmem:[%s11541_s23 + $0x7a0] ss:$152 sps:$4 sm:$0xff]  }
 0x272   : > { %v6968_v17 = vpop.f32.mrf.mxu0  ;;  %v7079_v60 = vpop.f32.mrf.mxu1 }
 0x273   : > { %v6969_v55 = vadd.f32 %v6968_v17, %v13785_v61  ;;  %v14021_v33 = vadd.f32 %v7079_v60, %v6967_v50 }
 0x274   : > { %v6970_v8 = vpop.f32.mrf.mxu0  ;;  %v7081_v62 = vpop.f32.mrf.mxu1 }
 0x275   : > { %v14025_v29 = vadd.f32 %v6970_v8, %v13798_v39  ;;  %v14027_v16 = vadd.f32 %v7081_v62, %v6969_v55  ;;  %v11214_v8 = vld [vmem:[%s11541_s23 + $0x94] ss:$152 sps:$4 sm:$0xff]  }
 0x276   : > { %v6974_v20 = vpop.f32.mrf.mxu0  ;;  %v14029_v4 = vpop.f32.mrf.mxu1  ;;  %7651 = vmatmul.mubr.bf16.gmra.mxu0 %v11186_v59 }
 0x277   : > { %v6975_v21 = vadd.f32 %v6974_v20, %v13807_v44  ;;  %7660 = vmatprep.mubr.bf16.mxu0 %v11197_v58  ;;  %v11207_v20 = vld [vmem:[%s11541_s23 + $0x8d8] ss:$152 sps:$4 sm:$0xff]  }
 0x278   : > { %v6976_v61 = vpop.f32.mrf.mxu0  ;;  %v7087_v3 = vpop.f32.mrf.mxu1  ;;  %7764 = vmatmul.mubr.bf16.gmra.mxu1 %v11189_v6  ;;  %v11204_v6 = vld [vmem:[%s11541_s23 + $0x8d0] ss:$152 sps:$4 sm:$0xff]  }
 0x279   : > { %v6977_v10 = vadd.f32 %v6976_v61, %v13818_v34  ;;  %v14033_v13 = vadd.f32 %v7087_v3, %v6975_v21  ;;  %7773 = vmatprep.mubr.bf16.mxu1 %v11200_v37  ;;  %v11209_v34 = vld [vmem:[%s11541_s23 + $0x8dc] ss:$152 sps:$4 sm:$0xff]  }
 0x27a   : > { %v6978_v39 = vpop.f32.mrf.mxu0  ;;  %v7089_v28 = vpop.f32.mrf.mxu1 }
 0x27b   : > { %v6979_v43 = vadd.f32 %v6978_v39, %v13825_v24  ;;  %v14037_v12 = vadd.f32 %v7089_v28, %v6977_v10 }
 0x27c   : > { %v6980_v44 = vpop.f32.mrf.mxu0  ;;  %v7091_v46 = vpop.f32.mrf.mxu1 }
 0x27d   : > { %v14042_v31 = vadd.f32 %v6980_v44, %v13838_v23  ;;  %v14044_v7 = vadd.f32 %v7091_v46, %v6979_v43 }
 0x27e   : > { %v6984_v9 = vpop.f32.mrf.mxu0  ;;  %v14047_v26 = vpop.f32.mrf.mxu1  ;;  %7661 = vmatmul.mubr.bf16.gmra.mxu0 %v11195_v14 }
 0x27f   : > { %v6985_v24 = vadd.f32 %v6984_v9, %v13847_v32  ;;  %7670 = vmatprep.mubr.bf16.mxu0 %v11206_v57  ;;  %v11212_v57 = vld [vmem:[%s11541_s23 + $0x90] ss:$152 sps:$4 sm:$0xff]  }
 0x280   : > { %v6986_v59 = vpop.f32.mrf.mxu0  ;;  %v7097_v50 = vpop.f32.mrf.mxu1  ;;  %7774 = vmatmul.mubr.bf16.gmra.mxu1 %v11198_v48  ;;  %v11215_v48 = vld [vmem:[%s11541_s23 + $0x1c4] ss:$152 sps:$4 sm:$0xff]  }
 0x281   : > { %v6987_v58 = vadd.f32 %v6986_v59, %v13858_v51  ;;  %v14051_v23 = vadd.f32 %v7097_v50, %v6985_v24  ;;  %7783 = vmatprep.mubr.bf16.mxu1 %v11209_v34 }
 0x282   : > { %v6988_v17 = vpop.f32.mrf.mxu0  ;;  %v7099_v60 = vpop.f32.mrf.mxu1 }
 0x283   : > { %v6989_v55 = vadd.f32 %v6988_v17, %v13865_v1  ;;  %v14055_v37 = vadd.f32 %v7099_v60, %v6987_v58 }
 0x284   : > { %v6990_v62 = vpop.f32.mrf.mxu0  ;;  %v7101_v32 = vpop.f32.mrf.mxu1 }
 0x285   : > { %v14060_v21 = vadd.f32 %v6990_v62, %v13875_v19  ;;  %v14062_v51 = vadd.f32 %v7101_v32, %v6989_v55  ;;  %v11217_v55 = vld [vmem:[%s11541_s23 + $0x1c0] ss:$152 sps:$4 sm:$0xff]   ;;  %v11218_v32 = vld [vmem:[%s11541_s23 + $0x2f4] ss:$152 sps:$4 sm:$0xff]  }
 0x286   : > { %v6994_v61 = vpop.f32.mrf.mxu0  ;;  %v14064_v3 = vpop.f32.mrf.mxu1  ;;  %7671 = vmatmul.mubr.bf16.gmra.mxu0 %v11204_v6 }
 0x287   : > { %v6995_v1 = vadd.f32 %v6994_v61, %v13884_v49  ;;  %9774 = vmatprep.mubr.msk.bf16.mxu0 %vm5728_vm1, %v11214_v8 }
 0x288   : > { %v6996_v10 = vpop.f32.mrf.mxu0  ;;  %v7107_v39 = vpop.f32.mrf.mxu1  ;;  %7784 = vmatmul.mubr.bf16.gmra.mxu1 %v11207_v20 }
 0x289   : > { %v6997_v28 = vadd.f32 %v6996_v10, %v13895_v35  ;;  %v14069_v14 = vadd.f32 %v7107_v39, %v6995_v1 }
 0x28a   : > { %v6998_v19 = vpop.f32.mrf.mxu0  ;;  %v7109_v43 = vpop.f32.mrf.mxu1 }
 0x28b   : > { %v6999_v44 = vadd.f32 %v6998_v19, %v13902_v52  ;;  %v14073_v46 = vadd.f32 %v7109_v43, %v6997_v28 }
 0x28c   : > { %v7000_v34 = vpop.f32.mrf.mxu0  ;;  %v7111_v49 = vpop.f32.mrf.mxu1 }
 0x28d   : > { %v14077_v9 = vadd.f32 %v7000_v34, %v13905_v2  ;;  %v14079_v24 = vadd.f32 %v7111_v49, %v6999_v44  ;;  %v11220_v44 = vld [vmem:[%s11541_s23 + $0x2f0] ss:$152 sps:$4 sm:$0xff]  }
 0x28e   : > { %v14081_v35 = vpop.f32.mrf.mxu1  ;;  %v7150_v59 = vpop.f32.mrf.mxu0  ;;  %7827 = vmatmul.mubr.bf16.vlgmr.msra.gmra.mxu0 %v11212_v57 }
 0x28f   : > { %v7151_v50 = vadd.f32 %v7150_v59, %v13915_v5  ;;  %9775 = vmatprep.mubr.msk.bf16.mxu0 %vm5728_vm1, %v11215_v48  ;;  %v11238_v48 = vld [vmem:[%s15035_s3 + $0x74] ss:$8 sps:$4 sm:$0xff]   ;;  %v11236_v59 = vld [vmem:[%s15035_s3 + $0x70] ss:$8 sps:$4 sm:$0xff]  }
 0x290   : > { %v7152_v52 = vpop.f32.mrf.mxu0  ;;  %v7263_v58 = vpop.f32.mrf.mxu1  ;;  %8159 = vmatprep.subr.bf16.mxu1 %v11238_v48 }
 0x291   : > { %v7153_v17 = vadd.f32 %v7152_v52, %v13921_v22  ;;  %v14086_v60 = vadd.f32 %v7263_v58, %v7151_v50  ;;  %8160 = vmatpush1.bf16.msra.mxu1 %v11236_v59 }
 0x292   : > { %v7154_v6 = vpop.f32.mrf.mxu0  ;;  %v7265_v2 = vpop.f32.mrf.mxu1 }
 0x293   : > { %v7155_v8 = vadd.f32 %v7154_v6, %v13930_v41  ;;  %v14090_v62 = vadd.f32 %v7265_v2, %v7153_v17 }
 0x294   : > { %v7156_v20 = vpop.f32.mrf.mxu0  ;;  %v7267_v61 = vpop.f32.mrf.mxu1 }
 0x295   : > { %v14094_v5 = vadd.f32 %v7156_v20, %v13934_v45  ;;  %v14096_v1 = vadd.f32 %v7267_v61, %v7155_v8 }
 0x296   : > { %v7160_v22 = vpop.f32.mrf.mxu0  ;;  %v14098_v10 = vpop.f32.mrf.mxu1  ;;  %7837 = vmatmul.mubr.bf16.gmra.mxu0 %v11217_v55 }
 0x297   : > { %v7161_v39 = vadd.f32 %v7160_v22, %v13943_v47  ;;  %9776 = vmatprep.mubr.msk.bf16.mxu0 %vm5728_vm1, %v11218_v32  ;;  %v11221_v47 = vld [vmem:[%s11541_s23 + $0x424] ss:$152 sps:$4 sm:$0xff]  }
 0x298   : > { %v7162_v41 = vpop.f32.mrf.mxu0  ;;  %v7273_v28 = vpop.f32.mrf.mxu1 }
 0x299   : > { %v7163_v19 = vadd.f32 %v7162_v41, %v13948_v63  ;;  %v14103_v43 = vadd.f32 %v7273_v28, %v7161_v39  ;;  %v11223_v39 = vld [vmem:[%s11541_s23 + $0x420] ss:$152 sps:$4 sm:$0xff]  }
 0x29a   : > { %v7164_v57 = vpop.f32.mrf.mxu0  ;;  %v7275_v45 = vpop.f32.mrf.mxu1 }
 0x29b   : > { %v7165_v34 = vadd.f32 %v7164_v57, %v13958_v11  ;;  %v14110_v49 = vadd.f32 %v7275_v45, %v7163_v19  ;;  %v11241_v11 = vld [vmem:[%s15035_s3 + $0x64] ss:$8 sps:$4 sm:$0xff]   ;;  %v11242_v57 = vld [vmem:[%s15035_s3 + $0x50] ss:$8 sps:$4 sm:$0xff]  }
 0x29c   : > { %v7166_v50 = vpop.f32.mrf.mxu0  ;;  %v7277_v63 = vpop.f32.mrf.mxu1  ;;  %8161 = vmatprep.subr.bf16.mxu1 %v11241_v11  ;;  %v11224_v19 = vld [vmem:[%s11541_s23 + $0x554] ss:$152 sps:$4 sm:$0xff]  }
 0x29d   : > { %v14117_v52 = vadd.f32 %v7166_v50, %v13962_v54  ;;  %v14119_v58 = vadd.f32 %v7277_v63, %v7165_v34  ;;  %v11239_v54 = vld [vmem:[%s15035_s3 + $0x60] ss:$8 sps:$4 sm:$0xff]  }
 0x29e   : > { %v7170_v17 = vpop.f32.mrf.mxu0  ;;  %v14121_v6 = vpop.f32.mrf.mxu1  ;;  %7847 = vmatmul.mubr.bf16.gmra.mxu0 %v11220_v44  ;;  %8162 = vmatpush1.bf16.msra.mxu1 %v11239_v54 }
 0x29f   : > { %v7171_v2 = vadd.f32 %v7170_v17, %v13972_v18  ;;  %9777 = vmatprep.mubr.msk.bf16.mxu0 %vm5728_vm1, %v11221_v47  ;;  %v11244_v18 = vld [vmem:[%s15035_s3 + $0x54] ss:$8 sps:$4 sm:$0xff]  }
 0x2a0   : > { %v7172_v55 = vpop.f32.mrf.mxu0  ;;  %v7283_v8 = vpop.f32.mrf.mxu1  ;;  %8163 = vmatprep.subr.bf16.mxu1 %v11244_v18 }
 0x2a1   : > { %v7173_v32 = vadd.f32 %v7172_v55, %v13983_v56  ;;  %v14132_v20 = vadd.f32 %v7283_v8, %v7171_v2  ;;  %v11226_v55 = vld [vmem:[%s11541_s23 + $0x550] ss:$152 sps:$4 sm:$0xff]  }
 0x2a2   : > { %v7174_v61 = vpop.f32.mrf.mxu0  ;;  %v7285_v22 = vpop.f32.mrf.mxu1  ;;  %8164 = vmatpush1.bf16.msra.mxu1 %v11242_v57 }
 0x2a3   : > { %v7175_v41 = vadd.f32 %v7174_v61, %v13990_v25  ;;  %v14139_v28 = vadd.f32 %v7285_v22, %v7173_v32  ;;  %v11247_v25 = vld [vmem:[%s15035_s3 + $0x44] ss:$8 sps:$4 sm:$0xff]   ;;  %v11248_v22 = vld [vmem:[%s15035_s3 + $0x30] ss:$8 sps:$4 sm:$0xff]  }
 0x2a4   : > { %v7176_v56 = vpop.f32.mrf.mxu0  ;;  %v7287_v45 = vpop.f32.mrf.mxu1  ;;  %8165 = vmatprep.subr.bf16.mxu1 %v11247_v25  ;;  %v11227_v61 = vld [vmem:[%s11541_s23 + $0x684] ss:$152 sps:$4 sm:$0xff]  }
 0x2a5   : > { %v14146_v44 = vadd.f32 %v7176_v56, %v13996_v40  ;;  %v14148_v48 = vadd.f32 %v7287_v45, %v7175_v41  ;;  %v11245_v40 = vld [vmem:[%s15035_s3 + $0x40] ss:$8 sps:$4 sm:$0xff]  }
 0x2a6   : > { %v7180_v34 = vpop.f32.mrf.mxu0  ;;  %v14150_v47 = vpop.f32.mrf.mxu1  ;;  %7857 = vmatmul.mubr.bf16.gmra.mxu0 %v11223_v39  ;;  %8166 = vmatpush1.bf16.msra.mxu1 %v11245_v40 }
 0x2a7   : > { %v7181_v59 = vadd.f32 %v7180_v34, %v14000_v15  ;;  %9778 = vmatprep.mubr.msk.bf16.mxu0 %vm5728_vm1, %v11224_v19  ;;  %v11250_v15 = vld [vmem:[%s15035_s3 + $0x34] ss:$8 sps:$4 sm:$0xff]  }
 0x2a8   : > { %v7182_v50 = vpop.f32.mrf.mxu0  ;;  %v7293_v63 = vpop.f32.mrf.mxu1  ;;  %8167 = vmatprep.subr.bf16.mxu1 %v11250_v15 }
 0x2a9   : > { %v7183_v17 = vadd.f32 %v7182_v50, %v14005_v27  ;;  %v14161_v11 = vadd.f32 %v7293_v63, %v7181_v59  ;;  %v11229_v63 = vld [vmem:[%s11541_s23 + $0x680] ss:$152 sps:$4 sm:$0xff]  }
 0x2aa   : > { %v7184_v2 = vpop.f32.mrf.mxu0  ;;  %v7295_v54 = vpop.f32.mrf.mxu1  ;;  %8168 = vmatpush1.bf16.msra.mxu1 %v11248_v22 }
 0x2ab   : > { %v7185_v8 = vadd.f32 %v7184_v2, %v14009_v0  ;;  %v14168_v32 = vadd.f32 %v7295_v54, %v7183_v17  ;;  %v11253_v0 = vld [vmem:[%s15035_s3 + $0x24] ss:$8 sps:$4 sm:$0xff]  }
 0x2ac   : > { %v7186_v27 = vpop.f32.mrf.mxu0  ;;  %v7297_v39 = vpop.f32.mrf.mxu1  ;;  %8169 = vmatprep.subr.bf16.mxu1 %v11253_v0  ;;  %v11230_v54 = vld [vmem:[%s11541_s23 + $0x7b4] ss:$152 sps:$4 sm:$0xff]  }
 0x2ad   : > { %v14175_v18 = vadd.f32 %v7186_v27, %v14012_v36  ;;  %v14177_v41 = vadd.f32 %v7297_v39, %v7185_v8  ;;  %v11251_v36 = vld [vmem:[%s15035_s3 + $0x20] ss:$8 sps:$4 sm:$0xff]  }
 0x2ae   : > { %v7190_v19 = vpop.f32.mrf.mxu0  ;;  %v14179_v57 = vpop.f32.mrf.mxu1  ;;  %7867 = vmatmul.mubr.bf16.gmra.mxu0 %v11226_v55  ;;  %8170 = vmatpush1.bf16.msra.mxu1 %v11251_v36  ;;  %v11254_v55 = vld [vmem:[%s15035_s3 + $0x10] ss:$8 sps:$4 sm:$0xff]   ;;  %v11257_v39 = vld [vmem:[%s15035_s3] ss:$8 sps:$4 sm:$0xff]  }
 0x2af   : > { %v7191_v56 = vadd.f32 %v7190_v19, %v14016_v53  ;;  %9779 = vmatprep.mubr.msk.bf16.mxu0 %vm5728_vm1, %v11227_v61  ;;  %v11256_v53 = vld [vmem:[%s15035_s3 + $0x14] ss:$8 sps:$4 sm:$0xff]  }
 0x2b0   : > { %v7192_v45 = vpop.f32.mrf.mxu0  ;;  %v7303_v34 = vpop.f32.mrf.mxu1  ;;  %8171 = vmatprep.subr.bf16.mxu1 %v11256_v53  ;;  %v11260_v53 = vld [vmem:[%s15035_s3 + $0xf0] ss:$8 sps:$4 sm:$0xff]  }
 0x2b1   : > { %v7193_v25 = vadd.f32 %v7192_v45, %v14021_v33  ;;  %v14190_v59 = vadd.f32 %v7303_v34, %v7191_v56 }
 0x2b2   : > { %v7194_v40 = vpop.f32.mrf.mxu0  ;;  %v7305_v50 = vpop.f32.mrf.mxu1  ;;  %8172 = vmatpush1.bf16.msra.mxu1 %v11254_v55 }
 0x2b3   : > { %v7195_v17 = vadd.f32 %v7194_v40, %v14027_v16  ;;  %v14197_v2 = vadd.f32 %v7305_v50, %v7193_v25  ;;  %v11259_v16 = vld [vmem:[%s15035_s3 + $0x4] ss:$8 sps:$4 sm:$0xff]   ;;  %v11232_v25 = vld [vmem:[%s11541_s23 + $0x7b0] ss:$152 sps:$4 sm:$0xff]  }
 0x2b4   : > { %v14203_v33 = vpop.f32.mrf.mxu0  ;;  %v7307_v15 = vpop.f32.mrf.mxu1  ;;  %8173 = vmatprep.subr.bf16.mxu1 %v11259_v16  ;;  %v11263_v16 = vld [vmem:[%s15035_s3 + $0xe0] ss:$8 sps:$4 sm:$0xff]  }
 0x2b5   : > { %v14205_v8 = vadd.f32 %v7307_v15, %v7195_v17 }
 0x2b6   : > { %v7200_v61 = vpop.f32.mrf.mxu0  ;;  %v14207_v22 = vpop.f32.mrf.mxu1  ;;  %7877 = vmatmul.mubr.bf16.gmra.mxu0 %v11229_v63  ;;  %8174 = vmatpush1.bf16.msra.mxu1 %v11257_v39  ;;  %v11233_v63 = vld [vmem:[%s11541_s23 + $0x8e4] ss:$152 sps:$4 sm:$0xff]  }
 0x2b7   : > { %v7201_v27 = vadd.f32 %v7200_v61, %v14033_v13  ;;  %9780 = vmatprep.mubr.msk.bf16.mxu0 %vm5728_vm1, %v11230_v54  ;;  %v11262_v13 = vld [vmem:[%s15035_s3 + $0xf4] ss:$8 sps:$4 sm:$0xff]  }
 0x2b8   : > { %v7202_v19 = vpop.f32.mrf.mxu0  ;;  %v7313_v0 = vpop.f32.mrf.mxu1  ;;  %8175 = vmatprep.subr.bf16.mxu1 %v11262_v13 }
 0x2b9   : > { %v7203_v56 = vadd.f32 %v7202_v19, %v14037_v12  ;;  %v14218_v36 = vadd.f32 %v7313_v0, %v7201_v27 }
 0x2ba   : > { %v7204_v45 = vpop.f32.mrf.mxu0  ;;  %v7315_v34 = vpop.f32.mrf.mxu1  ;;  %8176 = vmatpush2.bf16.msra.mxu1 %v11260_v53 }
 0x2bb   : > { %v7205_v40 = vadd.f32 %v7204_v45, %v14044_v7  ;;  %v14225_v50 = vadd.f32 %v7315_v34, %v7203_v56  ;;  %v11265_v7 = vld [vmem:[%s15035_s3 + $0xe4] ss:$8 sps:$4 sm:$0xff]   ;;  %v11235_v34 = vld [vmem:[%s11541_s23 + $0x8e0] ss:$152 sps:$4 sm:$0xff]  }
 0x2bc   : > { %v14231_v12 = vpop.f32.mrf.mxu0  ;;  %v7317_v17 = vpop.f32.mrf.mxu1  ;;  %8177 = vmatprep.subr.bf16.mxu1 %v11265_v7 }
 0x2bd   : > { %v14233_v54 = vadd.f32 %v7317_v17, %v7205_v40  ;;  %v11266_v40 = vld [vmem:[%s15035_s3 + $0xd0] ss:$8 sps:$4 sm:$0xff]  }
 0x2be   : > { %v7210_v55 = vpop.f32.mrf.mxu0  ;;  %v14235_v15 = vpop.f32.mrf.mxu1  ;;  %7887 = vmatmul.mubr.bf16.gmra.mxu0 %v11232_v25  ;;  %8178 = vmatpush2.bf16.msra.mxu1 %v11263_v16 }
 0x2bf   : > { %v7211_v61 = vadd.f32 %v7210_v55, %v14051_v23  ;;  %9781 = vmatprep.mubr.msk.bf16.mxu0 %vm5728_vm1, %v11233_v63  ;;  %v11268_v23 = vld [vmem:[%s15035_s3 + $0xd4] ss:$8 sps:$4 sm:$0xff]  }
 0x2c0   : > { %v7212_v27 = vpop.f32.mrf.mxu0  ;;  %v7323_v39 = vpop.f32.mrf.mxu1  ;;  %8179 = vmatprep.subr.bf16.mxu1 %v11268_v23 }
 0x2c1   : > { %v7213_v19 = vadd.f32 %v7212_v27, %v14055_v37  ;;  %v14246_v0 = vadd.f32 %v7323_v39, %v7211_v61  ;;  %v11269_v61 = vld [vmem:[%s15035_s3 + $0xc0] ss:$8 sps:$4 sm:$0xff]  }
 0x2c2   : > { %v7214_v56 = vpop.f32.mrf.mxu0  ;;  %v7325_v45 = vpop.f32.mrf.mxu1  ;;  %8180 = vmatpush2.bf16.msra.mxu1 %v11266_v40 }
 0x2c3   : > { %v7215_v25 = vadd.f32 %v7214_v56, %v14062_v51  ;;  %v14253_v13 = vadd.f32 %v7325_v45, %v7213_v19  ;;  %v11271_v51 = vld [vmem:[%s15035_s3 + $0xc4] ss:$8 sps:$4 sm:$0xff]  }
 0x2c4   : > { %v14258_v63 = vpop.f32.mrf.mxu0  ;;  %v7327_v37 = vpop.f32.mrf.mxu1  ;;  %8181 = vmatprep.subr.bf16.mxu1 %v11271_v51 }
 0x2c5   : > { %v14260_v53 = vadd.f32 %v7327_v37, %v7215_v25  ;;  %v11272_v25 = vld [vmem:[%s15035_s3 + $0xb0] ss:$8 sps:$4 sm:$0xff]  }
 0x2c6   : > { %v7220_v17 = vpop.f32.mrf.mxu0  ;;  %v14262_v55 = vpop.f32.mrf.mxu1  ;;  %7897 = vmatmul.mubr.bf16.gmra.mxu0 %v11235_v34  ;;  %8182 = vmatpush2.bf16.msra.mxu1 %v11269_v61  ;;  %v11274_v34 = vld [vmem:[%s15035_s3 + $0xb4] ss:$8 sps:$4 sm:$0xff]   ;;  %v11275_v61 = vld [vmem:[%s15035_s3 + $0xa0] ss:$8 sps:$4 sm:$0xff]  }
 0x2c7   : > { %v7221_v7 = vadd.f32 %v7220_v17, %v14069_v14  ;;  %8183 = vmatprep.subr.bf16.mxu1 %v11274_v34 }
 0x2c8   : > { %v7222_v16 = vpop.f32.mrf.mxu0  ;;  %v7333_v27 = vpop.f32.mrf.mxu1 }
 0x2c9   : > { %v7223_v39 = vadd.f32 %v7222_v16, %v14073_v46  ;;  %v14272_v19 = vadd.f32 %v7333_v27, %v7221_v7 }
 0x2ca   : > { %v7224_v56 = vpop.f32.mrf.mxu0  ;;  %v7335_v45 = vpop.f32.mrf.mxu1  ;;  %8184 = vmatpush2.bf16.msra.mxu1 %v11272_v25 }
 0x2cb   : > { %v7225_v14 = vadd.f32 %v7224_v56, %v14079_v24  ;;  %v14278_v23 = vadd.f32 %v7335_v45, %v7223_v39  ;;  %v11277_v24 = vld [vmem:[%s15035_s3 + $0xa4] ss:$8 sps:$4 sm:$0xff]  }
 0x2cc   : > { %v14283_v40 = vpop.f32.mrf.mxu0  ;;  %v7337_v46 = vpop.f32.mrf.mxu1  ;;  %8185 = vmatprep.subr.bf16.mxu1 %v11277_v24 }
 0x2cd   : > { %v14285_v37 = vadd.f32 %v7337_v46, %v7225_v14  ;;  %v11280_v14 = vld [vmem:[%s15035_s3 + $0x94] ss:$8 sps:$4 sm:$0xff]  }
 0x2ce   : > { %v14287_v17 = vpop.f32.mrf.mxu1  ;;  %v7376_v51 = vpop.f32.mrf.mxu0  ;;  %8186 = vmatpush2.bf16.msra.mxu1 %v11275_v61 }
 0x2cf   : > { %v7377_v7 = vadd.f32 %v7376_v51, %v14086_v60  ;;  %v7270_v60 = vadd.f32 %v14098_v10, %v14094_v5  ;;  %8187 = vmatprep.subr.bf16.mxu1 %v11280_v14  ;;  %v11283_v5 = vld [vmem:[%s15035_s3 + $0x84] ss:$8 sps:$4 sm:$0xff]   ;;  %v11281_v10 = vld [vmem:[%s15035_s3 + $0x80] ss:$8 sps:$4 sm:$0xff]  }
 0x2d0   : > { %v7378_v16 = vpop.f32.mrf.mxu0  ;;  %v7489_v27 = vpop.f32.mrf.mxu1 }
 0x2d1   : > { %v7379_v39 = vadd.f32 %v7378_v16, %v14090_v62  ;;  %v14297_v56 = vadd.f32 %v7489_v27, %v7377_v7  ;;  %v11278_v62 = vld [vmem:[%s15035_s3 + $0x90] ss:$8 sps:$4 sm:$0xff]  }
 0x2d2   : > { %v7380_v45 = vpop.f32.mrf.mxu0  ;;  %v7491_v34 = vpop.f32.mrf.mxu1  ;;  %8188 = vmatpush2.bf16.msra.mxu1 %v11278_v62  ;;  %v7280_v62 = vadd.f32 %v14121_v6, %v14117_v52 }
 0x2d3   : > { %v14305_v25 = vadd.f32 %v7380_v45, %v14096_v1  ;;  %v14307_v46 = vadd.f32 %v7491_v34, %v7379_v39  ;;  %8189 = vmatprep.subr.bf16.mxu1 %v11283_v5 }
 0x2d4   : > { %v7382_v51 = vpop.f32.mrf.mxu0  ;;  %v14312_v24 = vpop.f32.mrf.mxu1 }
 0x2d5   : > { %v14314_v7 = vadd.f32 %v7382_v51, %v7270_v60 }
 0x2d6   : > { %v7386_v61 = vpop.f32.mrf.mxu0  ;;  %v14316_v16 = vpop.f32.mrf.mxu1  ;;  %8190 = vmatpush2.bf16.msra.mxu1 %v11281_v10 }
 0x2d7   : > { %v7387_v1 = vadd.f32 %v7386_v61, %v14103_v43 }
 0x2d8   : > { %v7388_v27 = vpop.f32.mrf.mxu0  ;;  %v7499_v39 = vpop.f32.mrf.mxu1 }
 0x2d9   : > { %v7389_v45 = vadd.f32 %v7388_v27, %v14110_v49  ;;  %v14326_v34 = vadd.f32 %v7499_v39, %v7387_v1 }
 0x2da   : > { %v7390_v14 = vpop.f32.mrf.mxu0  ;;  %v7501_v60 = vpop.f32.mrf.mxu1 }
 0x2db   : > { %v14331_v51 = vadd.f32 %v7390_v14, %v14119_v58  ;;  %v14333_v43 = vadd.f32 %v7501_v60, %v7389_v45  ;;  %v7290_v45 = vadd.f32 %v14150_v47, %v14146_v44 }
 0x2dc   : > { %v7392_v61 = vpop.f32.mrf.mxu0  ;;  %v14335_v30 = vpop.f32.mrf.mxu1 }
 0x2dd   : > { %v14337_v38 = vadd.f32 %v7392_v61, %v7280_v62 }
 0x2de   : > { %v7396_v5 = vpop.f32.mrf.mxu0  ;;  %v14339_v49 = vpop.f32.mrf.mxu1 }
 0x2df   : > { %v7397_v1 = vadd.f32 %v7396_v5, %v14132_v20 }
 0x2e0   : > { %v7398_v10 = vpop.f32.mrf.mxu0  ;;  %v7509_v27 = vpop.f32.mrf.mxu1 }
 0x2e1   : > { %v7399_v39 = vadd.f32 %v7398_v10, %v14139_v28  ;;  %v14343_v52 = vadd.f32 %v7509_v27, %v7397_v1 }
 0x2e2   : > { %v7400_v58 = vpop.f32.mrf.mxu0  ;;  %v7511_v6 = vpop.f32.mrf.mxu1 }
 0x2e3   : > { %v14348_v14 = vadd.f32 %v7400_v58, %v14148_v48  ;;  %v14350_v60 = vadd.f32 %v7511_v6, %v7399_v39  ;;  %v7300_v39 = vadd.f32 %v14179_v57, %v14175_v18 }
 0x2e4   : > { %v7402_v62 = vpop.f32.mrf.mxu0  ;;  %v14352_v61 = vpop.f32.mrf.mxu1 }
 0x2e5   : > { %v14354_v20 = vadd.f32 %v7402_v62, %v7290_v45 }
 0x2e6   : > { %v7406_v5 = vpop.f32.mrf.mxu0  ;;  %v14356_v42 = vpop.f32.mrf.mxu1 }
 0x2e7   : > { %v7407_v28 = vadd.f32 %v7406_v5, %v14161_v11  ;;  %v7084_v11 = vadd.f32 %v14029_v4, %v14025_v29 }
 0x2e8   : > { %v7408_v1 = vpop.f32.mrf.mxu0  ;;  %v7519_v10 = vpop.f32.mrf.mxu1 }
 0x2e9   : > { %v7409_v27 = vadd.f32 %v7408_v1, %v14168_v32  ;;  %v14360_v44 = vadd.f32 %v7519_v10, %v7407_v28  ;;  %v7197_v1 = vadd.f32 %v14203_v33, %v7084_v11 }
 0x2ea   : > { %v7410_v48 = vpop.f32.mrf.mxu0  ;;  %v7521_v47 = vpop.f32.mrf.mxu1 }
 0x2eb   : > { %v14365_v58 = vadd.f32 %v7410_v48, %v14177_v41  ;;  %v14367_v6 = vadd.f32 %v7521_v47, %v7409_v27 }
 0x2ec   : > { %v7412_v45 = vpop.f32.mrf.mxu0  ;;  %v14369_v62 = vpop.f32.mrf.mxu1 }
 0x2ed   : > { %15069 = vst [vmem:[#allocation6_spill] sm:$0xff] %v14369_v62  ;;  %v14373_v5 = vadd.f32 %v7412_v45, %v7300_v39  ;;  %v7310_v62 = vadd.f32 %v14207_v22, %v7197_v1 }
 0x2ee   : > { %v7416_v32 = vpop.f32.mrf.mxu0  ;;  %v14375_v28 = vpop.f32.mrf.mxu1 }
 0x2ef   : > { %v7417_v18 = vadd.f32 %v7416_v32, %v14190_v59  ;;  %v7094_v59 = vadd.f32 %v14047_v26, %v14042_v31 }
 0x2f0   : > { %v7418_v57 = vpop.f32.mrf.mxu0  ;;  %v7529_v41 = vpop.f32.mrf.mxu1 }
 0x2f1   : > { %v7419_v10 = vadd.f32 %v7418_v57, %v14197_v2  ;;  %v14380_v27 = vadd.f32 %v7529_v41, %v7417_v18  ;;  %v7207_v32 = vadd.f32 %v14231_v12, %v7094_v59 }
 0x2f2   : > { %v7420_v48 = vpop.f32.mrf.mxu0  ;;  %v7531_v47 = vpop.f32.mrf.mxu1 }
 0x2f3   : > { %v14384_v29 = vadd.f32 %v7420_v48, %v14205_v8  ;;  %v14386_v4 = vadd.f32 %v7531_v47, %v7419_v10  ;;  %v7320_v48 = vadd.f32 %v14235_v15, %v7207_v32 }
 0x2f4   : > { %v7422_v39 = vpop.f32.mrf.mxu0  ;;  %v14388_v45 = vpop.f32.mrf.mxu1 }
 0x2f5   : > { %15070 = vst [vmem:[#allocation7_spill] sm:$0xff] %v14384_v29  ;;  %15071 = vst [vmem:[#allocation8_spill] sm:$0xff] %v14388_v45  ;;  %v14392_v33 = vadd.f32 %v7422_v39, %v7310_v62 }
 0x2f6   : > { %v7426_v2 = vpop.f32.mrf.mxu0  ;;  %v14394_v11 = vpop.f32.mrf.mxu1 }
 0x2f7   : > { %15072 = vst [vmem:[#allocation9_spill] sm:$0xff] %v14392_v33  ;;  %15073 = vst [vmem:[#allocation10_spill] sm:$0xff] %v14394_v11  ;;  %v7427_v22 = vadd.f32 %v7426_v2, %v14218_v36  ;;  %v7104_v36 = vadd.f32 %v14064_v3, %v14060_v21 }
 0x2f8   : > { %v7428_v1 = vpop.f32.mrf.mxu0  ;;  %v7539_v8 = vpop.f32.mrf.mxu1 }
 0x2f9   : > { %v7429_v18 = vadd.f32 %v7428_v1, %v14225_v50  ;;  %v14399_v57 = vadd.f32 %v7539_v8, %v7427_v22  ;;  %v7217_v59 = vadd.f32 %v14258_v63, %v7104_v36 }
 0x2fa   : > { %v7430_v41 = vpop.f32.mrf.mxu0  ;;  %v7541_v10 = vpop.f32.mrf.mxu1 }
 0x2fb   : > { %v14403_v31 = vadd.f32 %v7430_v41, %v14233_v54  ;;  %v14405_v26 = vadd.f32 %v7541_v10, %v7429_v18  ;;  %v7330_v18 = vadd.f32 %v14262_v55, %v7217_v59 }
 0x2fc   : > { %v7432_v62 = vpop.f32.mrf.mxu0  ;;  %v14407_v47 = vpop.f32.mrf.mxu1 }
 0x2fd   : > { %15074 = vst [vmem:[#allocation11_spill] sm:$0xff] %v14403_v31  ;;  %15075 = vst [vmem:[#allocation12_spill] sm:$0xff] %v14407_v47  ;;  %v14411_v12 = vadd.f32 %v7432_v62, %v7320_v48  ;;  %v14571_v31 = vld [vmem:[%s15037_s5 + $0x14] ss:$8 sps:$4 sm:$0xff]  }
 0x2fe   : > { %v7436_v50 = vpop.f32.mrf.mxu0  ;;  %v14413_v39 = vpop.f32.mrf.mxu1  ;;  %15091 = vst [vmem:[#allocation28_spill] sm:$0xff] %v14571_v31 }
 0x2ff   : > { %15076 = vst [vmem:[#allocation13_spill] sm:$0xff] %v14411_v12  ;;  %15077 = vst [vmem:[#allocation14_spill] sm:$0xff] %v14413_v39  ;;  %v7437_v15 = vadd.f32 %v7436_v50, %v14246_v0  ;;  %v7114_v0 = vadd.f32 %v14081_v35, %v14077_v9  ;;  %v14563_v39 = vld [vmem:[%s15037_s5 + $0x20] ss:$8 sps:$4 sm:$0xff]  }
 0x300   : > { %v7438_v2 = vpop.f32.mrf.mxu0  ;;  %v7549_v54 = vpop.f32.mrf.mxu1  ;;  %15090 = vst [vmem:[#allocation27_spill] sm:$0xff] %v14563_v39 }
 0x301   : > { %v7439_v32 = vadd.f32 %v7438_v2, %v14253_v13  ;;  %v14418_v22 = vadd.f32 %v7549_v54, %v7437_v15  ;;  %v7227_v62 = vadd.f32 %v14283_v40, %v7114_v0 }
 0x302   : > { %v7440_v1 = vpop.f32.mrf.mxu0  ;;  %v7551_v8 = vpop.f32.mrf.mxu1 }
 0x303   : > { %v14422_v21 = vadd.f32 %v7440_v1, %v14260_v53  ;;  %v14424_v3 = vadd.f32 %v7551_v8, %v7439_v32  ;;  %v7340_v54 = vadd.f32 %v14287_v17, %v7227_v62 }
 0x304   : > { %v7442_v41 = vpop.f32.mrf.mxu0  ;;  %v14426_v10 = vpop.f32.mrf.mxu1 }
 0x305   : > { %15078 = vst [vmem:[#allocation15_spill] sm:$0xff] %v14422_v21  ;;  %15079 = vst [vmem:[#allocation16_spill] sm:$0xff] %v14426_v10  ;;  %v14430_v63 = vadd.f32 %v7442_v41, %v7330_v18 }
 0x306   : > { %v7446_v13 = vpop.f32.mrf.mxu0  ;;  %v14432_v48 = vpop.f32.mrf.mxu1 }
 0x307   : > { %15080 = vst [vmem:[#allocation17_spill] sm:$0xff] %v14430_v63  ;;  %15081 = vst [vmem:[#allocation18_spill] sm:$0xff] %v14432_v48  ;;  %v7447_v55 = vadd.f32 %v7446_v13, %v14272_v19  ;;  %v14544_v48 = vld [vmem:[%s15037_s5 + $0x30] ss:$8 sps:$4 sm:$0xff]  }
 0x308   : > { %v7448_v36 = vpop.f32.mrf.mxu0  ;;  %v7559_v53 = vpop.f32.mrf.mxu1  ;;  %15088 = vst [vmem:[#allocation25_spill] sm:$0xff] %v14544_v48 }
 0x309   : > { %v7449_v50 = vadd.f32 %v7448_v36, %v14278_v23  ;;  %v14437_v59 = vadd.f32 %v7559_v53, %v7447_v55  ;;  %v14470_v55 = vld [vmem:[%s15037_s5 + $0x70] ss:$8 sps:$4 sm:$0xff]  }
 0x30a   : > { %v7450_v15 = vpop.f32.mrf.mxu0  ;;  %v7561_v2 = vpop.f32.mrf.mxu1 }
 0x30b   : > { %v14441_v9 = vadd.f32 %v7450_v15, %v14285_v37  ;;  %v14443_v35 = vadd.f32 %v7561_v2, %v7449_v50  ;;  %v14487_v50 = vld [vmem:[%s15037_s5 + $0x60] ss:$8 sps:$4 sm:$0xff]  }
 0x30c   : > { %v7452_v32 = vpop.f32.mrf.mxu0  ;;  %v14445_v1 = vpop.f32.mrf.mxu1 }
 0x30d   : > { %15082 = vst [vmem:[#allocation19_spill] sm:$0xff] %v14441_v9  ;;  %15083 = vst [vmem:[#allocation20_spill] sm:$0xff] %v14445_v1  ;;  %v14447_v40 = vadd.f32 %v7452_v32, %v7340_v54  ;;  %v14495_v54 = vld [vmem:[%s15037_s5 + $0x54] ss:$8 sps:$4 sm:$0xff]  }
 0x30e   : > { %v14449_v19 = vpop.f32.mrf.mxu1  ;;  %v7602_v8 = vpop.f32.mrf.mxu0  ;;  %v14533_v9 = vld [vmem:[%s15037_s5 + $0x34] ss:$8 sps:$4 sm:$0xff]  }
 0x30f   : > { %15084 = vst [vmem:[#allocation21_spill] sm:$0xff] %v14447_v40  ;;  %15085 = vst [vmem:[#allocation22_spill] sm:$0xff] %v14449_v19  ;;  %v14452_v23 = vadd.f32 %v7602_v8, %v14297_v56  ;;  %v11286_v56 = vld [vmem:[%s15037_s5 + $0x74] ss:$8 sps:$4 sm:$0xff]   ;;  %v14506_v8 = vld [vmem:[%s15037_s5 + $0x50] ss:$8 sps:$4 sm:$0xff]  }
 0x310   : > { %v7604_v18 = vpop.f32.mrf.mxu0  ;;  %v14454_v41 = vpop.f32.mrf.mxu1  ;;  %8524 = vmatprep.subr.bf16.mxu0 %v11286_v56  ;;  %9849 = vmatprep.subr.bf16.mxu1 %v11286_v56  ;;  %v14525_v19 = vld [vmem:[%s15037_s5 + $0x40] ss:$8 sps:$4 sm:$0xff]   ;;  %15087 = vst [vmem:[#allocation24_spill] sm:$0xff] %v14533_v9 }
 0x311   : > { %v14457_v17 = vadd.f32 %v7604_v18, %v14307_v46  ;;  %v14478_v46 = vld [vmem:[%s15037_s5 + $0x64] ss:$8 sps:$4 sm:$0xff]   ;;  %8525 = vmatpush1.bf16.msra.mxu0 %v14470_v55  ;;  %15086 = vst [vmem:[#allocation23_spill] sm:$0xff] %v14525_v19 }
 0x312   : > { %v14459_v37 = vpop.f32.mrf.mxu0  ;;  %v14461_v0 = vpop.f32.mrf.mxu1  ;;  %8526 = vmatprep.subr.bf16.mxu0 %v14478_v46 }
 0x314   : > { %v14463_v13 = vpop.f32.mrf.mxu0  ;;  %v14465_v62 = vpop.f32.mrf.mxu1 }
 0x315   : > { %8527 = vmatpush1.bf16.msra.mxu0 %v14487_v50 }
 0x316   : > { %v7612_v36 = vpop.f32.mrf.mxu0  ;;  %v14489_v15 = vpop.f32.mrf.mxu1  ;;  %8528 = vmatprep.subr.bf16.mxu0 %v14495_v54 }
 0x317   : > { %v14481_v53 = vadd.f32 %v7612_v36, %v14326_v34 }
 0x318   : > { %v7614_v2 = vpop.f32.mrf.mxu0  ;;  %v14508_v18 = vpop.f32.mrf.mxu1 }
 0x319   : > { %v14498_v34 = vadd.f32 %v7614_v2, %v14333_v43  ;;  %v14516_v43 = vld [vmem:[%s15037_s5 + $0x44] ss:$8 sps:$4 sm:$0xff]   ;;  %8529 = vmatpush1.bf16.msra.mxu0 %v14506_v8 }
 0x31a   : > { %v14500_v32 = vpop.f32.mrf.mxu0  ;;  %v14527_v40 = vpop.f32.mrf.mxu1  ;;  %8530 = vmatprep.subr.bf16.mxu0 %v14516_v43 }
 0x31c   : > { %v14510_v56 = vpop.f32.mrf.mxu0  ;;  %v14546_v63 = vpop.f32.mrf.mxu1 }
 0x31d   : > { %8531 = vmatpush1.bf16.msra.mxu0 %v14525_v19 }
 0x31e   : > { %v7622_v36 = vpop.f32.mrf.mxu0  ;;  %8532 = vmatprep.subr.bf16.mxu0 %v14533_v9  ;;  %v14565_v12 = vpop.f32.mrf.mxu1 }
 0x31f   : > { %v14519_v2 = vadd.f32 %v7622_v36, %v14343_v52 }
 0x320   : > { %v7624_v1 = vpop.f32.mrf.mxu0  ;;  %v14584_v11 = vpop.f32.mrf.mxu1 }
 0x321   : > { %v14536_v52 = vadd.f32 %v7624_v1, %v14350_v60  ;;  %v14554_v60 = vld [vmem:[%s15037_s5 + $0x24] ss:$8 sps:$4 sm:$0xff]   ;;  %8533 = vmatpush1.bf16.msra.mxu0 %v14544_v48  ;;  %v14582_v48 = vld [vmem:[%s15037_s5 + $0x10] ss:$8 sps:$4 sm:$0xff]  }
 0x322   : > { %v14538_v36 = vpop.f32.mrf.mxu0  ;;  %15089 = vst [vmem:[#allocation26_spill] sm:$0xff] %v14554_v60  ;;  %8534 = vmatprep.subr.bf16.mxu0 %v14554_v60  ;;  %15092 = vst [vmem:[#allocation29_spill] sm:$0xff] %v14582_v48  ;;  %v14603_v45 = vpop.f32.mrf.mxu1 }
 0x324   : > { %v14548_v10 = vpop.f32.mrf.mxu0 }
 0x325   : > { %8535 = vmatpush1.bf16.msra.mxu0 %v14563_v39  ;;  %v14601_v39 = vld [vmem:[%s15037_s5] ss:$8 sps:$4 sm:$0xff]  }
 0x326   : > { %v7632_v1 = vpop.f32.mrf.mxu0  ;;  %8536 = vmatprep.subr.bf16.mxu0 %v14571_v31  ;;  %15095 = vst [vmem:[#allocation32_spill] sm:$0xff] %v14601_v39  ;;  %v14609_v31 = vld [vmem:[%s15037_s5 + $0xf4] ss:$8 sps:$4 sm:$0xff]  }
 0x327   : > { %v14557_v21 = vadd.f32 %v7632_v1, %v14360_v44  ;;  %15096 = vst [vmem:[#allocation33_spill] sm:$0xff] %v14609_v31 }
 0x328   : > { %v7634_v47 = vpop.f32.mrf.mxu0 }
 0x329   : > { %v14574_v44 = vadd.f32 %v7634_v47, %v14367_v6  ;;  %v14592_v6 = vld [vmem:[%s15037_s5 + $0x4] ss:$8 sps:$4 sm:$0xff]   ;;  %8537 = vmatpush1.bf16.msra.mxu0 %v14582_v48  ;;  %v14620_v48 = vld [vmem:[%s15037_s5 + $0xf0] ss:$8 sps:$4 sm:$0xff]  }
 0x32a   : > { %v14576_v1 = vpop.f32.mrf.mxu0  ;;  %15093 = vst [vmem:[#allocation30_spill] sm:$0xff] %v14592_v6  ;;  %8538 = vmatprep.subr.bf16.mxu0 %v14592_v6  ;;  %15099 = vst [vmem:[#allocation36_spill] sm:$0xff] %v14620_v48 }
 0x32c   : > { %v14586_v60 = vpop.f32.mrf.mxu0 }
 0x32d   : > { %8539 = vmatpush1.bf16.msra.mxu0 %v14601_v39  ;;  %v14639_v39 = vld [vmem:[%s15037_s5 + $0xe0] ss:$8 sps:$4 sm:$0xff]  }
 0x32e   : > { %v7642_v47 = vpop.f32.mrf.mxu0  ;;  %8540 = vmatprep.subr.bf16.mxu0 %v14609_v31  ;;  %15103 = vst [vmem:[#allocation40_spill] sm:$0xff] %v14639_v39  ;;  %v14647_v31 = vld [vmem:[%s15037_s5 + $0xd4] ss:$8 sps:$4 sm:$0xff]  }
 0x32f   : > { %v14595_v33 = vadd.f32 %v7642_v47, %v14380_v27  ;;  %15104 = vst [vmem:[#allocation41_spill] sm:$0xff] %v14647_v31 }
 0x330   : > { %v7644_v29 = vpop.f32.mrf.mxu0 }
 0x331   : > { %15094 = vst [vmem:[#allocation31_spill] sm:$0xff] %v14595_v33  ;;  %v14612_v27 = vadd.f32 %v7644_v29, %v14386_v4  ;;  %v14622_v33 = vpop.f32.mrf.mxu1  ;;  %v14630_v29 = vld [vmem:[%s15037_s5 + $0xe4] ss:$8 sps:$4 sm:$0xff]   ;;  %8541 = vmatpush2.bf16.msra.mxu0 %v14620_v48  ;;  %v14658_v48 = vld [vmem:[%s15037_s5 + $0xd0] ss:$8 sps:$4 sm:$0xff]  }
 0x332   : > { %v14614_v47 = vpop.f32.mrf.mxu0  ;;  %15101 = vst [vmem:[#allocation38_spill] sm:$0xff] %v14630_v29  ;;  %8542 = vmatprep.subr.bf16.mxu0 %v14630_v29  ;;  %15107 = vst [vmem:[#allocation44_spill] sm:$0xff] %v14658_v48 }
 0x333   : > { %15097 = vst [vmem:[#allocation34_spill] sm:$0xff] %v14612_v27  ;;  %15098 = vst [vmem:[#allocation35_spill] sm:$0xff] %v14614_v47  ;;  %v14641_v47 = vpop.f32.mrf.mxu1 }
 0x334   : > { %v14624_v6 = vpop.f32.mrf.mxu0 }
 0x335   : > { %15100 = vst [vmem:[#allocation37_spill] sm:$0xff] %v14624_v6  ;;  %8543 = vmatpush2.bf16.msra.mxu0 %v14639_v39  ;;  %v14677_v39 = vld [vmem:[%s15037_s5 + $0xc0] ss:$8 sps:$4 sm:$0xff]  }
 0x336   : > { %v7652_v4 = vpop.f32.mrf.mxu0  ;;  %8544 = vmatprep.subr.bf16.mxu0 %v14647_v31  ;;  %15111 = vst [vmem:[#allocation48_spill] sm:$0xff] %v14677_v39  ;;  %v14685_v31 = vld [vmem:[%s15037_s5 + $0xb4] ss:$8 sps:$4 sm:$0xff]  }
 0x337   : > { %v14633_v27 = vadd.f32 %v7652_v4, %v14399_v57  ;;  %15112 = vst [vmem:[#allocation49_spill] sm:$0xff] %v14685_v31 }
 0x338   : > { %v7654_v6 = vpop.f32.mrf.mxu0 }
 0x339   : > { %15102 = vst [vmem:[#allocation39_spill] sm:$0xff] %v14633_v27  ;;  %v14650_v57 = vadd.f32 %v7654_v6, %v14405_v26  ;;  %v14660_v27 = vpop.f32.mrf.mxu1  ;;  %v14668_v26 = vld [vmem:[%s15037_s5 + $0xc4] ss:$8 sps:$4 sm:$0xff]   ;;  %8545 = vmatpush2.bf16.msra.mxu0 %v14658_v48  ;;  %v14696_v48 = vld [vmem:[%s15037_s5 + $0xb0] ss:$8 sps:$4 sm:$0xff]  }
 0x33a   : > { %v14652_v4 = vpop.f32.mrf.mxu0  ;;  %15109 = vst [vmem:[#allocation46_spill] sm:$0xff] %v14668_v26  ;;  %8546 = vmatprep.subr.bf16.mxu0 %v14668_v26  ;;  %15115 = vst [vmem:[#allocation52_spill] sm:$0xff] %v14696_v48 }
 0x33b   : > { %15105 = vst [vmem:[#allocation42_spill] sm:$0xff] %v14650_v57  ;;  %15106 = vst [vmem:[#allocation43_spill] sm:$0xff] %v14652_v4  ;;  %v14679_v4 = vpop.f32.mrf.mxu1 }
 0x33c   : > { %v14662_v29 = vpop.f32.mrf.mxu0 }
 0x33d   : > { %15108 = vst [vmem:[#allocation45_spill] sm:$0xff] %v14662_v29  ;;  %8547 = vmatpush2.bf16.msra.mxu0 %v14677_v39 }
 0x33e   : > { %v7662_v6 = vpop.f32.mrf.mxu0  ;;  %8548 = vmatprep.subr.bf16.mxu0 %v14685_v31 }
 0x33f   : > { %v14671_v57 = vadd.f32 %v7662_v6, %v14418_v22 }
 0x340   : > { %v7664_v29 = vpop.f32.mrf.mxu0 }
 0x341   : > { %15110 = vst [vmem:[#allocation47_spill] sm:$0xff] %v14671_v57  ;;  %v14688_v22 = vadd.f32 %v7664_v29, %v14424_v3  ;;  %v14698_v57 = vpop.f32.mrf.mxu1  ;;  %8549 = vmatpush2.bf16.msra.mxu0 %v14696_v48 }
 0x342   : > { %v14690_v6 = vpop.f32.mrf.mxu0 }
 0x343   : > { %15113 = vst [vmem:[#allocation50_spill] sm:$0xff] %v14688_v22  ;;  %15114 = vst [vmem:[#allocation51_spill] sm:$0xff] %v14690_v6  ;;  %v14707_v3 = vpop.f32.mrf.mxu1  ;;  %v7494_v6 = vadd.f32 %v14312_v24, %v14305_v25  ;;  %v7718_v25 = vadd.f32 %v14461_v0, %v14457_v17 }
 0x344   : > { %v14700_v26 = vpop.f32.mrf.mxu0 }
 0x345   : > { %15116 = vst [vmem:[#allocation53_spill] sm:$0xff] %v14700_v26  ;;  %v14716_v26 = vpop.f32.mrf.mxu1 }
 0x346   : > { %v7672_v9 = vpop.f32.mrf.mxu0 }
 0x347   : > { %v14704_v19 = vadd.f32 %v7672_v9, %v14437_v59  ;;  %v7496_v59 = vadd.f32 %v14316_v16, %v14314_v7  ;;  %v7607_v9 = vadd.f32 %v14459_v37, %v7494_v6  ;;  %v7504_v7 = vadd.f32 %v14335_v30, %v14331_v51 }
 0x348   : > { %v7674_v29 = vpop.f32.mrf.mxu0 }
 0x349   : > { %15117 = vst [vmem:[#allocation54_spill] sm:$0xff] %v14704_v19  ;;  %v14710_v39 = vadd.f32 %v7674_v29, %v14443_v35  ;;  %v7716_v19 = vadd.f32 %v14454_v41, %v14452_v23  ;;  %v7609_v35 = vadd.f32 %v14463_v13, %v7496_v59  ;;  %v14726_v29 = vpop.f32.mrf.mxu1  ;;  %v7720_v24 = vadd.f32 %v14465_v62, %v7607_v9 }
 0x34a   : > { %v14712_v22 = vpop.f32.mrf.mxu0  ;;  %v7506_v23 = vadd.f32 %v14339_v49, %v14337_v38  ;;  %v7617_v59 = vadd.f32 %v14500_v32, %v7504_v7  ;;  %v7728_v49 = vadd.f32 %v14527_v40, %v14498_v34 }
 0x34b   : > { %15118 = vst [vmem:[#allocation55_spill] sm:$0xff] %v14710_v39  ;;  %15119 = vst [vmem:[#allocation56_spill] sm:$0xff] %v14712_v22  ;;  %v7722_v16 = vadd.f32 %v14489_v15, %v7609_v35  ;;  %v14736_v41 = vpop.f32.mrf.mxu1 }
 0x34c   : > { %v14718_v31 = vpop.f32.mrf.mxu0  ;;  %v7619_v30 = vadd.f32 %v14510_v56, %v7506_v23  ;;  %v7730_v32 = vadd.f32 %v14546_v63, %v7617_v59 }
 0x34d   : > { %15120 = vst [vmem:[#allocation57_spill] sm:$0xff] %v14718_v31 }
 0x34e   : > { %v7828_v48 = vpop.f32.mrf.mxu0 }
 0x34f   : > { %v7829_v31 = vadd.f32 %v7828_v48, %v7716_v19  ;;  %v7726_v48 = vadd.f32 %v14508_v18, %v14481_v53  ;;  %v7514_v53 = vadd.f32 %v14352_v61, %v14348_v14  ;;  %v7732_v18 = vadd.f32 %v14565_v12, %v7619_v30 }
 0x350   : > { %v7830_v39 = vpop.f32.mrf.mxu0  ;;  %v7736_v14 = vadd.f32 %v14584_v11, %v14519_v2 }
 0x351   : > { %v7831_v37 = vadd.f32 %v7830_v39, %v7718_v25  ;;  %v7907_v17 = vmax.f32 %v7829_v31, 0.0  ;;  %v7627_v63 = vadd.f32 %v14538_v36, %v7514_v53  ;;  %v7738_v36 = vadd.f32 %v14603_v45, %v14536_v52 }
 0x352   : > { %v7832_v22 = vpop.f32.mrf.mxu0  ;;  %v7526_v45 = vadd.f32 %v14375_v28, %v14373_v5 }
 0x353   : > { %v7833_v6 = vadd.f32 %v7832_v22, %v7720_v24  ;;  %v7908_v51 = vmax.f32 %v7831_v37, 0.0  ;;  %v14742_v22 = vpop.f32.mrf.mxu1  ;;  %v7516_v24 = vadd.f32 %v14356_v42, %v14354_v20  ;;  %v7740_v59 = vadd.f32 %v14622_v33, %v7627_v63 }
 0x354   : > { %v7834_v13 = vpop.f32.mrf.mxu0  ;;  %v7639_v30 = vadd.f32 %v14586_v60, %v7526_v45  ;;  %v15125_v60 = vld [vmem:[#allocation8_spill] sm:$0xff] }
 0x355   : > { %v7909_v0 = vmax.f32 %v7833_v6, 0.0  ;;  %v7835_v62 = vadd.f32 %v7834_v13, %v7722_v16  ;;  %v14752_v7 = vpop.f32.mrf.mxu1  ;;  %v7629_v12 = vadd.f32 %v14548_v10, %v7516_v24  ;;  %v15121_v10 = vld [vmem:[#allocation6_spill] sm:$0xff]  ;;  %v15137_v45 = vld [vmem:[#allocation12_spill] sm:$0xff] }
 0x356   : > { %v7838_v19 = vpop.f32.mrf.mxu0 }
 0x357   : > { %v7939_v39 = vpack.c.bf16 %v7909_v0, %v7907_v17  ;;  %v7910_v15 = vmax.f32 %v7835_v62, 0.0  ;;  %v7839_v9 = vadd.f32 %v7838_v19, %v7726_v48  ;;  %v14760_v23 = vpop.f32.mrf.mxu1  ;;  %v7742_v2 = vadd.f32 %v14641_v47, %v7629_v12  ;;  %v15132_v12 = vld [vmem:[#allocation37_spill] sm:$0xff] }
 0x358   : > { %v7840_v38 = vpop.f32.mrf.mxu0 }
 0x359   : > { %v7940_v31 = vpack.c.bf16 %v7910_v15, %v7908_v51  ;;  %v7841_v56 = vadd.f32 %v7840_v38, %v7728_v49  ;;  %v7911_v40 = vmax.f32 %v7839_v9, 0.0  ;;  %v14772_v52 = vpop.f32.mrf.mxu1  ;;  %v7752_v9 = vadd.f32 %v14707_v3, %v7639_v30  ;;  %v15140_v30 = vld [vmem:[#allocation43_spill] sm:$0xff] }
 0x35a   : > { %v7842_v35 = vpop.f32.mrf.mxu0 }
 0x35b   : > { %v7843_v25 = vadd.f32 %v7842_v35, %v7730_v32  ;;  %8191 = vmatprep.mubr.bf16.mxu1 %v7940_v31  ;;  %v7912_v42 = vmax.f32 %v7841_v56, 0.0  ;;  %v15122_v32 = vld [vmem:[#allocation23_spill] sm:$0xff]  ;;  %v15127_v56 = vld [vmem:[#allocation10_spill] sm:$0xff] }
 0x35c   : > { %v7844_v16 = vpop.f32.mrf.mxu0  ;;  %8192 = vmatmul.mubr.bf16.vlgmr.msra.gmra.mxu1 %v7939_v39  ;;  %v14780_v39 = vpop.f32.mrf.mxu1 }
 0x35d   : > { %v7913_v34 = vmax.f32 %v7843_v25, 0.0  ;;  %v7845_v37 = vadd.f32 %v7844_v16, %v7732_v18  ;;  %9865 = vmatpush1.bf16.msra.mxu1 %v14470_v55  ;;  %v15126_v18 = vld [vmem:[#allocation9_spill] sm:$0xff]  ;;  %v15128_v25 = vld [vmem:[#allocation35_spill] sm:$0xff] }
 0x35e   : > { %v7848_v61 = vpop.f32.mrf.mxu0  ;;  %9850 = vmatprep.subr.bf16.mxu1 %v14478_v46  ;;  %v7524_v46 = vadd.f32 %v15121_v10, %v14365_v58  ;;  %v7746_v58 = vadd.f32 %v14660_v27, %v14557_v21  ;;  %v15123_v27 = vld [vmem:[#allocation24_spill] sm:$0xff] }
 0x35f   : > { %v7941_v20 = vpack.c.bf16 %v7913_v34, %v7911_v40  ;;  %v7914_v6 = vmax.f32 %v7845_v37, 0.0  ;;  %v7849_v17 = vadd.f32 %v7848_v61, %v7736_v14  ;;  %v15129_v34 = vld [vmem:[#allocation25_spill] sm:$0xff]  ;;  %v15130_v37 = vld [vmem:[#allocation31_spill] sm:$0xff]  ;;  %v15131_v61 = vld [vmem:[#allocation26_spill] sm:$0xff] }
 0x360   : > { %v7850_v13 = vpop.f32.mrf.mxu0  ;;  %v7756_v3 = vadd.f32 %v14716_v26, %v15130_v37 }
 0x361   : > { %v7942_v55 = vpack.c.bf16 %v7914_v6, %v7912_v42  ;;  %9866 = vmatpush1.bf16.msra.mxu1 %v14487_v50  ;;  %v7851_v0 = vadd.f32 %v7850_v13, %v7738_v36  ;;  %v7637_v50 = vadd.f32 %v14576_v1, %v7524_v46  ;;  %v7915_v48 = vmax.f32 %v7849_v17, 0.0 }
 0x362   : > { %v7852_v11 = vpop.f32.mrf.mxu0  ;;  %9851 = vmatprep.subr.bf16.mxu1 %v14495_v54  ;;  %v7748_v1 = vadd.f32 %v14679_v4, %v14574_v44  ;;  %v7536_v44 = vadd.f32 %v15127_v56, %v15126_v18  ;;  %v14792_v4 = vpop.f32.mrf.mxu1 }
 0x363   : > { %v7853_v62 = vadd.f32 %v7852_v11, %v7740_v59  ;;  %8201 = vmatprep.mubr.bf16.mxu1 %v7942_v55  ;;  %v7916_v5 = vmax.f32 %v7851_v0, 0.0  ;;  %v7750_v38 = vadd.f32 %v14698_v57, %v7637_v50  ;;  %v15133_v55 = vld [vmem:[#allocation34_spill] sm:$0xff]  ;;  %v15135_v0 = vld [vmem:[#allocation28_spill] sm:$0xff] }
 0x364   : > { %v7854_v33 = vpop.f32.mrf.mxu0  ;;  %8202 = vmatmul.mubr.bf16.gmra.mxu1 %v7941_v20  ;;  %v7649_v42 = vadd.f32 %v15132_v12, %v7536_v44  ;;  %v7777_v36 = vpop.f32.mrf.mxu1  ;;  %v7758_v17 = vadd.f32 %v14726_v29, %v15133_v55  ;;  %v15152_v12 = vld [vmem:[#allocation51_spill] sm:$0xff] }
 0x365   : > { %v7917_v19 = vmax.f32 %v7853_v62, 0.0  ;;  %v7855_v54 = vadd.f32 %v7854_v33, %v7742_v2  ;;  %9867 = vmatpush1.bf16.msra.mxu1 %v14506_v8  ;;  %v15134_v2 = vld [vmem:[#allocation27_spill] sm:$0xff] }
 0x366   : > { %v7858_v47 = vpop.f32.mrf.mxu0  ;;  %9852 = vmatprep.subr.bf16.mxu1 %v14516_v43  ;;  %v15124_v43 = vld [vmem:[#allocation7_spill] sm:$0xff]  ;;  %v7762_v50 = vadd.f32 %v14742_v22, %v7649_v42 }
 0x367   : > { %v7943_v28 = vpack.c.bf16 %v7917_v19, %v7915_v48  ;;  %v7918_v51 = vmax.f32 %v7855_v54, 0.0  ;;  %v7859_v49 = vadd.f32 %v7858_v47, %v7746_v58  ;;  %v7534_v31 = vadd.f32 %v15125_v60, %v15124_v43  ;;  %v15136_v62 = vld [vmem:[#allocation11_spill] sm:$0xff]  ;;  %v15138_v54 = vld [vmem:[#allocation13_spill] sm:$0xff]  ;;  %v15139_v58 = vld [vmem:[#allocation14_spill] sm:$0xff]  ;;  %v7779_v47 = vpop.f32.mrf.mxu1 }
 0x368   : > { %v7860_v15 = vpop.f32.mrf.mxu0  ;;  %v7544_v33 = vadd.f32 %v15137_v45, %v15136_v62  ;;  %v7546_v29 = vadd.f32 %v15139_v58, %v15138_v54  ;;  %v15154_v55 = vld [vmem:[#allocation47_spill] sm:$0xff]  ;;  %v15158_v58 = vld [vmem:[#allocation40_spill] sm:$0xff] }
 0x369   : > { %v7944_v8 = vpack.c.bf16 %v7918_v51, %v7916_v5  ;;  %9868 = vmatpush1.bf16.msra.mxu1 %v15122_v32  ;;  %v7861_v35 = vadd.f32 %v7860_v15, %v7748_v1  ;;  %v7647_v24 = vadd.f32 %v15128_v25, %v7534_v31  ;;  %v7919_v16 = vmax.f32 %v7859_v49, 0.0  ;;  %v15141_v1 = vld [vmem:[#allocation29_spill] sm:$0xff]  ;;  %v15143_v49 = vld [vmem:[#allocation30_spill] sm:$0xff]  ;;  %v7781_v31 = vpop.f32.mrf.mxu1 }
 0x36a   : > { %v7862_v21 = vpop.f32.mrf.mxu0  ;;  %9853 = vmatprep.subr.bf16.mxu1 %v15123_v27  ;;  %v7657_v5 = vadd.f32 %v15140_v30, %v7544_v33  ;;  %v15144_v32 = vld [vmem:[#allocation45_spill] sm:$0xff]  ;;  %v15157_v33 = vld [vmem:[#allocation50_spill] sm:$0xff]  ;;  %v15161_v30 = vld [vmem:[#allocation20_spill] sm:$0xff] }
 0x36b   : > { %v7863_v53 = vadd.f32 %v7862_v21, %v7750_v38  ;;  %8211 = vmatprep.mubr.bf16.mxu1 %v7944_v8  ;;  %v7920_v20 = vmax.f32 %v7861_v35, 0.0  ;;  %v7760_v11 = vadd.f32 %v14736_v41, %v7647_v24  ;;  %v15142_v38 = vld [vmem:[#allocation39_spill] sm:$0xff]  ;;  %v7659_v21 = vadd.f32 %v15144_v32, %v7546_v29  ;;  %v15145_v35 = vld [vmem:[#allocation42_spill] sm:$0xff]  ;;  %v15147_v25 = vld [vmem:[#allocation33_spill] sm:$0xff] }
 0x36c   : > { %v7864_v57 = vpop.f32.mrf.mxu0  ;;  %8212 = vmatmul.mubr.bf16.gmra.mxu1 %v7943_v28  ;;  %v7766_v8 = vadd.f32 %v14752_v7, %v15142_v38  ;;  %v7770_v18 = vadd.f32 %v14772_v52, %v7657_v5  ;;  %v15148_v24 = vld [vmem:[#allocation15_spill] sm:$0xff]  ;;  %v15163_v38 = vld [vmem:[#allocation22_spill] sm:$0xff] }
 0x36d   : > { %v7921_v63 = vmax.f32 %v7863_v53, 0.0  ;;  %v7865_v40 = vadd.f32 %v7864_v57, %v7752_v9  ;;  %9869 = vmatpush1.bf16.msra.mxu1 %v15129_v34  ;;  %v7768_v53 = vadd.f32 %v14760_v23, %v15145_v35  ;;  %v15146_v57 = vld [vmem:[#allocation32_spill] sm:$0xff] }
 0x36e   : > { %v7868_v14 = vpop.f32.mrf.mxu0  ;;  %9854 = vmatprep.subr.bf16.mxu1 %v15131_v61  ;;  %v7785_v61 = vpop.f32.mrf.mxu1 }
 0x36f   : > { %v7945_v6 = vpack.c.bf16 %v7921_v63, %v7919_v16  ;;  %v7922_v13 = vmax.f32 %v7865_v40, 0.0  ;;  %v7869_v46 = vadd.f32 %v7868_v14, %v7756_v3  ;;  %v15149_v16 = vld [vmem:[#allocation16_spill] sm:$0xff]  ;;  %v7772_v40 = vadd.f32 %v14780_v39, %v7659_v21  ;;  %v15150_v3 = vld [vmem:[#allocation17_spill] sm:$0xff]  ;;  %v15151_v14 = vld [vmem:[#allocation18_spill] sm:$0xff] }
 0x370   : > { %v7870_v59 = vpop.f32.mrf.mxu0  ;;  %v7554_v63 = vadd.f32 %v15149_v16, %v15148_v24  ;;  %v7556_v23 = vadd.f32 %v15151_v14, %v15150_v3  ;;  %v7787_v62 = vpop.f32.mrf.mxu1  ;;  %v15169_v24 = vld [vmem:[#allocation55_spill] sm:$0xff]  ;;  %v15171_v14 = vld [vmem:[#allocation49_spill] sm:$0xff] }
 0x371   : > { %v7946_v10 = vpack.c.bf16 %v7922_v13, %v7920_v20  ;;  %9870 = vmatpush1.bf16.msra.mxu1 %v15134_v2  ;;  %v7871_v48 = vadd.f32 %v7870_v59, %v7758_v17  ;;  %v7923_v28 = vmax.f32 %v7869_v46, 0.0  ;;  %v15153_v59 = vld [vmem:[#allocation36_spill] sm:$0xff]  ;;  %v7776_v17 = vadd.f32 %v14792_v4, %v15154_v55  ;;  %v15160_v4 = vld [vmem:[#allocation19_spill] sm:$0xff] }
 0x372   : > { %v7872_v26 = vpop.f32.mrf.mxu0  ;;  %9855 = vmatprep.subr.bf16.mxu1 %v15135_v0  ;;  %v7667_v42 = vadd.f32 %v15152_v12, %v7554_v63  ;;  %v7564_v5 = vadd.f32 %v15161_v30, %v15160_v4  ;;  %v7788_v16 = vadd.f32 %v7787_v62, %v15169_v24  ;;  %v7987_v62 = vld [vmem:[%s15036_s4] sm:$0x3] }
 0x373   : > { %v7873_v19 = vadd.f32 %v7872_v26, %v7760_v11  ;;  %8221 = vmatprep.mubr.bf16.mxu1 %v7946_v10  ;;  %v7924_v27 = vmax.f32 %v7871_v48, 0.0  ;;  %v15155_v11 = vld [vmem:[#allocation38_spill] sm:$0xff]  ;;  %v15156_v10 = vld [vmem:[#allocation53_spill] sm:$0xff] }
 0x374   : > { %v7874_v41 = vpop.f32.mrf.mxu0  ;;  %8222 = vmatmul.mubr.bf16.gmra.mxu1 %v7945_v6  ;;  %v7669_v46 = vadd.f32 %v15156_v10, %v7556_v23  ;;  %v7780_v48 = vadd.f32 %v7779_v47, %v7667_v42  ;;  %v15164_v47 = vld [vmem:[#allocation56_spill] sm:$0xff] }
 0x375   : > { %v7925_v51 = vmax.f32 %v7873_v19, 0.0  ;;  %v7875_v15 = vadd.f32 %v7874_v41, %v7762_v50  ;;  %9871 = vmatpush1.bf16.msra.mxu1 %v15141_v1  ;;  %v7778_v50 = vadd.f32 %v7777_v36, %v15157_v33  ;;  %v15159_v41 = vld [vmem:[#allocation41_spill] sm:$0xff]  ;;  %v11323_v10 = vld [vmem:[%s15037_s5 + $0xa0] ss:$8 sps:$4 sm:$0xff]  }
 0x376   : > { %v7878_v22 = vpop.f32.mrf.mxu0  ;;  %9856 = vmatprep.subr.bf16.mxu1 %v15143_v49  ;;  %v15162_v1 = vld [vmem:[#allocation21_spill] sm:$0xff]  ;;  %v7677_v49 = vadd.f32 %v15164_v47, %v7564_v5 }
 0x377   : > { %v7947_v43 = vpack.c.bf16 %v7925_v51, %v7923_v28  ;;  %v7926_v60 = vmax.f32 %v7875_v15, 0.0  ;;  %v7879_v44 = vadd.f32 %v7878_v22, %v7766_v8  ;;  %v7782_v28 = vadd.f32 %v7781_v31, %v7669_v46  ;;  %v7789_v22 = vpop.f32.mrf.mxu1  ;;  %v15167_v31 = vld [vmem:[#allocation46_spill] sm:$0xff]  ;;  %v15173_v33 = vld [vmem:[#allocation5_spill] sm:$0xff] }
 0x378   : > { %v7880_v9 = vpop.f32.mrf.mxu0  ;;  %v7566_v8 = vadd.f32 %v15163_v38, %v15162_v1  ;;  %v7790_v63 = vadd.f32 %v7789_v22, %v7677_v49  ;;  %v11328_v46 = vld [vmem:[%s15037_s5 + $0x94] ss:$8 sps:$4 sm:$0xff]  }
 0x379   : > { %v7948_v56 = vpack.c.bf16 %v7926_v60, %v7924_v27  ;;  %9872 = vmatpush1.bf16.msra.mxu1 %v15146_v57  ;;  %v7881_v34 = vadd.f32 %v7880_v9, %v7768_v53  ;;  %v7927_v20 = vmax.f32 %v7879_v44, 0.0  ;;  %v15166_v60 = vld [vmem:[#allocation54_spill] sm:$0xff]  ;;  %v15168_v53 = vld [vmem:[#allocation57_spill] sm:$0xff] }
 0x37a   : > { %v7882_v7 = vpop.f32.mrf.mxu0  ;;  %9857 = vmatprep.subr.bf16.mxu1 %v15147_v25  ;;  %v7786_v9 = vadd.f32 %v7785_v61, %v15166_v60 }
 0x37b   : > { %v7883_v37 = vadd.f32 %v7882_v7, %v7770_v18  ;;  %8231 = vmatprep.mubr.bf16.mxu1 %v7948_v56  ;;  %v7928_v2 = vmax.f32 %v7881_v34, 0.0  ;;  %v7679_v18 = vadd.f32 %v15168_v53, %v7566_v8  ;;  %v7791_v7 = vpop.f32.mrf.mxu1 }
 0x37c   : > { %v7884_v52 = vpop.f32.mrf.mxu0  ;;  %8232 = vmatmul.mubr.bf16.gmra.mxu1 %v7947_v43  ;;  %v15165_v43 = vld [vmem:[#allocation44_spill] sm:$0xff] }
 0x37d   : > { %v7929_v6 = vmax.f32 %v7883_v37, 0.0  ;;  %v7885_v13 = vadd.f32 %v7884_v52, %v7772_v40  ;;  %9873 = vmatpush2.bf16.msra.mxu1 %v15153_v59  ;;  %v15170_v37 = vld [vmem:[#allocation48_spill] sm:$0xff]  ;;  %v7792_v23 = vadd.f32 %v7791_v7, %v7679_v18 }
 0x37e   : > { %v7888_v39 = vpop.f32.mrf.mxu0  ;;  %9858 = vmatprep.subr.bf16.mxu1 %v15155_v11  ;;  %v11325_v11 = vld [vmem:[%s15037_s5 + $0xa4] ss:$8 sps:$4 sm:$0xff]  }
 0x37f   : > { %v7949_v26 = vpack.c.bf16 %v7929_v6, %v7927_v20  ;;  %v7930_v0 = vmax.f32 %v7885_v13, 0.0  ;;  %v7889_v54 = vadd.f32 %v7888_v39, %v7776_v17  ;;  %v15172_v13 = vld [vmem:[#allocation52_spill] sm:$0xff]  ;;  %8550 = vmatprep.subr.bf16.mxu0 %v11325_v11 }
 0x380   : > { %v7890_v45 = vpop.f32.mrf.mxu0  ;;  %8551 = vmatpush2.bf16.msra.mxu0 %v11323_v10 }
 0x381   : > { %v7950_v19 = vpack.c.bf16 %v7930_v0, %v7928_v2  ;;  %9874 = vmatpush2.bf16.msra.mxu1 %v15158_v58  ;;  %v7891_v51 = vadd.f32 %v7890_v45, %v7778_v50  ;;  %v7931_v32 = vmax.f32 %v7889_v54, 0.0  ;;  %v11326_v2 = vld [vmem:[%s15037_s5 + $0x90] ss:$8 sps:$4 sm:$0xff]   ;;  %8552 = vmatprep.subr.bf16.mxu0 %v11328_v46  ;;  %v11329_v0 = vld [vmem:[%s15037_s5 + $0x80] ss:$8 sps:$4 sm:$0xff]   ;;  %v14870_v50 = vrot.slane %v7987_v62, %v15173_v33 }
 0x382   : > { %v7892_v29 = vpop.f32.mrf.mxu0  ;;  %9859 = vmatprep.subr.bf16.mxu1 %v15159_v41 }
 0x383   : > { %v7893_v15 = vadd.f32 %v7892_v29, %v7780_v48  ;;  %8241 = vmatprep.mubr.bf16.mxu1 %v7950_v19  ;;  %v7932_v56 = vmax.f32 %v7891_v51, 0.0  ;;  %v15174_v48 = vld [vmem:[#allocation4_spill] sm:$0xff] }
 0x384   : > { %v7894_v36 = vpop.f32.mrf.mxu0  ;;  %8242 = vmatmul.mubr.bf16.gmra.mxu1 %v7949_v26  ;;  %8553 = vmatpush2.bf16.msra.mxu0 %v11326_v2  ;;  %v11331_v26 = vld [vmem:[%s15037_s5 + $0x84] ss:$8 sps:$4 sm:$0xff]   ;;  %v14873_v19 = vrot.slane %v7987_v62, %v15174_v48 }
 0x385   : > { %v7933_v21 = vmax.f32 %v7893_v15, 0.0  ;;  %v7895_v27 = vadd.f32 %v7894_v36, %v7782_v28  ;;  %9875 = vmatpush2.bf16.msra.mxu1 %v15165_v43  ;;  %8554 = vmatprep.subr.bf16.mxu0 %v11331_v26 }
 0x386   : > { %v7898_v35 = vpop.f32.mrf.mxu0  ;;  %9860 = vmatprep.subr.bf16.mxu1 %v15167_v31 }
 0x387   : > { %v7951_v44 = vpack.c.bf16 %v7933_v21, %v7931_v32  ;;  %v7934_v57 = vmax.f32 %v7895_v27, 0.0  ;;  %v7899_v34 = vadd.f32 %v7898_v35, %v7786_v9 }
 0x388   : > { %v7900_v25 = vpop.f32.mrf.mxu0  ;;  %8555 = vmatpush2.bf16.msra.mxu0 %v11329_v0 }
 0x389   : > { %v7952_v40 = vpack.c.bf16 %v7934_v57, %v7932_v56  ;;  %9876 = vmatpush2.bf16.msra.mxu1 %v15170_v37  ;;  %v7901_v61 = vadd.f32 %v7900_v25, %v7788_v16  ;;  %v7935_v42 = vmax.f32 %v7899_v34, 0.0 }
 0x38a   : > { %v7902_v3 = vpop.f32.mrf.mxu0  ;;  %9861 = vmatprep.subr.bf16.mxu1 %v15171_v14 }
 0x38b   : > { %v7903_v52 = vadd.f32 %v7902_v3, %v7790_v63  ;;  %8251 = vmatprep.mubr.bf16.mxu1 %v7952_v40  ;;  %v7936_v59 = vmax.f32 %v7901_v61, 0.0 }
 0x38c   : > { %v7904_v12 = vpop.f32.mrf.mxu0  ;;  %8252 = vmatmul.mubr.bf16.gmra.mxu1 %v7951_v44 }
 0x38d   : > { %v7937_v20 = vmax.f32 %v7903_v52, 0.0  ;;  %v7905_v6 = vadd.f32 %v7904_v12, %v7792_v23  ;;  %9877 = vmatpush2.bf16.msra.mxu1 %v15172_v13 }
 0x38e   : > { %9862 = vmatprep.subr.bf16.mxu1 %v11325_v11 }
 0x38f   : > { %v7953_v55 = vpack.c.bf16 %v7937_v20, %v7935_v42  ;;  %v7938_v17 = vmax.f32 %v7905_v6, 0.0 }
 0x391   : > { %v7954_v39 = vpack.c.bf16 %v7938_v17, %v7936_v59  ;;  %9878 = vmatpush2.bf16.msra.mxu1 %v11323_v10 }
 0x392   : > { %9863 = vmatprep.subr.bf16.mxu1 %v11328_v46 }
 0x393   : > { %8261 = vmatprep.mubr.bf16.mxu1 %v7954_v39 }
 0x394   : > { %8262 = vmatmul.mubr.bf16.gmra.mxu1 %v7953_v55 }
 0x395   : > { %9879 = vmatpush2.bf16.msra.mxu1 %v11326_v2 }
 0x396   : > { %9864 = vmatprep.subr.bf16.mxu1 %v11331_v26 }
 0x399   : > { %9880 = vmatpush2.bf16.msra.mxu1 %v11329_v0 }
 0x41c   : > { %v8193_v45 = vpop.f32.mrf.mxu1 }
 0x41d   : > { %v8194_v4 = vadd.f32 %v8193_v45, %v14873_v19 }
 0x41e   : > { %v8195_v54 = vpop.f32.mrf.mxu1 }
 0x41f   : > { %v8196_v29 = vadd.f32 %v8195_v54, %v14870_v50  ;;  %v8272_v38 = vmax.f32 %v8194_v4, 0.0 }
 0x420   : > { %v8197_v58 = vpop.f32.mrf.mxu1 }
 0x421   : > { %v8198_v41 = vadd.f32 %v8197_v58, %v14873_v19  ;;  %v8273_v15 = vmax.f32 %v8196_v29, 0.0 }
 0x422   : > { %v8199_v30 = vpop.f32.mrf.mxu1 }
 0x423   : > { %v8200_v5 = vadd.f32 %v8199_v30, %v14870_v50  ;;  %v8274_v28 = vmax.f32 %v8198_v41, 0.0 }
 0x424   : > { %v8203_v51 = vpop.f32.mrf.mxu1 }
 0x425   : > { %v8275_v1 = vmax.f32 %v8200_v5, 0.0  ;;  %v8304_v36 = vpack.c.bf16 %v8274_v28, %v8272_v38  ;;  %v8204_v21 = vadd.f32 %v8203_v51, %v14873_v19 }
 0x426   : > { %v8205_v8 = vpop.f32.mrf.mxu1 }
 0x427   : > { %v8305_v22 = vpack.c.bf16 %v8275_v1, %v8273_v15  ;;  %v8206_v49 = vadd.f32 %v8205_v8, %v14870_v50  ;;  %v8276_v53 = vmax.f32 %v8204_v21, 0.0 }
 0x428   : > { %v8207_v47 = vpop.f32.mrf.mxu1 }
 0x429   : > { %v8208_v32 = vadd.f32 %v8207_v47, %v14873_v19  ;;  %8556 = vmatprep.mubr.bf16.mxu0 %v8305_v22  ;;  %v8277_v35 = vmax.f32 %v8206_v49, 0.0 }
 0x42a   : > { %v8209_v27 = vpop.f32.mrf.mxu1  ;;  %8557 = vmatmul.mubr.bf16.vlgmr.msra.gmra.mxu0 %v8304_v36 }
 0x42b   : > { %v8210_v43 = vadd.f32 %v8209_v27, %v14870_v50  ;;  %v8278_v60 = vmax.f32 %v8208_v32, 0.0 }
 0x42c   : > { %v8213_v9 = vpop.f32.mrf.mxu1 }
 0x42d   : > { %v8279_v31 = vmax.f32 %v8210_v43, 0.0  ;;  %v8306_v44 = vpack.c.bf16 %v8278_v60, %v8276_v53  ;;  %v8214_v24 = vadd.f32 %v8213_v9, %v14873_v19 }
 0x42e   : > { %v8215_v18 = vpop.f32.mrf.mxu1 }
 0x42f   : > { %v8307_v56 = vpack.c.bf16 %v8279_v31, %v8277_v35  ;;  %v8216_v7 = vadd.f32 %v8215_v18, %v14870_v50  ;;  %v8280_v14 = vmax.f32 %v8214_v24, 0.0 }
 0x430   : > { %v8217_v57 = vpop.f32.mrf.mxu1 }
 0x431   : > { %v8218_v25 = vadd.f32 %v8217_v57, %v14873_v19  ;;  %8566 = vmatprep.mubr.bf16.mxu0 %v8307_v56  ;;  %v8281_v37 = vmax.f32 %v8216_v7, 0.0 }
 0x432   : > { %v8219_v16 = vpop.f32.mrf.mxu1  ;;  %8567 = vmatmul.mubr.bf16.gmra.mxu0 %v8306_v44 }
 0x433   : > { %v8220_v63 = vadd.f32 %v8219_v16, %v14870_v50  ;;  %v8282_v40 = vmax.f32 %v8218_v25, 0.0 }
 0x434   : > { %v8223_v34 = vpop.f32.mrf.mxu1 }
 0x435   : > { %v8283_v3 = vmax.f32 %v8220_v63, 0.0  ;;  %v8308_v52 = vpack.c.bf16 %v8282_v40, %v8280_v14  ;;  %v8224_v6 = vadd.f32 %v8223_v34, %v14873_v19 }
 0x436   : > { %v8225_v23 = vpop.f32.mrf.mxu1 }
 0x437   : > { %v8309_v61 = vpack.c.bf16 %v8283_v3, %v8281_v37  ;;  %v8226_v42 = vadd.f32 %v8225_v23, %v14870_v50  ;;  %v8284_v10 = vmax.f32 %v8224_v6, 0.0 }
 0x438   : > { %v8227_v12 = vpop.f32.mrf.mxu1 }
 0x439   : > { %v8228_v20 = vadd.f32 %v8227_v12, %v14873_v19  ;;  %8576 = vmatprep.mubr.bf16.mxu0 %v8309_v61  ;;  %v8285_v39 = vmax.f32 %v8226_v42, 0.0 }
 0x43a   : > { %v8229_v13 = vpop.f32.mrf.mxu1  ;;  %8577 = vmatmul.mubr.bf16.gmra.mxu0 %v8308_v52 }
 0x43b   : > { %v8230_v59 = vadd.f32 %v8229_v13, %v14870_v50  ;;  %v8286_v55 = vmax.f32 %v8228_v20, 0.0 }
 0x43c   : > { %v8233_v17 = vpop.f32.mrf.mxu1 }
 0x43d   : > { %v8287_v11 = vmax.f32 %v8230_v59, 0.0  ;;  %v8310_v26 = vpack.c.bf16 %v8286_v55, %v8284_v10  ;;  %v8234_v54 = vadd.f32 %v8233_v17, %v14873_v19  ;;  %v15175_v10 = vld [vmem:[#allocation3_spill] sm:$0xff] }
 0x43e   : > { %v8235_v46 = vpop.f32.mrf.mxu1 }
 0x43f   : > { %v8311_v2 = vpack.c.bf16 %v8287_v11, %v8285_v39  ;;  %v8236_v62 = vadd.f32 %v8235_v46, %v14870_v50  ;;  %v8288_v28 = vmax.f32 %v8234_v54, 0.0  ;;  %v8669_v39 = vld [vmem:[%s15039_s7] sm:$0x3]  ;;  %v8678_v46 = vsub.s32 2, %v15175_v10 }
 0x440   : > { %v8237_v0 = vpop.f32.mrf.mxu1  ;;  %v8670_v11 = vunpack.c.l.bf16 %v8669_v39 }
 0x441   : > { %v8238_v45 = vadd.f32 %v8237_v0, %v14873_v19  ;;  %8586 = vmatprep.mubr.bf16.mxu0 %v8311_v2  ;;  %v8289_v30 = vmax.f32 %v8236_v62, 0.0 }
 0x442   : > { %v8239_v58 = vpop.f32.mrf.mxu1  ;;  %8587 = vmatmul.mubr.bf16.gmra.mxu0 %v8310_v26  ;;  %v8675_v26 = vrot.slane %v8670_v11, %v15174_v48  ;;  %v8679_v0 = vrot.slane %v8670_v11, %v8678_v46 }
 0x443   : > { %v8240_v29 = vadd.f32 %v8239_v58, %v14870_v50  ;;  %v8290_v41 = vmax.f32 %v8238_v45, 0.0 }
 0x444   : > { %v8243_v4 = vpop.f32.mrf.mxu1 }
 0x445   : > { %v8291_v5 = vmax.f32 %v8240_v29, 0.0  ;;  %v8312_v1 = vpack.c.bf16 %v8290_v41, %v8288_v28  ;;  %v8244_v36 = vadd.f32 %v8243_v4, %v14873_v19  ;;  %v14924_v41 = vrot.slane %v8675_v26, %v15174_v48 }
 0x446   : > { %v8245_v51 = vpop.f32.mrf.mxu1  ;;  %v14927_v4 = vrot.slane %v8679_v0, %v15174_v48 }
 0x447   : > { %v8313_v15 = vpack.c.bf16 %v8291_v5, %v8289_v30  ;;  %v8246_v8 = vadd.f32 %v8245_v51, %v14870_v50  ;;  %v8292_v60 = vmax.f32 %v8244_v36, 0.0 }
 0x448   : > { %v8247_v38 = vpop.f32.mrf.mxu1 }
 0x449   : > { %v8248_v22 = vadd.f32 %v8247_v38, %v14873_v19  ;;  %8596 = vmatprep.mubr.bf16.mxu1 %v8313_v15  ;;  %v8293_v27 = vmax.f32 %v8246_v8, 0.0 }
 0x44a   : > { %v8249_v47 = vpop.f32.mrf.mxu1  ;;  %8597 = vmatmul.mubr.bf16.vlgmr.msra.gmra.mxu1 %v8312_v1 }
 0x44b   : > { %v8250_v49 = vadd.f32 %v8249_v47, %v14870_v50  ;;  %v8294_v32 = vmax.f32 %v8248_v22, 0.0 }
 0x44c   : > { %v8253_v21 = vpop.f32.mrf.mxu1 }
 0x44d   : > { %v8295_v43 = vmax.f32 %v8250_v49, 0.0  ;;  %v8314_v31 = vpack.c.bf16 %v8294_v32, %v8292_v60  ;;  %v8254_v44 = vadd.f32 %v8253_v21, %v14873_v19 }
 0x44e   : > { %v8255_v9 = vpop.f32.mrf.mxu1 }
 0x44f   : > { %v8315_v35 = vpack.c.bf16 %v8295_v43, %v8293_v27  ;;  %v8256_v18 = vadd.f32 %v8255_v9, %v14870_v50  ;;  %v8296_v40 = vmax.f32 %v8254_v44, 0.0 }
 0x450   : > { %v8257_v53 = vpop.f32.mrf.mxu1 }
 0x451   : > { %v8258_v56 = vadd.f32 %v8257_v53, %v14873_v19  ;;  %8606 = vmatprep.mubr.bf16.mxu1 %v8315_v35  ;;  %v8297_v16 = vmax.f32 %v8256_v18, 0.0 }
 0x452   : > { %v8259_v57 = vpop.f32.mrf.mxu1  ;;  %8607 = vmatmul.mubr.bf16.gmra.mxu1 %v8314_v31 }
 0x453   : > { %v8260_v7 = vadd.f32 %v8259_v57, %v14870_v50  ;;  %v8298_v25 = vmax.f32 %v8258_v56, 0.0 }
 0x454   : > { %v8263_v24 = vpop.f32.mrf.mxu1 }
 0x455   : > { %v8299_v63 = vmax.f32 %v8260_v7, 0.0  ;;  %v8316_v3 = vpack.c.bf16 %v8298_v25, %v8296_v40  ;;  %v8264_v52 = vadd.f32 %v8263_v24, %v14873_v19 }
 0x456   : > { %v8265_v34 = vpop.f32.mrf.mxu1 }
 0x457   : > { %v8317_v37 = vpack.c.bf16 %v8299_v63, %v8297_v16  ;;  %v8266_v23 = vadd.f32 %v8265_v34, %v14870_v50  ;;  %v8300_v59 = vmax.f32 %v8264_v52, 0.0 }
 0x458   : > { %v8267_v14 = vpop.f32.mrf.mxu1 }
 0x459   : > { %v8268_v61 = vadd.f32 %v8267_v14, %v14873_v19  ;;  %8616 = vmatprep.mubr.bf16.mxu1 %v8317_v37  ;;  %v8301_v6 = vmax.f32 %v8266_v23, 0.0  ;;  %v8352_v19 = vld [vmem:[%s15038_s6] sm:$0x3] }
 0x45a   : > { %v8269_v12 = vpop.f32.mrf.mxu1  ;;  %8617 = vmatmul.mubr.bf16.gmra.mxu1 %v8316_v3  ;;  %v14918_v2 = vrot.slane %v8352_v19, %v15173_v33 }
 0x45b   : > { %v8270_v42 = vadd.f32 %v8269_v12, %v14870_v50  ;;  %v8302_v20 = vmax.f32 %v8268_v61, 0.0  ;;  %v14915_v50 = vrot.slane %v8352_v19, %v15174_v48 }
 0x45d   : > { %v8303_v13 = vmax.f32 %v8270_v42, 0.0  ;;  %v8318_v17 = vpack.c.bf16 %v8302_v20, %v8300_v59 }
 0x45f   : > { %v8319_v55 = vpack.c.bf16 %v8303_v13, %v8301_v6 }
 0x461   : > { %8626 = vmatprep.mubr.bf16.mxu1 %v8319_v55 }
 0x462   : > { %8627 = vmatmul.mubr.bf16.gmra.mxu1 %v8318_v17 }
 0x4ea   : > { %v8558_v62 = vpop.f32.mrf.mxu0 }
 0x4eb   : > { %v8559_v45 = vadd.f32 %v8558_v62, %v14915_v50 }
 0x4ec   : > { %v8560_v54 = vpop.f32.mrf.mxu0 }
 0x4ed   : > { %v8637_v58 = vmax.f32 %v8559_v45, 0.0  ;;  %v8561_v29 = vadd.f32 %v8560_v54, %v14918_v2 }
 0x4ee   : > { %v8562_v30 = vpop.f32.mrf.mxu0 }
 0x4ef   : > { %v8638_v5 = vmax.f32 %v8561_v29, 0.0  ;;  %v8563_v33 = vadd.f32 %v8562_v30, %v14915_v50  ;;  %v8690_v1 = vmul.f32 %v14924_v41, %v8637_v58 }
 0x4f0   : > { %v8564_v28 = vpop.f32.mrf.mxu0 }
 0x4f1   : > { %v8639_v51 = vmax.f32 %v8563_v33, 0.0  ;;  %v8565_v15 = vadd.f32 %v8564_v28, %v14918_v2  ;;  %v8691_v38 = vmul.f32 %v14927_v4, %v8638_v5 }
 0x4f2   : > { %v8568_v8 = vpop.f32.mrf.mxu0 }
 0x4f3   : > { %v8640_v22 = vmax.f32 %v8565_v15, 0.0  ;;  %v8569_v36 = vadd.f32 %v8568_v8, %v14915_v50  ;;  %v8722_v47 = vadd.f32 %v8691_v38, %v8690_v1  ;;  %v8692_v48 = vmul.f32 %v14924_v41, %v8639_v51 }
 0x4f4   : > { %v8570_v49 = vpop.f32.mrf.mxu0 }
 0x4f5   : > { %v8693_v32 = vmul.f32 %v14927_v4, %v8640_v22  ;;  %v8641_v21 = vmax.f32 %v8569_v36, 0.0  ;;  %v8571_v27 = vadd.f32 %v8570_v49, %v14918_v2  ;;  %8723 = vadd.xlane.f32.xlu0 %v8722_v47 }
 0x4f6   : > { %v8572_v43 = vpop.f32.mrf.mxu0 }
 0x4f7   : > { %v8642_v60 = vmax.f32 %v8571_v27, 0.0  ;;  %v8573_v9 = vadd.f32 %v8572_v43, %v14915_v50  ;;  %v8725_v35 = vadd.f32 %v8693_v32, %v8692_v48  ;;  %v8694_v56 = vmul.f32 %v14924_v41, %v8641_v21 }
 0x4f8   : > { %v8574_v31 = vpop.f32.mrf.mxu0 }
 0x4f9   : > { %v8643_v53 = vmax.f32 %v8573_v9, 0.0  ;;  %v8575_v18 = vadd.f32 %v8574_v31, %v14918_v2  ;;  %8726 = vadd.xlane.f32.xlu0 %v8725_v35  ;;  %v8695_v44 = vmul.f32 %v14927_v4, %v8642_v60 }
 0x4fa   : > { %v8578_v57 = vpop.f32.mrf.mxu0 }
 0x4fb   : > { %v8644_v7 = vmax.f32 %v8575_v18, 0.0  ;;  %v8579_v25 = vadd.f32 %v8578_v57, %v14915_v50  ;;  %v8728_v24 = vadd.f32 %v8695_v44, %v8694_v56  ;;  %v8696_v63 = vmul.f32 %v14924_v41, %v8643_v53 }
 0x4fc   : > { %v8580_v16 = vpop.f32.mrf.mxu0 }
 0x4fd   : > { %v8697_v40 = vmul.f32 %v14927_v4, %v8644_v7  ;;  %v8645_v34 = vmax.f32 %v8579_v25, 0.0  ;;  %v8581_v37 = vadd.f32 %v8580_v16, %v14918_v2  ;;  %8729 = vadd.xlane.f32.xlu1 %v8728_v24 }
 0x4fe   : > { %v8582_v3 = vpop.f32.mrf.mxu0 }
 0x4ff   : > { %v8646_v14 = vmax.f32 %v8581_v37, 0.0  ;;  %v8583_v23 = vadd.f32 %v8582_v3, %v14915_v50  ;;  %v8731_v61 = vadd.f32 %v8697_v40, %v8696_v63  ;;  %v8698_v12 = vmul.f32 %v14924_v41, %v8645_v34 }
 0x500   : > { %v8584_v52 = vpop.f32.mrf.mxu0 }
 0x501   : > { %v8699_v42 = vmul.f32 %v14927_v4, %v8646_v14  ;;  %v8647_v20 = vmax.f32 %v8583_v23, 0.0  ;;  %v8585_v6 = vadd.f32 %v8584_v52, %v14918_v2  ;;  %8732 = vadd.xlane.f32.xlu1 %v8731_v61 }
 0x502   : > { %v8588_v13 = vpop.f32.mrf.mxu0 }
 0x503   : > { %v8648_v59 = vmax.f32 %v8585_v6, 0.0  ;;  %v8589_v55 = vadd.f32 %v8588_v13, %v14915_v50  ;;  %v8734_v17 = vadd.f32 %v8699_v42, %v8698_v12  ;;  %v8700_v19 = vmul.f32 %v14924_v41, %v8647_v20 }
 0x504   : > { %v8590_v39 = vpop.f32.mrf.mxu0 }
 0x505   : > { %v8701_v11 = vmul.f32 %v14927_v4, %v8648_v59  ;;  %v8649_v10 = vmax.f32 %v8589_v55, 0.0  ;;  %v8591_v46 = vadd.f32 %v8590_v39, %v14918_v2  ;;  %8735 = vadd.xlane.f32.xlu0 %v8734_v17 }
 0x506   : > { %v8592_v26 = vpop.f32.mrf.mxu0 }
 0x507   : > { %v8650_v0 = vmax.f32 %v8591_v46, 0.0  ;;  %v8593_v62 = vadd.f32 %v8592_v26, %v14915_v50  ;;  %v8737_v45 = vadd.f32 %v8701_v11, %v8700_v19  ;;  %v8702_v58 = vmul.f32 %v14924_v41, %v8649_v10 }
 0x508   : > { %v8594_v54 = vpop.f32.mrf.mxu0 }
 0x509   : > { %v8703_v29 = vmul.f32 %v14927_v4, %v8650_v0  ;;  %v8651_v30 = vmax.f32 %v8593_v62, 0.0  ;;  %v8595_v5 = vadd.f32 %v8594_v54, %v14918_v2  ;;  %8738 = vadd.xlane.f32.xlu1 %v8737_v45 }
 0x50a   : > { %v8598_v33 = vpop.f32.mrf.mxu1 }
 0x50b   : > { %v8652_v28 = vmax.f32 %v8595_v5, 0.0  ;;  %v8599_v51 = vadd.f32 %v8598_v33, %v14915_v50  ;;  %v8740_v15 = vadd.f32 %v8703_v29, %v8702_v58  ;;  %v8704_v38 = vmul.f32 %v14924_v41, %v8651_v30 }
 0x50c   : > { %v8600_v1 = vpop.f32.mrf.mxu1 }
 0x50d   : > { %v8705_v8 = vmul.f32 %v14927_v4, %v8652_v28  ;;  %v8653_v22 = vmax.f32 %v8599_v51, 0.0  ;;  %v8601_v36 = vadd.f32 %v8600_v1, %v14918_v2  ;;  %8741 = vadd.xlane.f32.xlu0 %v8740_v15 }
 0x50e   : > { %v8602_v47 = vpop.f32.mrf.mxu1 }
 0x50f   : > { %v8654_v49 = vmax.f32 %v8601_v36, 0.0  ;;  %v8603_v48 = vadd.f32 %v8602_v47, %v14915_v50  ;;  %v8743_v32 = vadd.f32 %v8705_v8, %v8704_v38  ;;  %v8706_v27 = vmul.f32 %v14924_v41, %v8653_v22 }
 0x510   : > { %v8604_v21 = vpop.f32.mrf.mxu1 }
 0x511   : > { %v8707_v43 = vmul.f32 %v14927_v4, %v8654_v49  ;;  %v8655_v60 = vmax.f32 %v8603_v48, 0.0  ;;  %v8605_v9 = vadd.f32 %v8604_v21, %v14918_v2  ;;  %8744 = vadd.xlane.f32.xlu1 %v8743_v32 }
 0x512   : > { %v8608_v35 = vpop.f32.mrf.mxu1 }
 0x513   : > { %v8656_v31 = vmax.f32 %v8605_v9, 0.0  ;;  %v8609_v53 = vadd.f32 %v8608_v35, %v14915_v50  ;;  %v8746_v18 = vadd.f32 %v8707_v43, %v8706_v27  ;;  %v8708_v44 = vmul.f32 %v14924_v41, %v8655_v60 }
 0x514   : > { %v8610_v56 = vpop.f32.mrf.mxu1 }
 0x515   : > { %v8709_v57 = vmul.f32 %v14927_v4, %v8656_v31  ;;  %v8657_v7 = vmax.f32 %v8609_v53, 0.0  ;;  %v8611_v25 = vadd.f32 %v8610_v56, %v14918_v2  ;;  %8747 = vadd.xlane.f32.xlu0 %v8746_v18 }
 0x516   : > { %v8612_v24 = vpop.f32.mrf.mxu1 }
 0x517   : > { %v8658_v16 = vmax.f32 %v8611_v25, 0.0  ;;  %v8613_v63 = vadd.f32 %v8612_v24, %v14915_v50  ;;  %v8749_v40 = vadd.f32 %v8709_v57, %v8708_v44  ;;  %v8710_v37 = vmul.f32 %v14924_v41, %v8657_v7 }
 0x518   : > { %v8614_v34 = vpop.f32.mrf.mxu1 }
 0x519   : > { %v8711_v3 = vmul.f32 %v14927_v4, %v8658_v16  ;;  %v8659_v14 = vmax.f32 %v8613_v63, 0.0  ;;  %v8615_v23 = vadd.f32 %v8614_v34, %v14918_v2  ;;  %8750 = vadd.xlane.f32.xlu1 %v8749_v40 }
 0x51a   : > { %v8618_v61 = vpop.f32.mrf.mxu1 }
 0x51b   : > { %v8660_v52 = vmax.f32 %v8615_v23, 0.0  ;;  %v8619_v12 = vadd.f32 %v8618_v61, %v14915_v50  ;;  %v8752_v42 = vadd.f32 %v8711_v3, %v8710_v37  ;;  %v8712_v6 = vmul.f32 %v14924_v41, %v8659_v14 }
 0x51c   : > { %v8620_v20 = vpop.f32.mrf.mxu1 }
 0x51d   : > { %v8713_v13 = vmul.f32 %v14927_v4, %v8660_v52  ;;  %v8661_v59 = vmax.f32 %v8619_v12, 0.0  ;;  %v8621_v55 = vadd.f32 %v8620_v20, %v14918_v2  ;;  %8753 = vadd.xlane.f32.xlu0 %v8752_v42 }
 0x51e   : > { %v8622_v17 = vpop.f32.mrf.mxu1 }
 0x51f   : > { %v8662_v39 = vmax.f32 %v8621_v55, 0.0  ;;  %v8623_v19 = vadd.f32 %v8622_v17, %v14915_v50  ;;  %v8755_v11 = vadd.f32 %v8713_v13, %v8712_v6  ;;  %v8714_v46 = vmul.f32 %v14924_v41, %v8661_v59 }
 0x520   : > { %v8624_v10 = vpop.f32.mrf.mxu1 }
 0x521   : > { %v8715_v26 = vmul.f32 %v14927_v4, %v8662_v39  ;;  %v8663_v0 = vmax.f32 %v8623_v19, 0.0  ;;  %v8625_v62 = vadd.f32 %v8624_v10, %v14918_v2  ;;  %8756 = vadd.xlane.f32.xlu1 %v8755_v11 }
 0x522   : > { %v8628_v45 = vpop.f32.mrf.mxu1 }
 0x523   : > { %v8664_v54 = vmax.f32 %v8625_v62, 0.0  ;;  %v8629_v58 = vadd.f32 %v8628_v45, %v14915_v50  ;;  %v8758_v29 = vadd.f32 %v8715_v26, %v8714_v46  ;;  %v8716_v5 = vmul.f32 %v14924_v41, %v8663_v0 }
 0x524   : > { %v8630_v30 = vpop.f32.mrf.mxu1 }
 0x525   : > { %v8717_v33 = vmul.f32 %v14927_v4, %v8664_v54  ;;  %v8665_v28 = vmax.f32 %v8629_v58, 0.0  ;;  %v8631_v51 = vadd.f32 %v8630_v30, %v14918_v2  ;;  %8759 = vadd.xlane.f32.xlu0 %v8758_v29 }
 0x526   : > { %v8632_v15 = vpop.f32.mrf.mxu1 }
 0x527   : > { %v8666_v1 = vmax.f32 %v8631_v51, 0.0  ;;  %v8633_v38 = vadd.f32 %v8632_v15, %v14915_v50  ;;  %v8761_v8 = vadd.f32 %v8717_v33, %v8716_v5  ;;  %v8718_v36 = vmul.f32 %v14924_v41, %v8665_v28  ;;  %v9846_v50 = vld [vmem:[#allocation2] ss:$0 sm:$0xff] }
 0x528   : > { %v8634_v22 = vpop.f32.mrf.mxu1 }
 0x529   : > { %v8719_v47 = vmul.f32 %v14927_v4, %v8666_v1  ;;  %v8667_v49 = vmax.f32 %v8633_v38, 0.0  ;;  %v8635_v48 = vadd.f32 %v8634_v22, %v14918_v2  ;;  %8762 = vadd.xlane.f32.xlu1 %v8761_v8 }
 0x52b   : > { %v8668_v32 = vmax.f32 %v8635_v48, 0.0  ;;  %v8764_v21 = vadd.f32 %v8719_v47, %v8718_v36  ;;  %v8720_v27 = vmul.f32 %v14924_v41, %v8667_v49 }
 0x52d   : > { %v8721_v43 = vmul.f32 %v14927_v4, %v8668_v32  ;;  %8765 = vadd.xlane.f32.xlu0 %v8764_v21 }
 0x52f   : > { %v8767_v60 = vadd.f32 %v8721_v43, %v8720_v27 }
 0x531   : > { %8768 = vadd.xlane.f32.xlu1 %v8767_v60 }
 0x57e   : > { %v8724_v2 = vpop.xlane.xlu0 %8723 }
 0x57f   : > { %v8777_v41 = vadd.f32 %v9846_v50, %v8724_v2 }
 0x581   : > { %8794 = vst.msk [vmem:[%s14995_s20] sm:$0xff] %vm8793_vm2, %v8777_v41 }
 0x582   : > { %v8727_v4 = vpop.xlane.xlu0 %8726 }
 0x583   : > { %v8778_v9 = vadd.f32 %v9846_v50, %v8727_v4 }
 0x585   : > { %8795 = vst.msk [vmem:[%s14995_s20 + $0x8] sm:$0xff] %vm8793_vm2, %v8778_v9 }
 0x586   : > { %v8730_v35 = vpop.xlane.xlu1 %8729 }
 0x587   : > { %v8779_v31 = vadd.f32 %v9846_v50, %v8730_v35 }
 0x589   : > { %8796 = vst.msk [vmem:[%s14995_s20 + $0x10] sm:$0xff] %vm8793_vm2, %v8779_v31 }
 0x58a   : > { %v8733_v53 = vpop.xlane.xlu1 %8732 }
 0x58b   : > { %v8780_v18 = vadd.f32 %v9846_v50, %v8733_v53 }
 0x58d   : > { %8797 = vst.msk [vmem:[%s14995_s20 + $0x18] sm:$0xff] %vm8793_vm2, %v8780_v18 }
 0x58e   : > { %v8736_v56 = vpop.xlane.xlu0 %8735 }
 0x58f   : > { %v8781_v44 = vadd.f32 %v9846_v50, %v8736_v56 }
 0x591   : > { %8798 = vst.msk [vmem:[%s14995_s20 + $0x20] sm:$0xff] %vm8793_vm2, %v8781_v44 }
 0x592   : > { %v8739_v57 = vpop.xlane.xlu1 %8738 }
 0x593   : > { %v8782_v7 = vadd.f32 %v9846_v50, %v8739_v57 }
 0x595   : > { %8799 = vst.msk [vmem:[%s14995_s20 + $0x28] sm:$0xff] %vm8793_vm2, %v8782_v7 }
 0x596   : > { %v8742_v25 = vpop.xlane.xlu0 %8741 }
 0x597   : > { %v8783_v24 = vadd.f32 %v9846_v50, %v8742_v25 }
 0x599   : > { %8800 = vst.msk [vmem:[%s14995_s20 + $0x30] sm:$0xff] %vm8793_vm2, %v8783_v24 }
 0x59a   : > { %v8745_v16 = vpop.xlane.xlu1 %8744 }
 0x59b   : > { %v8784_v63 = vadd.f32 %v9846_v50, %v8745_v16 }
 0x59d   : > { %8801 = vst.msk [vmem:[%s14995_s20 + $0x38] sm:$0xff] %vm8793_vm2, %v8784_v63 }
 0x59e   : > { %v8748_v40 = vpop.xlane.xlu0 %8747 }
 0x59f   : > { %v8785_v34 = vadd.f32 %v9846_v50, %v8748_v40 }
 0x5a1   : > { %8802 = vst.msk [vmem:[%s14995_s20 + $0x40] sm:$0xff] %vm8793_vm2, %v8785_v34 }
 0x5a2   : > { %v8751_v37 = vpop.xlane.xlu1 %8750 }
 0x5a3   : > { %v8786_v3 = vadd.f32 %v9846_v50, %v8751_v37 }
 0x5a5   : > { %8803 = vst.msk [vmem:[%s14995_s20 + $0x48] sm:$0xff] %vm8793_vm2, %v8786_v3 }
 0x5a6   : > { %v8754_v14 = vpop.xlane.xlu0 %8753 }
 0x5a7   : > { %v8787_v23 = vadd.f32 %v9846_v50, %v8754_v14 }
 0x5a9   : > { %8804 = vst.msk [vmem:[%s14995_s20 + $0x50] sm:$0xff] %vm8793_vm2, %v8787_v23 }
 0x5aa   : > { %v8757_v61 = vpop.xlane.xlu1 %8756 }
 0x5ab   : > { %v8788_v52 = vadd.f32 %v9846_v50, %v8757_v61 }
 0x5ad   : > { %8805 = vst.msk [vmem:[%s14995_s20 + $0x58] sm:$0xff] %vm8793_vm2, %v8788_v52 }
 0x5ae   : > { %v8760_v12 = vpop.xlane.xlu0 %8759 }
 0x5af   : > { %v8789_v42 = vadd.f32 %v9846_v50, %v8760_v12 }
 0x5b1   : > { %8806 = vst.msk [vmem:[%s14995_s20 + $0x60] sm:$0xff] %vm8793_vm2, %v8789_v42 }
 0x5b2   : > { %v8763_v20 = vpop.xlane.xlu1 %8762 }
 0x5b3   : > { %v8790_v6 = vadd.f32 %v9846_v50, %v8763_v20 }
 0x5b5   : > { %8807 = vst.msk [vmem:[%s14995_s20 + $0x68] sm:$0xff] %vm8793_vm2, %v8790_v6 }
 0x5b6   : > { %v8766_v13 = vpop.xlane.xlu0 %8765 }
 0x5b7   : > { %v8791_v59 = vadd.f32 %v9846_v50, %v8766_v13 }
 0x5b9   : > { %8808 = vst.msk [vmem:[%s14995_s20 + $0x70] sm:$0xff] %vm8793_vm2, %v8791_v59 }
 0x5ba   : > { %v8769_v55 = vpop.xlane.xlu1 %8768 }
 0x5bb   : > { %v8792_v17 = vadd.f32 %v9846_v50, %v8769_v55 }
 0x5bd   : > { %8809 = vst.msk [vmem:[%s14995_s20 + $0x78] sm:$0xff] %vm8793_vm2, %v8792_v17 }
 0x5be PF: > { %s21_s11 = sadd.s32 1, %s11338_s11  }
 0x5bf   : > { %p18_p4 = scmp.ge.s32.totalorder %s21_s11, 6  }
 0x5c1   :  { %20 = sbr.rel (!%p18_p4) target bundleno = 3 (0x3), region = 86 }

</bundles_post_ra>
